<compile_context>
chip_gen: v7x
topology: tpu7x:2x2x1
jax: 0.10.0
libtpu: 0.0.40
codegen_flags: <defaults>
</compile_context>

<pallas_src>
import functools
import numpy as np
import jax
import jax.numpy as jnp
from jax.experimental import pallas as pl
from jax.experimental.pallas import tpu as pltpu

# Model hyper-parameters (defaults of ResNet_Model.__init__).
KSIZE = 4        # first conv kernel size
STRIDE = 1       # first conv stride (grid placement assumes 1)
NUM_BLOCKS = 5
C_IN = 4
C_MID = 8
C_OUT = 4
BN_EPS = 1e-5

LANE = 128


def _round_up(v, m):
    return ((int(v) + m - 1) // m) * m


def resnet_kernel(x_ref, mask_ref, w1_ref, b1_ref, wres_ref,
                  gamma_ref, beta_ref, wfc_ref, bfc_ref, out_ref, ext_ref,
                  *, grid_w, img_lanes, n_imgs, mgp, padl, inv_cnt, inv_pool):
    """Whole forward pass in one kernel invocation (everything in VMEM).

    Layout: activations are (C_MID, MGP) -- channels in sublanes, the flattened
    zero-padded (N, H+2, W+2) spatial grid in lanes (tail lanes past the real
    grid are dead and kept zero via the mask).

    x_ref     : (C_MID, MGP)  padded input, channels 0..C_IN-1 live, rest zero
    mask_ref  : (C_MID, MGP)  1.0 at valid (interior) conv-output lanes
    w1_ref    : (K*K*C_MID, C_MID)  rows = (tap, cout), cols = cin (zero-padded)
    b1_ref    : (C_MID, 1)
    wres_ref  : (3*3*C_MID, C_MID)  shared residual conv weight, same ordering
    gamma/beta: (C_MID, 1)          shared BatchNorm affine parameters
    wfc_ref   : (C_OUT, C_MID), bfc_ref : (C_OUT, 1)
    out_ref   : (C_OUT, n_imgs)     transposed logits (wrapper transposes back)
    ext_ref   : (C_MID, padl+MGP+padr) zero-halo VMEM scratch for tap shifts
    """
    mask = mask_ref[...]                                    # (C_MID, MGP)

    # Zero the halo scratch once; the interior is rewritten before every conv.
    ext_ref[...] = jnp.zeros_like(ext_ref)

    def conv(act, w_ref, ksize):
        # Per-tap MXU accumulation: acc += W_tap @ shifted(act).  The shift is
        # a static lane slice of the persistent zero-halo scratch (padding=1).
        ext_ref[:, padl:padl + mgp] = act                   # lane-aligned store
        ext = ext_ref[...]
        acc = None
        for kh in range(ksize):
            for kw in range(ksize):
                d = (kh - 1) * grid_w + (kw - 1)
                shifted = ext[:, padl + d:padl + d + mgp]   # (C_MID, MGP)
                t = kh * ksize + kw
                wt = w_ref[t * C_MID:(t + 1) * C_MID, :]    # (cout, cin), 8-row aligned
                part = jnp.dot(wt, shifted, preferred_element_type=jnp.float32)
                acc = part if acc is None else acc + part
        return acc

    # ---- Conv2d(4, 8, kernel=4, stride=1, pad=1) + bias; zero off-interior ----
    cur = (conv(x_ref[...], w1_ref, KSIZE) + b1_ref[...]) * mask

    # ---- residual blocks: the SAME weights reused NUM_BLOCKS times ----
    gamma = gamma_ref[...]                                  # (C_MID, 1)
    beta = beta_ref[...]
    for _ in range(NUM_BLOCKS):
        c = conv(cur, wres_ref, 3)
        mc = c * mask                                       # masked conv output
        # BatchNorm2d (training mode): biased batch stats over interior lanes.
        mean = jnp.sum(mc, axis=1, keepdims=True) * inv_cnt        # (C_MID, 1)
        ex2 = jnp.sum(mc * mc, axis=1, keepdims=True) * inv_cnt    # mask^2 == mask
        var = ex2 - mean * mean
        scale = gamma * jax.lax.rsqrt(var + BN_EPS)         # folded scale (EUP rsqrt)
        shift = beta - mean * scale
        y = mc * scale + shift * mask                       # exactly 0 off-interior
        cur = cur + jnp.maximum(y, 0.0)                     # relu + residual add

    # ---- AdaptiveAvgPool2d(1): masked per-image lane reduction (cur is masked) ----
    lane = jax.lax.broadcasted_iota(jnp.int32, (C_MID, mgp), 1)
    cols = []
    for im in range(n_imgs):
        lo, hi = im * img_lanes, (im + 1) * img_lanes
        sel = jnp.where((lane >= lo) & (lane < hi), cur, 0.0)
        cols.append(jnp.sum(sel, axis=1, keepdims=True))
    pooled = jnp.concatenate(cols, axis=1) * inv_pool       # (C_MID, n_imgs)

    # ---- Linear(8, 4): one tiny MXU matmul, result kept transposed ----
    out_ref[...] = (jnp.dot(wfc_ref[...], pooled,
                            preferred_element_type=jnp.float32) + bfc_ref[...])
    # TODO(synk): BatchNorm running-stat buffer updates are a training-time side
    # effect that does not change the returned forward value; not reproduced.


@jax.jit
def resnet_forward(x_nchw, w1, b1, wres, gamma, beta, wfc, bfc):
    assert STRIDE == 1 and KSIZE >= 3, "grid placement assumes stride=1, k>=3"
    n, c_in, h, w = x_nchw.shape
    hg, wg = h + 2, w + 2                        # padded grid used for ALL stages
    ho = (h + 2 - KSIZE) // STRIDE + 1
    wo = (w + 2 - KSIZE) // STRIDE + 1
    mg = n * hg * wg
    mgp = _round_up(mg, LANE)                    # lane-dense activation width
    padl = _round_up(wg + 1, LANE)               # >= |most negative tap offset|
    padr = _round_up((KSIZE - 2) * (wg + 1), LANE)  # >= most positive tap offset

    # NCHW -> (C_MID, MGP): channels in sublanes (zero-padded 4->8), flattened
    # zero-padded spatial grid in lanes (zero-padded to a multiple of 128).
    xc = jnp.transpose(x_nchw, (1, 0, 2, 3)).astype(jnp.float32)   # (C, N, H, W)
    xp = jnp.pad(xc, ((0, C_MID - c_in), (0, 0), (1, 1), (1, 1)))  # (8, N, Hg, Wg)
    xflat = jnp.pad(xp.reshape(C_MID, mg), ((0, 0), (0, mgp - mg)))

    # Interior mask: trace-time numpy constant (no tiny XLA builder ops).
    # Conv outputs live at grid rows 1..ho, cols 1..wo of every image.
    m2 = np.zeros((hg, wg), np.float32)
    m2[1:1 + ho, 1:1 + wo] = 1.0
    mflat = np.concatenate([np.tile(m2.reshape(-1), n),
                            np.zeros(mgp - mg, np.float32)])
    mask8 = np.ascontiguousarray(np.broadcast_to(mflat[None, :], (C_MID, mgp)))

    kernel = functools.partial(
        resnet_kernel, grid_w=wg, img_lanes=hg * wg, n_imgs=n, mgp=mgp,
        padl=padl, inv_cnt=1.0 / float(n * ho * wo),
        inv_pool=1.0 / float(ho * wo))

    flops = (2 * mgp * C_MID * (KSIZE * KSIZE * C_MID + NUM_BLOCKS * 9 * C_MID)
             + NUM_BLOCKS * 12 * mgp * C_MID + 2 * n * C_MID * C_OUT)
    bytes_accessed = 4 * (2 * C_MID * mgp + KSIZE * KSIZE * C_MID * C_MID
                          + 9 * C_MID * C_MID + 5 * C_MID
                          + C_OUT * C_MID + C_OUT + n * C_OUT)

    vmem = pl.BlockSpec(memory_space=pltpu.MemorySpace.VMEM)
    out_t = pl.pallas_call(
        kernel,
        out_shape=jax.ShapeDtypeStruct((C_OUT, n), jnp.float32),
        in_specs=[vmem] * 9,
        out_specs=vmem,
        scratch_shapes=[pltpu.VMEM((C_MID, padl + mgp + padr), jnp.float32)],
        cost_estimate=pl.CostEstimate(flops=int(flops),
                                      transcendentals=NUM_BLOCKS * C_MID,
                                      bytes_accessed=int(bytes_accessed)),
    )(xflat, mask8, w1, b1, wres, gamma, beta, wfc, bfc)
    return out_t.T                               # (N, C_OUT)


def init_params(key):
    """Deterministic synthetic parameters, stored in PyTorch layouts."""
    k1, k2, k3, k4, k5 = jax.random.split(key, 5)
    return dict(
        w1=jax.random.normal(k1, (C_MID, C_IN, KSIZE, KSIZE), jnp.float32) * 0.1,
        b1=jax.random.normal(k2, (C_MID,), jnp.float32) * 0.1,
        wres=jax.random.normal(k3, (C_MID, C_MID, 3, 3), jnp.float32) * 0.1,
        gamma=jnp.ones((C_MID,), jnp.float32),
        beta=jnp.zeros((C_MID,), jnp.float32),
        wfc=jax.random.normal(k4, (C_OUT, C_MID), jnp.float32) * 0.1,
        bfc=jax.random.normal(k5, (C_OUT,), jnp.float32) * 0.1,
    )


def to_kernel_layout(p):
    """PyTorch layouts -> layouts the kernel expects."""
    # Conv weights -> rows = (tap, cout), cols = cin; conv1 cin zero-padded to 8.
    w1 = jnp.transpose(p["w1"], (2, 3, 0, 1))                 # (kh, kw, cout, cin)
    w1 = jnp.pad(w1, ((0, 0), (0, 0), (0, 0), (0, C_MID - C_IN)))
    w1 = w1.reshape(KSIZE * KSIZE * C_MID, C_MID)
    wres = jnp.transpose(p["wres"], (2, 3, 0, 1)).reshape(9 * C_MID, C_MID)
    return (w1, p["b1"].reshape(C_MID, 1), wres,
            p["gamma"].reshape(C_MID, 1), p["beta"].reshape(C_MID, 1),
            p["wfc"], p["bfc"].reshape(C_OUT, 1))


def reference_forward(x_nchw, p):
    """Pure-JAX reference (XLA convs) matching the PyTorch forward."""
    x = jnp.transpose(x_nchw, (0, 2, 3, 1))

    def conv(inp, w_pt, pad):
        w = jnp.transpose(w_pt, (2, 3, 1, 0))  # OIHW -> HWIO
        return jax.lax.conv_general_dilated(
            inp, w, window_strides=(STRIDE, STRIDE),
            padding=[(pad, pad), (pad, pad)],
            dimension_numbers=("NHWC", "HWIO", "NHWC"))

    out = conv(x, p["w1"], 1) + p["b1"]
    for _ in range(NUM_BLOCKS):
        c = conv(out, p["wres"], 1)
        mean = jnp.mean(c, axis=(0, 1, 2), keepdims=True)
        var = jnp.mean((c - mean) ** 2, axis=(0, 1, 2), keepdims=True)
        y = (c - mean) / jnp.sqrt(var + BN_EPS) * p["gamma"] + p["beta"]
        out = jnp.maximum(y, 0.0) + out
    pooled = jnp.mean(out, axis=(1, 2))
    return pooled @ p["wfc"].T + p["bfc"]


if __name__ == "__main__":
    key = jax.random.PRNGKey(0)
    kx, kp = jax.random.split(key)

    # Small deterministic input, PyTorch NCHW convention: (batch=2, C=4, 16, 16)
    x = jax.random.normal(kx, (2, 4, 16, 16), jnp.float32)
    params_pt = init_params(kp)
    kernel_params = to_kernel_layout(params_pt)

    out = resnet_forward(x, *kernel_params)
    out = jax.block_until_ready(out)

    ref = reference_forward(x, params_pt)
    np.testing.assert_allclose(np.asarray(out), np.asarray(ref),
                               rtol=2e-3, atol=2e-3)
    print("KERNEL_OK")
</pallas_src>

<mosaic_0001>
module attributes {stable_mosaic.version = 11 : i64} {
  func.func @resnet_kernel(%arg0: memref<8x768xf32, #tpu.memory_space<vmem>>, %arg1: memref<8x768xf32, #tpu.memory_space<vmem>>, %arg2: memref<128x8xf32, #tpu.memory_space<vmem>>, %arg3: memref<8x1xf32, #tpu.memory_space<vmem>>, %arg4: memref<72x8xf32, #tpu.memory_space<vmem>>, %arg5: memref<8x1xf32, #tpu.memory_space<vmem>>, %arg6: memref<8x1xf32, #tpu.memory_space<vmem>>, %arg7: memref<4x8xf32, #tpu.memory_space<vmem>>, %arg8: memref<4x1xf32, #tpu.memory_space<vmem>>, %arg9: memref<4x2xf32, #tpu.memory_space<vmem>>, %arg10: memref<8x1024xf32, #tpu.memory_space<vmem>>) attributes {dimension_semantics = [], scalar_prefetch = 0 : i64, scratch_operands = 1 : i64, tpu.core_type = #tpu.core_type<tc>} {
    %c0 = arith.constant 0 : index
    %c0_0 = arith.constant 0 : index
    %0 = vector.load %arg1[%c0, %c0_0] : memref<8x768xf32, #tpu.memory_space<vmem>>, vector<8x768xf32>
    %cst = arith.constant 0.000000e+00 : f32
    %1 = vector.broadcast %cst : f32 to vector<8x1024xf32>
    %c0_1 = arith.constant 0 : index
    %c0_2 = arith.constant 0 : index
    %2 = vector.load %arg10[%c0_1, %c0_2] : memref<8x1024xf32, #tpu.memory_space<vmem>>, vector<8x1024xf32>
    tpu.vector_store %arg10[%c0_1, %c0_2], %1 {strides = array<i32>} : memref<8x1024xf32, #tpu.memory_space<vmem>>, vector<8x1024xf32>,
    %c0_3 = arith.constant 0 : index
    %c0_4 = arith.constant 0 : index
    %3 = vector.load %arg0[%c0_3, %c0_4] : memref<8x768xf32, #tpu.memory_space<vmem>>, vector<8x768xf32>
    %c0_5 = arith.constant 0 : index
    %c128 = arith.constant 128 : index
    %4 = vector.load %arg10[%c0_5, %c128] : memref<8x1024xf32, #tpu.memory_space<vmem>>, vector<8x768xf32>
    tpu.vector_store %arg10[%c0_5, %c128], %3 {strides = array<i32>} : memref<8x1024xf32, #tpu.memory_space<vmem>>, vector<8x768xf32>,
    %c0_6 = arith.constant 0 : index
    %c0_7 = arith.constant 0 : index
    %5 = vector.load %arg10[%c0_6, %c0_7] : memref<8x1024xf32, #tpu.memory_space<vmem>>, vector<8x1024xf32>
    %6 = vector.extract_strided_slice %5 {offsets = [0, 109], sizes = [8, 768], strides = [1, 1]} : vector<8x1024xf32> to vector<8x768xf32>
    %c0_8 = arith.constant 0 : index
    %c0_9 = arith.constant 0 : index
    %7 = vector.load %arg2[%c0_8, %c0_9] : memref<128x8xf32, #tpu.memory_space<vmem>>, vector<8x8xf32>
    %cst_10 = arith.constant dense<0.000000e+00> : vector<8x768xf32>
    %8 = tpu.matmul %7, %6, %cst_10 {dimension_numbers = #tpu.dot_dimension_numbers<[1], [0], [0], [1], [0, 0, 1, 1], [], []>} : vector<8x8xf32>, vector<8x768xf32>, vector<8x768xf32> -> vector<8x768xf32>
    %9 = vector.extract_strided_slice %5 {offsets = [0, 110], sizes = [8, 768], strides = [1, 1]} : vector<8x1024xf32> to vector<8x768xf32>
    %c8 = arith.constant 8 : index
    %c0_11 = arith.constant 0 : index
    %10 = vector.load %arg2[%c8, %c0_11] : memref<128x8xf32, #tpu.memory_space<vmem>>, vector<8x8xf32>
    %cst_12 = arith.constant dense<0.000000e+00> : vector<8x768xf32>
    %11 = tpu.matmul %10, %9, %cst_12 {dimension_numbers = #tpu.dot_dimension_numbers<[1], [0], [0], [1], [0, 0, 1, 1], [], []>} : vector<8x8xf32>, vector<8x768xf32>, vector<8x768xf32> -> vector<8x768xf32>
    %12 = arith.addf %8, %11 : vector<8x768xf32>
    %13 = vector.extract_strided_slice %5 {offsets = [0, 111], sizes = [8, 768], strides = [1, 1]} : vector<8x1024xf32> to vector<8x768xf32>
    %c16 = arith.constant 16 : index
    %c0_13 = arith.constant 0 : index
    %14 = vector.load %arg2[%c16, %c0_13] : memref<128x8xf32, #tpu.memory_space<vmem>>, vector<8x8xf32>
    %cst_14 = arith.constant dense<0.000000e+00> : vector<8x768xf32>
    %15 = tpu.matmul %14, %13, %cst_14 {dimension_numbers = #tpu.dot_dimension_numbers<[1], [0], [0], [1], [0, 0, 1, 1], [], []>} : vector<8x8xf32>, vector<8x768xf32>, vector<8x768xf32> -> vector<8x768xf32>
    %16 = arith.addf %12, %15 : vector<8x768xf32>
    %17 = vector.extract_strided_slice %5 {offsets = [0, 112], sizes = [8, 768], strides = [1, 1]} : vector<8x1024xf32> to vector<8x768xf32>
    %c24 = arith.constant 24 : index
    %c0_15 = arith.constant 0 : index
    %18 = vector.load %arg2[%c24, %c0_15] : memref<128x8xf32, #tpu.memory_space<vmem>>, vector<8x8xf32>
    %cst_16 = arith.constant dense<0.000000e+00> : vector<8x768xf32>
    %19 = tpu.matmul %18, %17, %cst_16 {dimension_numbers = #tpu.dot_dimension_numbers<[1], [0], [0], [1], [0, 0, 1, 1], [], []>} : vector<8x8xf32>, vector<8x768xf32>, vector<8x768xf32> -> vector<8x768xf32>
    %20 = arith.addf %16, %19 : vector<8x768xf32>
    %21 = vector.extract_strided_slice %5 {offsets = [0, 127], sizes = [8, 768], strides = [1, 1]} : vector<8x1024xf32> to vector<8x768xf32>
    %c32 = arith.constant 32 : index
    %c0_17 = arith.constant 0 : index
    %22 = vector.load %arg2[%c32, %c0_17] : memref<128x8xf32, #tpu.memory_space<vmem>>, vector<8x8xf32>
    %cst_18 = arith.constant dense<0.000000e+00> : vector<8x768xf32>
    %23 = tpu.matmul %22, %21, %cst_18 {dimension_numbers = #tpu.dot_dimension_numbers<[1], [0], [0], [1], [0, 0, 1, 1], [], []>} : vector<8x8xf32>, vector<8x768xf32>, vector<8x768xf32> -> vector<8x768xf32>
    %24 = arith.addf %20, %23 : vector<8x768xf32>
    %25 = vector.extract_strided_slice %5 {offsets = [0, 128], sizes = [8, 768], strides = [1, 1]} : vector<8x1024xf32> to vector<8x768xf32>
    %c40 = arith.constant 40 : index
    %c0_19 = arith.constant 0 : index
    %26 = vector.load %arg2[%c40, %c0_19] : memref<128x8xf32, #tpu.memory_space<vmem>>, vector<8x8xf32>
    %cst_20 = arith.constant dense<0.000000e+00> : vector<8x768xf32>
    %27 = tpu.matmul %26, %25, %cst_20 {dimension_numbers = #tpu.dot_dimension_numbers<[1], [0], [0], [1], [0, 0, 1, 1], [], []>} : vector<8x8xf32>, vector<8x768xf32>, vector<8x768xf32> -> vector<8x768xf32>
    %28 = arith.addf %24, %27 : vector<8x768xf32>
    %29 = vector.extract_strided_slice %5 {offsets = [0, 129], sizes = [8, 768], strides = [1, 1]} : vector<8x1024xf32> to vector<8x768xf32>
    %c48 = arith.constant 48 : index
    %c0_21 = arith.constant 0 : index
    %30 = vector.load %arg2[%c48, %c0_21] : memref<128x8xf32, #tpu.memory_space<vmem>>, vector<8x8xf32>
    %cst_22 = arith.constant dense<0.000000e+00> : vector<8x768xf32>
    %31 = tpu.matmul %30, %29, %cst_22 {dimension_numbers = #tpu.dot_dimension_numbers<[1], [0], [0], [1], [0, 0, 1, 1], [], []>} : vector<8x8xf32>, vector<8x768xf32>, vector<8x768xf32> -> vector<8x768xf32>
    %32 = arith.addf %28, %31 : vector<8x768xf32>
    %33 = vector.extract_strided_slice %5 {offsets = [0, 130], sizes = [8, 768], strides = [1, 1]} : vector<8x1024xf32> to vector<8x768xf32>
    %c56 = arith.constant 56 : index
    %c0_23 = arith.constant 0 : index
    %34 = vector.load %arg2[%c56, %c0_23] : memref<128x8xf32, #tpu.memory_space<vmem>>, vector<8x8xf32>
    %cst_24 = arith.constant dense<0.000000e+00> : vector<8x768xf32>
    %35 = tpu.matmul %34, %33, %cst_24 {dimension_numbers = #tpu.dot_dimension_numbers<[1], [0], [0], [1], [0, 0, 1, 1], [], []>} : vector<8x8xf32>, vector<8x768xf32>, vector<8x768xf32> -> vector<8x768xf32>
    %36 = arith.addf %32, %35 : vector<8x768xf32>
    %37 = vector.extract_strided_slice %5 {offsets = [0, 145], sizes = [8, 768], strides = [1, 1]} : vector<8x1024xf32> to vector<8x768xf32>
    %c64 = arith.constant 64 : index
    %c0_25 = arith.constant 0 : index
    %38 = vector.load %arg2[%c64, %c0_25] : memref<128x8xf32, #tpu.memory_space<vmem>>, vector<8x8xf32>
    %cst_26 = arith.constant dense<0.000000e+00> : vector<8x768xf32>
    %39 = tpu.matmul %38, %37, %cst_26 {dimension_numbers = #tpu.dot_dimension_numbers<[1], [0], [0], [1], [0, 0, 1, 1], [], []>} : vector<8x8xf32>, vector<8x768xf32>, vector<8x768xf32> -> vector<8x768xf32>
    %40 = arith.addf %36, %39 : vector<8x768xf32>
    %41 = vector.extract_strided_slice %5 {offsets = [0, 146], sizes = [8, 768], strides = [1, 1]} : vector<8x1024xf32> to vector<8x768xf32>
    %c72 = arith.constant 72 : index
    %c0_27 = arith.constant 0 : index
    %42 = vector.load %arg2[%c72, %c0_27] : memref<128x8xf32, #tpu.memory_space<vmem>>, vector<8x8xf32>
    %cst_28 = arith.constant dense<0.000000e+00> : vector<8x768xf32>
    %43 = tpu.matmul %42, %41, %cst_28 {dimension_numbers = #tpu.dot_dimension_numbers<[1], [0], [0], [1], [0, 0, 1, 1], [], []>} : vector<8x8xf32>, vector<8x768xf32>, vector<8x768xf32> -> vector<8x768xf32>
    %44 = arith.addf %40, %43 : vector<8x768xf32>
    %45 = vector.extract_strided_slice %5 {offsets = [0, 147], sizes = [8, 768], strides = [1, 1]} : vector<8x1024xf32> to vector<8x768xf32>
    %c80 = arith.constant 80 : index
    %c0_29 = arith.constant 0 : index
    %46 = vector.load %arg2[%c80, %c0_29] : memref<128x8xf32, #tpu.memory_space<vmem>>, vector<8x8xf32>
    %cst_30 = arith.constant dense<0.000000e+00> : vector<8x768xf32>
    %47 = tpu.matmul %46, %45, %cst_30 {dimension_numbers = #tpu.dot_dimension_numbers<[1], [0], [0], [1], [0, 0, 1, 1], [], []>} : vector<8x8xf32>, vector<8x768xf32>, vector<8x768xf32> -> vector<8x768xf32>
    %48 = arith.addf %44, %47 : vector<8x768xf32>
    %49 = vector.extract_strided_slice %5 {offsets = [0, 148], sizes = [8, 768], strides = [1, 1]} : vector<8x1024xf32> to vector<8x768xf32>
    %c88 = arith.constant 88 : index
    %c0_31 = arith.constant 0 : index
    %50 = vector.load %arg2[%c88, %c0_31] : memref<128x8xf32, #tpu.memory_space<vmem>>, vector<8x8xf32>
    %cst_32 = arith.constant dense<0.000000e+00> : vector<8x768xf32>
    %51 = tpu.matmul %50, %49, %cst_32 {dimension_numbers = #tpu.dot_dimension_numbers<[1], [0], [0], [1], [0, 0, 1, 1], [], []>} : vector<8x8xf32>, vector<8x768xf32>, vector<8x768xf32> -> vector<8x768xf32>
    %52 = arith.addf %48, %51 : vector<8x768xf32>
    %53 = vector.extract_strided_slice %5 {offsets = [0, 163], sizes = [8, 768], strides = [1, 1]} : vector<8x1024xf32> to vector<8x768xf32>
    %c96 = arith.constant 96 : index
    %c0_33 = arith.constant 0 : index
    %54 = vector.load %arg2[%c96, %c0_33] : memref<128x8xf32, #tpu.memory_space<vmem>>, vector<8x8xf32>
    %cst_34 = arith.constant dense<0.000000e+00> : vector<8x768xf32>
    %55 = tpu.matmul %54, %53, %cst_34 {dimension_numbers = #tpu.dot_dimension_numbers<[1], [0], [0], [1], [0, 0, 1, 1], [], []>} : vector<8x8xf32>, vector<8x768xf32>, vector<8x768xf32> -> vector<8x768xf32>
    %56 = arith.addf %52, %55 : vector<8x768xf32>
    %57 = vector.extract_strided_slice %5 {offsets = [0, 164], sizes = [8, 768], strides = [1, 1]} : vector<8x1024xf32> to vector<8x768xf32>
    %c104 = arith.constant 104 : index
    %c0_35 = arith.constant 0 : index
    %58 = vector.load %arg2[%c104, %c0_35] : memref<128x8xf32, #tpu.memory_space<vmem>>, vector<8x8xf32>
    %cst_36 = arith.constant dense<0.000000e+00> : vector<8x768xf32>
    %59 = tpu.matmul %58, %57, %cst_36 {dimension_numbers = #tpu.dot_dimension_numbers<[1], [0], [0], [1], [0, 0, 1, 1], [], []>} : vector<8x8xf32>, vector<8x768xf32>, vector<8x768xf32> -> vector<8x768xf32>
    %60 = arith.addf %56, %59 : vector<8x768xf32>
    %61 = vector.extract_strided_slice %5 {offsets = [0, 165], sizes = [8, 768], strides = [1, 1]} : vector<8x1024xf32> to vector<8x768xf32>
    %c112 = arith.constant 112 : index
    %c0_37 = arith.constant 0 : index
    %62 = vector.load %arg2[%c112, %c0_37] : memref<128x8xf32, #tpu.memory_space<vmem>>, vector<8x8xf32>
    %cst_38 = arith.constant dense<0.000000e+00> : vector<8x768xf32>
    %63 = tpu.matmul %62, %61, %cst_38 {dimension_numbers = #tpu.dot_dimension_numbers<[1], [0], [0], [1], [0, 0, 1, 1], [], []>} : vector<8x8xf32>, vector<8x768xf32>, vector<8x768xf32> -> vector<8x768xf32>
    %64 = arith.addf %60, %63 : vector<8x768xf32>
    %65 = vector.extract_strided_slice %5 {offsets = [0, 166], sizes = [8, 768], strides = [1, 1]} : vector<8x1024xf32> to vector<8x768xf32>
    %c120 = arith.constant 120 : index
    %c0_39 = arith.constant 0 : index
    %66 = vector.load %arg2[%c120, %c0_39] : memref<128x8xf32, #tpu.memory_space<vmem>>, vector<8x8xf32>
    %cst_40 = arith.constant dense<0.000000e+00> : vector<8x768xf32>
    %67 = tpu.matmul %66, %65, %cst_40 {dimension_numbers = #tpu.dot_dimension_numbers<[1], [0], [0], [1], [0, 0, 1, 1], [], []>} : vector<8x8xf32>, vector<8x768xf32>, vector<8x768xf32> -> vector<8x768xf32>
    %68 = arith.addf %64, %67 : vector<8x768xf32>
    %c0_41 = arith.constant 0 : index
    %c0_42 = arith.constant 0 : index
    %69 = vector.load %arg3[%c0_41, %c0_42] : memref<8x1xf32, #tpu.memory_space<vmem>>, vector<8x1xf32>
    %70 = vector.broadcast %69 : vector<8x1xf32> to vector<8x768xf32>
    %71 = arith.addf %68, %70 : vector<8x768xf32>
    %72 = arith.mulf %71, %0 : vector<8x768xf32>
    %c0_43 = arith.constant 0 : index
    %c0_44 = arith.constant 0 : index
    %73 = vector.load %arg5[%c0_43, %c0_44] : memref<8x1xf32, #tpu.memory_space<vmem>>, vector<8x1xf32>
    %c0_45 = arith.constant 0 : index
    %c0_46 = arith.constant 0 : index
    %74 = vector.load %arg6[%c0_45, %c0_46] : memref<8x1xf32, #tpu.memory_space<vmem>>, vector<8x1xf32>
    %c0_47 = arith.constant 0 : index
    %c128_48 = arith.constant 128 : index
    %75 = vector.load %arg10[%c0_47, %c128_48] : memref<8x1024xf32, #tpu.memory_space<vmem>>, vector<8x768xf32>
    tpu.vector_store %arg10[%c0_47, %c128_48], %72 {strides = array<i32>} : memref<8x1024xf32, #tpu.memory_space<vmem>>, vector<8x768xf32>,
    %c0_49 = arith.constant 0 : index
    %c0_50 = arith.constant 0 : index
    %76 = vector.load %arg10[%c0_49, %c0_50] : memref<8x1024xf32, #tpu.memory_space<vmem>>, vector<8x1024xf32>
    %77 = vector.extract_strided_slice %76 {offsets = [0, 109], sizes = [8, 768], strides = [1, 1]} : vector<8x1024xf32> to vector<8x768xf32>
    %c0_51 = arith.constant 0 : index
    %c0_52 = arith.constant 0 : index
    %78 = vector.load %arg4[%c0_51, %c0_52] : memref<72x8xf32, #tpu.memory_space<vmem>>, vector<8x8xf32>
    %cst_53 = arith.constant dense<0.000000e+00> : vector<8x768xf32>
    %79 = tpu.matmul %78, %77, %cst_53 {dimension_numbers = #tpu.dot_dimension_numbers<[1], [0], [0], [1], [0, 0, 1, 1], [], []>} : vector<8x8xf32>, vector<8x768xf32>, vector<8x768xf32> -> vector<8x768xf32>
    %80 = vector.extract_strided_slice %76 {offsets = [0, 110], sizes = [8, 768], strides = [1, 1]} : vector<8x1024xf32> to vector<8x768xf32>
    %c8_54 = arith.constant 8 : index
    %c0_55 = arith.constant 0 : index
    %81 = vector.load %arg4[%c8_54, %c0_55] : memref<72x8xf32, #tpu.memory_space<vmem>>, vector<8x8xf32>
    %cst_56 = arith.constant dense<0.000000e+00> : vector<8x768xf32>
    %82 = tpu.matmul %81, %80, %cst_56 {dimension_numbers = #tpu.dot_dimension_numbers<[1], [0], [0], [1], [0, 0, 1, 1], [], []>} : vector<8x8xf32>, vector<8x768xf32>, vector<8x768xf32> -> vector<8x768xf32>
    %83 = arith.addf %79, %82 : vector<8x768xf32>
    %84 = vector.extract_strided_slice %76 {offsets = [0, 111], sizes = [8, 768], strides = [1, 1]} : vector<8x1024xf32> to vector<8x768xf32>
    %c16_57 = arith.constant 16 : index
    %c0_58 = arith.constant 0 : index
    %85 = vector.load %arg4[%c16_57, %c0_58] : memref<72x8xf32, #tpu.memory_space<vmem>>, vector<8x8xf32>
    %cst_59 = arith.constant dense<0.000000e+00> : vector<8x768xf32>
    %86 = tpu.matmul %85, %84, %cst_59 {dimension_numbers = #tpu.dot_dimension_numbers<[1], [0], [0], [1], [0, 0, 1, 1], [], []>} : vector<8x8xf32>, vector<8x768xf32>, vector<8x768xf32> -> vector<8x768xf32>
    %87 = arith.addf %83, %86 : vector<8x768xf32>
    %88 = vector.extract_strided_slice %76 {offsets = [0, 127], sizes = [8, 768], strides = [1, 1]} : vector<8x1024xf32> to vector<8x768xf32>
    %c24_60 = arith.constant 24 : index
    %c0_61 = arith.constant 0 : index
    %89 = vector.load %arg4[%c24_60, %c0_61] : memref<72x8xf32, #tpu.memory_space<vmem>>, vector<8x8xf32>
    %cst_62 = arith.constant dense<0.000000e+00> : vector<8x768xf32>
    %90 = tpu.matmul %89, %88, %cst_62 {dimension_numbers = #tpu.dot_dimension_numbers<[1], [0], [0], [1], [0, 0, 1, 1], [], []>} : vector<8x8xf32>, vector<8x768xf32>, vector<8x768xf32> -> vector<8x768xf32>
    %91 = arith.addf %87, %90 : vector<8x768xf32>
    %92 = vector.extract_strided_slice %76 {offsets = [0, 128], sizes = [8, 768], strides = [1, 1]} : vector<8x1024xf32> to vector<8x768xf32>
    %c32_63 = arith.constant 32 : index
    %c0_64 = arith.constant 0 : index
    %93 = vector.load %arg4[%c32_63, %c0_64] : memref<72x8xf32, #tpu.memory_space<vmem>>, vector<8x8xf32>
    %cst_65 = arith.constant dense<0.000000e+00> : vector<8x768xf32>
    %94 = tpu.matmul %93, %92, %cst_65 {dimension_numbers = #tpu.dot_dimension_numbers<[1], [0], [0], [1], [0, 0, 1, 1], [], []>} : vector<8x8xf32>, vector<8x768xf32>, vector<8x768xf32> -> vector<8x768xf32>
    %95 = arith.addf %91, %94 : vector<8x768xf32>
    %96 = vector.extract_strided_slice %76 {offsets = [0, 129], sizes = [8, 768], strides = [1, 1]} : vector<8x1024xf32> to vector<8x768xf32>
    %c40_66 = arith.constant 40 : index
    %c0_67 = arith.constant 0 : index
    %97 = vector.load %arg4[%c40_66, %c0_67] : memref<72x8xf32, #tpu.memory_space<vmem>>, vector<8x8xf32>
    %cst_68 = arith.constant dense<0.000000e+00> : vector<8x768xf32>
    %98 = tpu.matmul %97, %96, %cst_68 {dimension_numbers = #tpu.dot_dimension_numbers<[1], [0], [0], [1], [0, 0, 1, 1], [], []>} : vector<8x8xf32>, vector<8x768xf32>, vector<8x768xf32> -> vector<8x768xf32>
    %99 = arith.addf %95, %98 : vector<8x768xf32>
    %100 = vector.extract_strided_slice %76 {offsets = [0, 145], sizes = [8, 768], strides = [1, 1]} : vector<8x1024xf32> to vector<8x768xf32>
    %c48_69 = arith.constant 48 : index
    %c0_70 = arith.constant 0 : index
    %101 = vector.load %arg4[%c48_69, %c0_70] : memref<72x8xf32, #tpu.memory_space<vmem>>, vector<8x8xf32>
    %cst_71 = arith.constant dense<0.000000e+00> : vector<8x768xf32>
    %102 = tpu.matmul %101, %100, %cst_71 {dimension_numbers = #tpu.dot_dimension_numbers<[1], [0], [0], [1], [0, 0, 1, 1], [], []>} : vector<8x8xf32>, vector<8x768xf32>, vector<8x768xf32> -> vector<8x768xf32>
    %103 = arith.addf %99, %102 : vector<8x768xf32>
    %104 = vector.extract_strided_slice %76 {offsets = [0, 146], sizes = [8, 768], strides = [1, 1]} : vector<8x1024xf32> to vector<8x768xf32>
    %c56_72 = arith.constant 56 : index
    %c0_73 = arith.constant 0 : index
    %105 = vector.load %arg4[%c56_72, %c0_73] : memref<72x8xf32, #tpu.memory_space<vmem>>, vector<8x8xf32>
    %cst_74 = arith.constant dense<0.000000e+00> : vector<8x768xf32>
    %106 = tpu.matmul %105, %104, %cst_74 {dimension_numbers = #tpu.dot_dimension_numbers<[1], [0], [0], [1], [0, 0, 1, 1], [], []>} : vector<8x8xf32>, vector<8x768xf32>, vector<8x768xf32> -> vector<8x768xf32>
    %107 = arith.addf %103, %106 : vector<8x768xf32>
    %108 = vector.extract_strided_slice %76 {offsets = [0, 147], sizes = [8, 768], strides = [1, 1]} : vector<8x1024xf32> to vector<8x768xf32>
    %c64_75 = arith.constant 64 : index
    %c0_76 = arith.constant 0 : index
    %109 = vector.load %arg4[%c64_75, %c0_76] : memref<72x8xf32, #tpu.memory_space<vmem>>, vector<8x8xf32>
    %cst_77 = arith.constant dense<0.000000e+00> : vector<8x768xf32>
    %110 = tpu.matmul %109, %108, %cst_77 {dimension_numbers = #tpu.dot_dimension_numbers<[1], [0], [0], [1], [0, 0, 1, 1], [], []>} : vector<8x8xf32>, vector<8x768xf32>, vector<8x768xf32> -> vector<8x768xf32>
    %111 = arith.addf %107, %110 : vector<8x768xf32>
    %112 = arith.mulf %111, %0 : vector<8x768xf32>
    %cst_78 = arith.constant dense<0.000000e+00> : vector<8xf32>
    %113 = vector.multi_reduction <add>, %112, %cst_78 [1] : vector<8x768xf32> to vector<8xf32>
    %114 = vector.shape_cast %113 : vector<8xf32> to vector<8x1xf32>
    %cst_79 = arith.constant 0.00222222228 : f32
    %115 = vector.broadcast %cst_79 : f32 to vector<8x1xf32>
    %116 = arith.mulf %114, %115 : vector<8x1xf32>
    %117 = arith.mulf %112, %112 : vector<8x768xf32>
    %cst_80 = arith.constant dense<0.000000e+00> : vector<8xf32>
    %118 = vector.multi_reduction <add>, %117, %cst_80 [1] : vector<8x768xf32> to vector<8xf32>
    %119 = vector.shape_cast %118 : vector<8xf32> to vector<8x1xf32>
    %cst_81 = arith.constant 0.00222222228 : f32
    %120 = vector.broadcast %cst_81 : f32 to vector<8x1xf32>
    %121 = arith.mulf %119, %120 : vector<8x1xf32>
    %122 = arith.mulf %116, %116 : vector<8x1xf32>
    %123 = arith.subf %121, %122 : vector<8x1xf32>
    %cst_82 = arith.constant 9.99999974E-6 : f32
    %124 = vector.broadcast %cst_82 : f32 to vector<8x1xf32>
    %125 = arith.addf %123, %124 : vector<8x1xf32>
    %126 = math.rsqrt %125 : vector<8x1xf32>
    %127 = arith.mulf %73, %126 : vector<8x1xf32>
    %128 = arith.mulf %116, %127 : vector<8x1xf32>
    %129 = arith.subf %74, %128 : vector<8x1xf32>
    %130 = vector.broadcast %127 : vector<8x1xf32> to vector<8x768xf32>
    %131 = arith.mulf %112, %130 : vector<8x768xf32>
    %132 = vector.broadcast %129 : vector<8x1xf32> to vector<8x768xf32>
    %133 = arith.mulf %132, %0 : vector<8x768xf32>
    %134 = arith.addf %131, %133 : vector<8x768xf32>
    %cst_83 = arith.constant 0.000000e+00 : f32
    %135 = vector.broadcast %cst_83 : f32 to vector<8x768xf32>
    %136 = arith.maximumf %134, %135 : vector<8x768xf32>
    %137 = arith.addf %72, %136 : vector<8x768xf32>
    %c0_84 = arith.constant 0 : index
    %c128_85 = arith.constant 128 : index
    %138 = vector.load %arg10[%c0_84, %c128_85] : memref<8x1024xf32, #tpu.memory_space<vmem>>, vector<8x768xf32>
    tpu.vector_store %arg10[%c0_84, %c128_85], %137 {strides = array<i32>} : memref<8x1024xf32, #tpu.memory_space<vmem>>, vector<8x768xf32>,
    %c0_86 = arith.constant 0 : index
    %c0_87 = arith.constant 0 : index
    %139 = vector.load %arg10[%c0_86, %c0_87] : memref<8x1024xf32, #tpu.memory_space<vmem>>, vector<8x1024xf32>
    %140 = vector.extract_strided_slice %139 {offsets = [0, 109], sizes = [8, 768], strides = [1, 1]} : vector<8x1024xf32> to vector<8x768xf32>
    %c0_88 = arith.constant 0 : index
    %c0_89 = arith.constant 0 : index
    %141 = vector.load %arg4[%c0_88, %c0_89] : memref<72x8xf32, #tpu.memory_space<vmem>>, vector<8x8xf32>
    %cst_90 = arith.constant dense<0.000000e+00> : vector<8x768xf32>
    %142 = tpu.matmul %141, %140, %cst_90 {dimension_numbers = #tpu.dot_dimension_numbers<[1], [0], [0], [1], [0, 0, 1, 1], [], []>} : vector<8x8xf32>, vector<8x768xf32>, vector<8x768xf32> -> vector<8x768xf32>
    %143 = vector.extract_strided_slice %139 {offsets = [0, 110], sizes = [8, 768], strides = [1, 1]} : vector<8x1024xf32> to vector<8x768xf32>
    %c8_91 = arith.constant 8 : index
    %c0_92 = arith.constant 0 : index
    %144 = vector.load %arg4[%c8_91, %c0_92] : memref<72x8xf32, #tpu.memory_space<vmem>>, vector<8x8xf32>
    %cst_93 = arith.constant dense<0.000000e+00> : vector<8x768xf32>
    %145 = tpu.matmul %144, %143, %cst_93 {dimension_numbers = #tpu.dot_dimension_numbers<[1], [0], [0], [1], [0, 0, 1, 1], [], []>} : vector<8x8xf32>, vector<8x768xf32>, vector<8x768xf32> -> vector<8x768xf32>
    %146 = arith.addf %142, %145 : vector<8x768xf32>
    %147 = vector.extract_strided_slice %139 {offsets = [0, 111], sizes = [8, 768], strides = [1, 1]} : vector<8x1024xf32> to vector<8x768xf32>
    %c16_94 = arith.constant 16 : index
    %c0_95 = arith.constant 0 : index
    %148 = vector.load %arg4[%c16_94, %c0_95] : memref<72x8xf32, #tpu.memory_space<vmem>>, vector<8x8xf32>
    %cst_96 = arith.constant dense<0.000000e+00> : vector<8x768xf32>
    %149 = tpu.matmul %148, %147, %cst_96 {dimension_numbers = #tpu.dot_dimension_numbers<[1], [0], [0], [1], [0, 0, 1, 1], [], []>} : vector<8x8xf32>, vector<8x768xf32>, vector<8x768xf32> -> vector<8x768xf32>
    %150 = arith.addf %146, %149 : vector<8x768xf32>
    %151 = vector.extract_strided_slice %139 {offsets = [0, 127], sizes = [8, 768], strides = [1, 1]} : vector<8x1024xf32> to vector<8x768xf32>
    %c24_97 = arith.constant 24 : index
    %c0_98 = arith.constant 0 : index
    %152 = vector.load %arg4[%c24_97, %c0_98] : memref<72x8xf32, #tpu.memory_space<vmem>>, vector<8x8xf32>
    %cst_99 = arith.constant dense<0.000000e+00> : vector<8x768xf32>
    %153 = tpu.matmul %152, %151, %cst_99 {dimension_numbers = #tpu.dot_dimension_numbers<[1], [0], [0], [1], [0, 0, 1, 1], [], []>} : vector<8x8xf32>, vector<8x768xf32>, vector<8x768xf32> -> vector<8x768xf32>
    %154 = arith.addf %150, %153 : vector<8x768xf32>
    %155 = vector.extract_strided_slice %139 {offsets = [0, 128], sizes = [8, 768], strides = [1, 1]} : vector<8x1024xf32> to vector<8x768xf32>
    %c32_100 = arith.constant 32 : index
    %c0_101 = arith.constant 0 : index
    %156 = vector.load %arg4[%c32_100, %c0_101] : memref<72x8xf32, #tpu.memory_space<vmem>>, vector<8x8xf32>
    %cst_102 = arith.constant dense<0.000000e+00> : vector<8x768xf32>
    %157 = tpu.matmul %156, %155, %cst_102 {dimension_numbers = #tpu.dot_dimension_numbers<[1], [0], [0], [1], [0, 0, 1, 1], [], []>} : vector<8x8xf32>, vector<8x768xf32>, vector<8x768xf32> -> vector<8x768xf32>
    %158 = arith.addf %154, %157 : vector<8x768xf32>
    %159 = vector.extract_strided_slice %139 {offsets = [0, 129], sizes = [8, 768], strides = [1, 1]} : vector<8x1024xf32> to vector<8x768xf32>
    %c40_103 = arith.constant 40 : index
    %c0_104 = arith.constant 0 : index
    %160 = vector.load %arg4[%c40_103, %c0_104] : memref<72x8xf32, #tpu.memory_space<vmem>>, vector<8x8xf32>
    %cst_105 = arith.constant dense<0.000000e+00> : vector<8x768xf32>
    %161 = tpu.matmul %160, %159, %cst_105 {dimension_numbers = #tpu.dot_dimension_numbers<[1], [0], [0], [1], [0, 0, 1, 1], [], []>} : vector<8x8xf32>, vector<8x768xf32>, vector<8x768xf32> -> vector<8x768xf32>
    %162 = arith.addf %158, %161 : vector<8x768xf32>
    %163 = vector.extract_strided_slice %139 {offsets = [0, 145], sizes = [8, 768], strides = [1, 1]} : vector<8x1024xf32> to vector<8x768xf32>
    %c48_106 = arith.constant 48 : index
    %c0_107 = arith.constant 0 : index
    %164 = vector.load %arg4[%c48_106, %c0_107] : memref<72x8xf32, #tpu.memory_space<vmem>>, vector<8x8xf32>
    %cst_108 = arith.constant dense<0.000000e+00> : vector<8x768xf32>
    %165 = tpu.matmul %164, %163, %cst_108 {dimension_numbers = #tpu.dot_dimension_numbers<[1], [0], [0], [1], [0, 0, 1, 1], [], []>} : vector<8x8xf32>, vector<8x768xf32>, vector<8x768xf32> -> vector<8x768xf32>
    %166 = arith.addf %162, %165 : vector<8x768xf32>
    %167 = vector.extract_strided_slice %139 {offsets = [0, 146], sizes = [8, 768], strides = [1, 1]} : vector<8x1024xf32> to vector<8x768xf32>
    %c56_109 = arith.constant 56 : index
    %c0_110 = arith.constant 0 : index
    %168 = vector.load %arg4[%c56_109, %c0_110] : memref<72x8xf32, #tpu.memory_space<vmem>>, vector<8x8xf32>
    %cst_111 = arith.constant dense<0.000000e+00> : vector<8x768xf32>
    %169 = tpu.matmul %168, %167, %cst_111 {dimension_numbers = #tpu.dot_dimension_numbers<[1], [0], [0], [1], [0, 0, 1, 1], [], []>} : vector<8x8xf32>, vector<8x768xf32>, vector<8x768xf32> -> vector<8x768xf32>
    %170 = arith.addf %166, %169 : vector<8x768xf32>
    %171 = vector.extract_strided_slice %139 {offsets = [0, 147], sizes = [8, 768], strides = [1, 1]} : vector<8x1024xf32> to vector<8x768xf32>
    %c64_112 = arith.constant 64 : index
    %c0_113 = arith.constant 0 : index
    %172 = vector.load %arg4[%c64_112, %c0_113] : memref<72x8xf32, #tpu.memory_space<vmem>>, vector<8x8xf32>
    %cst_114 = arith.constant dense<0.000000e+00> : vector<8x768xf32>
    %173 = tpu.matmul %172, %171, %cst_114 {dimension_numbers = #tpu.dot_dimension_numbers<[1], [0], [0], [1], [0, 0, 1, 1], [], []>} : vector<8x8xf32>, vector<8x768xf32>, vector<8x768xf32> -> vector<8x768xf32>
    %174 = arith.addf %170, %173 : vector<8x768xf32>
    %175 = arith.mulf %174, %0 : vector<8x768xf32>
    %cst_115 = arith.constant dense<0.000000e+00> : vector<8xf32>
    %176 = vector.multi_reduction <add>, %175, %cst_115 [1] : vector<8x768xf32> to vector<8xf32>
    %177 = vector.shape_cast %176 : vector<8xf32> to vector<8x1xf32>
    %cst_116 = arith.constant 0.00222222228 : f32
    %178 = vector.broadcast %cst_116 : f32 to vector<8x1xf32>
    %179 = arith.mulf %177, %178 : vector<8x1xf32>
    %180 = arith.mulf %175, %175 : vector<8x768xf32>
    %cst_117 = arith.constant dense<0.000000e+00> : vector<8xf32>
    %181 = vector.multi_reduction <add>, %180, %cst_117 [1] : vector<8x768xf32> to vector<8xf32>
    %182 = vector.shape_cast %181 : vector<8xf32> to vector<8x1xf32>
    %cst_118 = arith.constant 0.00222222228 : f32
    %183 = vector.broadcast %cst_118 : f32 to vector<8x1xf32>
    %184 = arith.mulf %182, %183 : vector<8x1xf32>
    %185 = arith.mulf %179, %179 : vector<8x1xf32>
    %186 = arith.subf %184, %185 : vector<8x1xf32>
    %cst_119 = arith.constant 9.99999974E-6 : f32
    %187 = vector.broadcast %cst_119 : f32 to vector<8x1xf32>
    %188 = arith.addf %186, %187 : vector<8x1xf32>
    %189 = math.rsqrt %188 : vector<8x1xf32>
    %190 = arith.mulf %73, %189 : vector<8x1xf32>
    %191 = arith.mulf %179, %190 : vector<8x1xf32>
    %192 = arith.subf %74, %191 : vector<8x1xf32>
    %193 = vector.broadcast %190 : vector<8x1xf32> to vector<8x768xf32>
    %194 = arith.mulf %175, %193 : vector<8x768xf32>
    %195 = vector.broadcast %192 : vector<8x1xf32> to vector<8x768xf32>
    %196 = arith.mulf %195, %0 : vector<8x768xf32>
    %197 = arith.addf %194, %196 : vector<8x768xf32>
    %cst_120 = arith.constant 0.000000e+00 : f32
    %198 = vector.broadcast %cst_120 : f32 to vector<8x768xf32>
    %199 = arith.maximumf %197, %198 : vector<8x768xf32>
    %200 = arith.addf %137, %199 : vector<8x768xf32>
    %c0_121 = arith.constant 0 : index
    %c128_122 = arith.constant 128 : index
    %201 = vector.load %arg10[%c0_121, %c128_122] : memref<8x1024xf32, #tpu.memory_space<vmem>>, vector<8x768xf32>
    tpu.vector_store %arg10[%c0_121, %c128_122], %200 {strides = array<i32>} : memref<8x1024xf32, #tpu.memory_space<vmem>>, vector<8x768xf32>,
    %c0_123 = arith.constant 0 : index
    %c0_124 = arith.constant 0 : index
    %202 = vector.load %arg10[%c0_123, %c0_124] : memref<8x1024xf32, #tpu.memory_space<vmem>>, vector<8x1024xf32>
    %203 = vector.extract_strided_slice %202 {offsets = [0, 109], sizes = [8, 768], strides = [1, 1]} : vector<8x1024xf32> to vector<8x768xf32>
    %c0_125 = arith.constant 0 : index
    %c0_126 = arith.constant 0 : index
    %204 = vector.load %arg4[%c0_125, %c0_126] : memref<72x8xf32, #tpu.memory_space<vmem>>, vector<8x8xf32>
    %cst_127 = arith.constant dense<0.000000e+00> : vector<8x768xf32>
    %205 = tpu.matmul %204, %203, %cst_127 {dimension_numbers = #tpu.dot_dimension_numbers<[1], [0], [0], [1], [0, 0, 1, 1], [], []>} : vector<8x8xf32>, vector<8x768xf32>, vector<8x768xf32> -> vector<8x768xf32>
    %206 = vector.extract_strided_slice %202 {offsets = [0, 110], sizes = [8, 768], strides = [1, 1]} : vector<8x1024xf32> to vector<8x768xf32>
    %c8_128 = arith.constant 8 : index
    %c0_129 = arith.constant 0 : index
    %207 = vector.load %arg4[%c8_128, %c0_129] : memref<72x8xf32, #tpu.memory_space<vmem>>, vector<8x8xf32>
    %cst_130 = arith.constant dense<0.000000e+00> : vector<8x768xf32>
    %208 = tpu.matmul %207, %206, %cst_130 {dimension_numbers = #tpu.dot_dimension_numbers<[1], [0], [0], [1], [0, 0, 1, 1], [], []>} : vector<8x8xf32>, vector<8x768xf32>, vector<8x768xf32> -> vector<8x768xf32>
    %209 = arith.addf %205, %208 : vector<8x768xf32>
    %210 = vector.extract_strided_slice %202 {offsets = [0, 111], sizes = [8, 768], strides = [1, 1]} : vector<8x1024xf32> to vector<8x768xf32>
    %c16_131 = arith.constant 16 : index
    %c0_132 = arith.constant 0 : index
    %211 = vector.load %arg4[%c16_131, %c0_132] : memref<72x8xf32, #tpu.memory_space<vmem>>, vector<8x8xf32>
    %cst_133 = arith.constant dense<0.000000e+00> : vector<8x768xf32>
    %212 = tpu.matmul %211, %210, %cst_133 {dimension_numbers = #tpu.dot_dimension_numbers<[1], [0], [0], [1], [0, 0, 1, 1], [], []>} : vector<8x8xf32>, vector<8x768xf32>, vector<8x768xf32> -> vector<8x768xf32>
    %213 = arith.addf %209, %212 : vector<8x768xf32>
    %214 = vector.extract_strided_slice %202 {offsets = [0, 127], sizes = [8, 768], strides = [1, 1]} : vector<8x1024xf32> to vector<8x768xf32>
    %c24_134 = arith.constant 24 : index
    %c0_135 = arith.constant 0 : index
    %215 = vector.load %arg4[%c24_134, %c0_135] : memref<72x8xf32, #tpu.memory_space<vmem>>, vector<8x8xf32>
    %cst_136 = arith.constant dense<0.000000e+00> : vector<8x768xf32>
    %216 = tpu.matmul %215, %214, %cst_136 {dimension_numbers = #tpu.dot_dimension_numbers<[1], [0], [0], [1], [0, 0, 1, 1], [], []>} : vector<8x8xf32>, vector<8x768xf32>, vector<8x768xf32> -> vector<8x768xf32>
    %217 = arith.addf %213, %216 : vector<8x768xf32>
    %218 = vector.extract_strided_slice %202 {offsets = [0, 128], sizes = [8, 768], strides = [1, 1]} : vector<8x1024xf32> to vector<8x768xf32>
    %c32_137 = arith.constant 32 : index
    %c0_138 = arith.constant 0 : index
    %219 = vector.load %arg4[%c32_137, %c0_138] : memref<72x8xf32, #tpu.memory_space<vmem>>, vector<8x8xf32>
    %cst_139 = arith.constant dense<0.000000e+00> : vector<8x768xf32>
    %220 = tpu.matmul %219, %218, %cst_139 {dimension_numbers = #tpu.dot_dimension_numbers<[1], [0], [0], [1], [0, 0, 1, 1], [], []>} : vector<8x8xf32>, vector<8x768xf32>, vector<8x768xf32> -> vector<8x768xf32>
    %221 = arith.addf %217, %220 : vector<8x768xf32>
    %222 = vector.extract_strided_slice %202 {offsets = [0, 129], sizes = [8, 768], strides = [1, 1]} : vector<8x1024xf32> to vector<8x768xf32>
    %c40_140 = arith.constant 40 : index
    %c0_141 = arith.constant 0 : index
    %223 = vector.load %arg4[%c40_140, %c0_141] : memref<72x8xf32, #tpu.memory_space<vmem>>, vector<8x8xf32>
    %cst_142 = arith.constant dense<0.000000e+00> : vector<8x768xf32>
    %224 = tpu.matmul %223, %222, %cst_142 {dimension_numbers = #tpu.dot_dimension_numbers<[1], [0], [0], [1], [0, 0, 1, 1], [], []>} : vector<8x8xf32>, vector<8x768xf32>, vector<8x768xf32> -> vector<8x768xf32>
    %225 = arith.addf %221, %224 : vector<8x768xf32>
    %226 = vector.extract_strided_slice %202 {offsets = [0, 145], sizes = [8, 768], strides = [1, 1]} : vector<8x1024xf32> to vector<8x768xf32>
    %c48_143 = arith.constant 48 : index
    %c0_144 = arith.constant 0 : index
    %227 = vector.load %arg4[%c48_143, %c0_144] : memref<72x8xf32, #tpu.memory_space<vmem>>, vector<8x8xf32>
    %cst_145 = arith.constant dense<0.000000e+00> : vector<8x768xf32>
    %228 = tpu.matmul %227, %226, %cst_145 {dimension_numbers = #tpu.dot_dimension_numbers<[1], [0], [0], [1], [0, 0, 1, 1], [], []>} : vector<8x8xf32>, vector<8x768xf32>, vector<8x768xf32> -> vector<8x768xf32>
    %229 = arith.addf %225, %228 : vector<8x768xf32>
    %230 = vector.extract_strided_slice %202 {offsets = [0, 146], sizes = [8, 768], strides = [1, 1]} : vector<8x1024xf32> to vector<8x768xf32>
    %c56_146 = arith.constant 56 : index
    %c0_147 = arith.constant 0 : index
    %231 = vector.load %arg4[%c56_146, %c0_147] : memref<72x8xf32, #tpu.memory_space<vmem>>, vector<8x8xf32>
    %cst_148 = arith.constant dense<0.000000e+00> : vector<8x768xf32>
    %232 = tpu.matmul %231, %230, %cst_148 {dimension_numbers = #tpu.dot_dimension_numbers<[1], [0], [0], [1], [0, 0, 1, 1], [], []>} : vector<8x8xf32>, vector<8x768xf32>, vector<8x768xf32> -> vector<8x768xf32>
    %233 = arith.addf %229, %232 : vector<8x768xf32>
    %234 = vector.extract_strided_slice %202 {offsets = [0, 147], sizes = [8, 768], strides = [1, 1]} : vector<8x1024xf32> to vector<8x768xf32>
    %c64_149 = arith.constant 64 : index
    %c0_150 = arith.constant 0 : index
    %235 = vector.load %arg4[%c64_149, %c0_150] : memref<72x8xf32, #tpu.memory_space<vmem>>, vector<8x8xf32>
    %cst_151 = arith.constant dense<0.000000e+00> : vector<8x768xf32>
    %236 = tpu.matmul %235, %234, %cst_151 {dimension_numbers = #tpu.dot_dimension_numbers<[1], [0], [0], [1], [0, 0, 1, 1], [], []>} : vector<8x8xf32>, vector<8x768xf32>, vector<8x768xf32> -> vector<8x768xf32>
    %237 = arith.addf %233, %236 : vector<8x768xf32>
    %238 = arith.mulf %237, %0 : vector<8x768xf32>
    %cst_152 = arith.constant dense<0.000000e+00> : vector<8xf32>
    %239 = vector.multi_reduction <add>, %238, %cst_152 [1] : vector<8x768xf32> to vector<8xf32>
    %240 = vector.shape_cast %239 : vector<8xf32> to vector<8x1xf32>
    %cst_153 = arith.constant 0.00222222228 : f32
    %241 = vector.broadcast %cst_153 : f32 to vector<8x1xf32>
    %242 = arith.mulf %240, %241 : vector<8x1xf32>
    %243 = arith.mulf %238, %238 : vector<8x768xf32>
    %cst_154 = arith.constant dense<0.000000e+00> : vector<8xf32>
    %244 = vector.multi_reduction <add>, %243, %cst_154 [1] : vector<8x768xf32> to vector<8xf32>
    %245 = vector.shape_cast %244 : vector<8xf32> to vector<8x1xf32>
    %cst_155 = arith.constant 0.00222222228 : f32
    %246 = vector.broadcast %cst_155 : f32 to vector<8x1xf32>
    %247 = arith.mulf %245, %246 : vector<8x1xf32>
    %248 = arith.mulf %242, %242 : vector<8x1xf32>
    %249 = arith.subf %247, %248 : vector<8x1xf32>
    %cst_156 = arith.constant 9.99999974E-6 : f32
    %250 = vector.broadcast %cst_156 : f32 to vector<8x1xf32>
    %251 = arith.addf %249, %250 : vector<8x1xf32>
    %252 = math.rsqrt %251 : vector<8x1xf32>
    %253 = arith.mulf %73, %252 : vector<8x1xf32>
    %254 = arith.mulf %242, %253 : vector<8x1xf32>
    %255 = arith.subf %74, %254 : vector<8x1xf32>
    %256 = vector.broadcast %253 : vector<8x1xf32> to vector<8x768xf32>
    %257 = arith.mulf %238, %256 : vector<8x768xf32>
    %258 = vector.broadcast %255 : vector<8x1xf32> to vector<8x768xf32>
    %259 = arith.mulf %258, %0 : vector<8x768xf32>
    %260 = arith.addf %257, %259 : vector<8x768xf32>
    %cst_157 = arith.constant 0.000000e+00 : f32
    %261 = vector.broadcast %cst_157 : f32 to vector<8x768xf32>
    %262 = arith.maximumf %260, %261 : vector<8x768xf32>
    %263 = arith.addf %200, %262 : vector<8x768xf32>
    %c0_158 = arith.constant 0 : index
    %c128_159 = arith.constant 128 : index
    %264 = vector.load %arg10[%c0_158, %c128_159] : memref<8x1024xf32, #tpu.memory_space<vmem>>, vector<8x768xf32>
    tpu.vector_store %arg10[%c0_158, %c128_159], %263 {strides = array<i32>} : memref<8x1024xf32, #tpu.memory_space<vmem>>, vector<8x768xf32>,
    %c0_160 = arith.constant 0 : index
    %c0_161 = arith.constant 0 : index
    %265 = vector.load %arg10[%c0_160, %c0_161] : memref<8x1024xf32, #tpu.memory_space<vmem>>, vector<8x1024xf32>
    %266 = vector.extract_strided_slice %265 {offsets = [0, 109], sizes = [8, 768], strides = [1, 1]} : vector<8x1024xf32> to vector<8x768xf32>
    %c0_162 = arith.constant 0 : index
    %c0_163 = arith.constant 0 : index
    %267 = vector.load %arg4[%c0_162, %c0_163] : memref<72x8xf32, #tpu.memory_space<vmem>>, vector<8x8xf32>
    %cst_164 = arith.constant dense<0.000000e+00> : vector<8x768xf32>
    %268 = tpu.matmul %267, %266, %cst_164 {dimension_numbers = #tpu.dot_dimension_numbers<[1], [0], [0], [1], [0, 0, 1, 1], [], []>} : vector<8x8xf32>, vector<8x768xf32>, vector<8x768xf32> -> vector<8x768xf32>
    %269 = vector.extract_strided_slice %265 {offsets = [0, 110], sizes = [8, 768], strides = [1, 1]} : vector<8x1024xf32> to vector<8x768xf32>
    %c8_165 = arith.constant 8 : index
    %c0_166 = arith.constant 0 : index
    %270 = vector.load %arg4[%c8_165, %c0_166] : memref<72x8xf32, #tpu.memory_space<vmem>>, vector<8x8xf32>
    %cst_167 = arith.constant dense<0.000000e+00> : vector<8x768xf32>
    %271 = tpu.matmul %270, %269, %cst_167 {dimension_numbers = #tpu.dot_dimension_numbers<[1], [0], [0], [1], [0, 0, 1, 1], [], []>} : vector<8x8xf32>, vector<8x768xf32>, vector<8x768xf32> -> vector<8x768xf32>
    %272 = arith.addf %268, %271 : vector<8x768xf32>
    %273 = vector.extract_strided_slice %265 {offsets = [0, 111], sizes = [8, 768], strides = [1, 1]} : vector<8x1024xf32> to vector<8x768xf32>
    %c16_168 = arith.constant 16 : index
    %c0_169 = arith.constant 0 : index
    %274 = vector.load %arg4[%c16_168, %c0_169] : memref<72x8xf32, #tpu.memory_space<vmem>>, vector<8x8xf32>
    %cst_170 = arith.constant dense<0.000000e+00> : vector<8x768xf32>
    %275 = tpu.matmul %274, %273, %cst_170 {dimension_numbers = #tpu.dot_dimension_numbers<[1], [0], [0], [1], [0, 0, 1, 1], [], []>} : vector<8x8xf32>, vector<8x768xf32>, vector<8x768xf32> -> vector<8x768xf32>
    %276 = arith.addf %272, %275 : vector<8x768xf32>
    %277 = vector.extract_strided_slice %265 {offsets = [0, 127], sizes = [8, 768], strides = [1, 1]} : vector<8x1024xf32> to vector<8x768xf32>
    %c24_171 = arith.constant 24 : index
    %c0_172 = arith.constant 0 : index
    %278 = vector.load %arg4[%c24_171, %c0_172] : memref<72x8xf32, #tpu.memory_space<vmem>>, vector<8x8xf32>
    %cst_173 = arith.constant dense<0.000000e+00> : vector<8x768xf32>
    %279 = tpu.matmul %278, %277, %cst_173 {dimension_numbers = #tpu.dot_dimension_numbers<[1], [0], [0], [1], [0, 0, 1, 1], [], []>} : vector<8x8xf32>, vector<8x768xf32>, vector<8x768xf32> -> vector<8x768xf32>
    %280 = arith.addf %276, %279 : vector<8x768xf32>
    %281 = vector.extract_strided_slice %265 {offsets = [0, 128], sizes = [8, 768], strides = [1, 1]} : vector<8x1024xf32> to vector<8x768xf32>
    %c32_174 = arith.constant 32 : index
    %c0_175 = arith.constant 0 : index
    %282 = vector.load %arg4[%c32_174, %c0_175] : memref<72x8xf32, #tpu.memory_space<vmem>>, vector<8x8xf32>
    %cst_176 = arith.constant dense<0.000000e+00> : vector<8x768xf32>
    %283 = tpu.matmul %282, %281, %cst_176 {dimension_numbers = #tpu.dot_dimension_numbers<[1], [0], [0], [1], [0, 0, 1, 1], [], []>} : vector<8x8xf32>, vector<8x768xf32>, vector<8x768xf32> -> vector<8x768xf32>
    %284 = arith.addf %280, %283 : vector<8x768xf32>
    %285 = vector.extract_strided_slice %265 {offsets = [0, 129], sizes = [8, 768], strides = [1, 1]} : vector<8x1024xf32> to vector<8x768xf32>
    %c40_177 = arith.constant 40 : index
    %c0_178 = arith.constant 0 : index
    %286 = vector.load %arg4[%c40_177, %c0_178] : memref<72x8xf32, #tpu.memory_space<vmem>>, vector<8x8xf32>
    %cst_179 = arith.constant dense<0.000000e+00> : vector<8x768xf32>
    %287 = tpu.matmul %286, %285, %cst_179 {dimension_numbers = #tpu.dot_dimension_numbers<[1], [0], [0], [1], [0, 0, 1, 1], [], []>} : vector<8x8xf32>, vector<8x768xf32>, vector<8x768xf32> -> vector<8x768xf32>
    %288 = arith.addf %284, %287 : vector<8x768xf32>
    %289 = vector.extract_strided_slice %265 {offsets = [0, 145], sizes = [8, 768], strides = [1, 1]} : vector<8x1024xf32> to vector<8x768xf32>
    %c48_180 = arith.constant 48 : index
    %c0_181 = arith.constant 0 : index
    %290 = vector.load %arg4[%c48_180, %c0_181] : memref<72x8xf32, #tpu.memory_space<vmem>>, vector<8x8xf32>
    %cst_182 = arith.constant dense<0.000000e+00> : vector<8x768xf32>
    %291 = tpu.matmul %290, %289, %cst_182 {dimension_numbers = #tpu.dot_dimension_numbers<[1], [0], [0], [1], [0, 0, 1, 1], [], []>} : vector<8x8xf32>, vector<8x768xf32>, vector<8x768xf32> -> vector<8x768xf32>
    %292 = arith.addf %288, %291 : vector<8x768xf32>
    %293 = vector.extract_strided_slice %265 {offsets = [0, 146], sizes = [8, 768], strides = [1, 1]} : vector<8x1024xf32> to vector<8x768xf32>
    %c56_183 = arith.constant 56 : index
    %c0_184 = arith.constant 0 : index
    %294 = vector.load %arg4[%c56_183, %c0_184] : memref<72x8xf32, #tpu.memory_space<vmem>>, vector<8x8xf32>
    %cst_185 = arith.constant dense<0.000000e+00> : vector<8x768xf32>
    %295 = tpu.matmul %294, %293, %cst_185 {dimension_numbers = #tpu.dot_dimension_numbers<[1], [0], [0], [1], [0, 0, 1, 1], [], []>} : vector<8x8xf32>, vector<8x768xf32>, vector<8x768xf32> -> vector<8x768xf32>
    %296 = arith.addf %292, %295 : vector<8x768xf32>
    %297 = vector.extract_strided_slice %265 {offsets = [0, 147], sizes = [8, 768], strides = [1, 1]} : vector<8x1024xf32> to vector<8x768xf32>
    %c64_186 = arith.constant 64 : index
    %c0_187 = arith.constant 0 : index
    %298 = vector.load %arg4[%c64_186, %c0_187] : memref<72x8xf32, #tpu.memory_space<vmem>>, vector<8x8xf32>
    %cst_188 = arith.constant dense<0.000000e+00> : vector<8x768xf32>
    %299 = tpu.matmul %298, %297, %cst_188 {dimension_numbers = #tpu.dot_dimension_numbers<[1], [0], [0], [1], [0, 0, 1, 1], [], []>} : vector<8x8xf32>, vector<8x768xf32>, vector<8x768xf32> -> vector<8x768xf32>
    %300 = arith.addf %296, %299 : vector<8x768xf32>
    %301 = arith.mulf %300, %0 : vector<8x768xf32>
    %cst_189 = arith.constant dense<0.000000e+00> : vector<8xf32>
    %302 = vector.multi_reduction <add>, %301, %cst_189 [1] : vector<8x768xf32> to vector<8xf32>
    %303 = vector.shape_cast %302 : vector<8xf32> to vector<8x1xf32>
    %cst_190 = arith.constant 0.00222222228 : f32
    %304 = vector.broadcast %cst_190 : f32 to vector<8x1xf32>
    %305 = arith.mulf %303, %304 : vector<8x1xf32>
    %306 = arith.mulf %301, %301 : vector<8x768xf32>
    %cst_191 = arith.constant dense<0.000000e+00> : vector<8xf32>
    %307 = vector.multi_reduction <add>, %306, %cst_191 [1] : vector<8x768xf32> to vector<8xf32>
    %308 = vector.shape_cast %307 : vector<8xf32> to vector<8x1xf32>
    %cst_192 = arith.constant 0.00222222228 : f32
    %309 = vector.broadcast %cst_192 : f32 to vector<8x1xf32>
    %310 = arith.mulf %308, %309 : vector<8x1xf32>
    %311 = arith.mulf %305, %305 : vector<8x1xf32>
    %312 = arith.subf %310, %311 : vector<8x1xf32>
    %cst_193 = arith.constant 9.99999974E-6 : f32
    %313 = vector.broadcast %cst_193 : f32 to vector<8x1xf32>
    %314 = arith.addf %312, %313 : vector<8x1xf32>
    %315 = math.rsqrt %314 : vector<8x1xf32>
    %316 = arith.mulf %73, %315 : vector<8x1xf32>
    %317 = arith.mulf %305, %316 : vector<8x1xf32>
    %318 = arith.subf %74, %317 : vector<8x1xf32>
    %319 = vector.broadcast %316 : vector<8x1xf32> to vector<8x768xf32>
    %320 = arith.mulf %301, %319 : vector<8x768xf32>
    %321 = vector.broadcast %318 : vector<8x1xf32> to vector<8x768xf32>
    %322 = arith.mulf %321, %0 : vector<8x768xf32>
    %323 = arith.addf %320, %322 : vector<8x768xf32>
    %cst_194 = arith.constant 0.000000e+00 : f32
    %324 = vector.broadcast %cst_194 : f32 to vector<8x768xf32>
    %325 = arith.maximumf %323, %324 : vector<8x768xf32>
    %326 = arith.addf %263, %325 : vector<8x768xf32>
    %c0_195 = arith.constant 0 : index
    %c128_196 = arith.constant 128 : index
    %327 = vector.load %arg10[%c0_195, %c128_196] : memref<8x1024xf32, #tpu.memory_space<vmem>>, vector<8x768xf32>
    tpu.vector_store %arg10[%c0_195, %c128_196], %326 {strides = array<i32>} : memref<8x1024xf32, #tpu.memory_space<vmem>>, vector<8x768xf32>,
    %c0_197 = arith.constant 0 : index
    %c0_198 = arith.constant 0 : index
    %328 = vector.load %arg10[%c0_197, %c0_198] : memref<8x1024xf32, #tpu.memory_space<vmem>>, vector<8x1024xf32>
    %329 = vector.extract_strided_slice %328 {offsets = [0, 109], sizes = [8, 768], strides = [1, 1]} : vector<8x1024xf32> to vector<8x768xf32>
    %c0_199 = arith.constant 0 : index
    %c0_200 = arith.constant 0 : index
    %330 = vector.load %arg4[%c0_199, %c0_200] : memref<72x8xf32, #tpu.memory_space<vmem>>, vector<8x8xf32>
    %cst_201 = arith.constant dense<0.000000e+00> : vector<8x768xf32>
    %331 = tpu.matmul %330, %329, %cst_201 {dimension_numbers = #tpu.dot_dimension_numbers<[1], [0], [0], [1], [0, 0, 1, 1], [], []>} : vector<8x8xf32>, vector<8x768xf32>, vector<8x768xf32> -> vector<8x768xf32>
    %332 = vector.extract_strided_slice %328 {offsets = [0, 110], sizes = [8, 768], strides = [1, 1]} : vector<8x1024xf32> to vector<8x768xf32>
    %c8_202 = arith.constant 8 : index
    %c0_203 = arith.constant 0 : index
    %333 = vector.load %arg4[%c8_202, %c0_203] : memref<72x8xf32, #tpu.memory_space<vmem>>, vector<8x8xf32>
    %cst_204 = arith.constant dense<0.000000e+00> : vector<8x768xf32>
    %334 = tpu.matmul %333, %332, %cst_204 {dimension_numbers = #tpu.dot_dimension_numbers<[1], [0], [0], [1], [0, 0, 1, 1], [], []>} : vector<8x8xf32>, vector<8x768xf32>, vector<8x768xf32> -> vector<8x768xf32>
    %335 = arith.addf %331, %334 : vector<8x768xf32>
    %336 = vector.extract_strided_slice %328 {offsets = [0, 111], sizes = [8, 768], strides = [1, 1]} : vector<8x1024xf32> to vector<8x768xf32>
    %c16_205 = arith.constant 16 : index
    %c0_206 = arith.constant 0 : index
    %337 = vector.load %arg4[%c16_205, %c0_206] : memref<72x8xf32, #tpu.memory_space<vmem>>, vector<8x8xf32>
    %cst_207 = arith.constant dense<0.000000e+00> : vector<8x768xf32>
    %338 = tpu.matmul %337, %336, %cst_207 {dimension_numbers = #tpu.dot_dimension_numbers<[1], [0], [0], [1], [0, 0, 1, 1], [], []>} : vector<8x8xf32>, vector<8x768xf32>, vector<8x768xf32> -> vector<8x768xf32>
    %339 = arith.addf %335, %338 : vector<8x768xf32>
    %340 = vector.extract_strided_slice %328 {offsets = [0, 127], sizes = [8, 768], strides = [1, 1]} : vector<8x1024xf32> to vector<8x768xf32>
    %c24_208 = arith.constant 24 : index
    %c0_209 = arith.constant 0 : index
    %341 = vector.load %arg4[%c24_208, %c0_209] : memref<72x8xf32, #tpu.memory_space<vmem>>, vector<8x8xf32>
    %cst_210 = arith.constant dense<0.000000e+00> : vector<8x768xf32>
    %342 = tpu.matmul %341, %340, %cst_210 {dimension_numbers = #tpu.dot_dimension_numbers<[1], [0], [0], [1], [0, 0, 1, 1], [], []>} : vector<8x8xf32>, vector<8x768xf32>, vector<8x768xf32> -> vector<8x768xf32>
    %343 = arith.addf %339, %342 : vector<8x768xf32>
    %344 = vector.extract_strided_slice %328 {offsets = [0, 128], sizes = [8, 768], strides = [1, 1]} : vector<8x1024xf32> to vector<8x768xf32>
    %c32_211 = arith.constant 32 : index
    %c0_212 = arith.constant 0 : index
    %345 = vector.load %arg4[%c32_211, %c0_212] : memref<72x8xf32, #tpu.memory_space<vmem>>, vector<8x8xf32>
    %cst_213 = arith.constant dense<0.000000e+00> : vector<8x768xf32>
    %346 = tpu.matmul %345, %344, %cst_213 {dimension_numbers = #tpu.dot_dimension_numbers<[1], [0], [0], [1], [0, 0, 1, 1], [], []>} : vector<8x8xf32>, vector<8x768xf32>, vector<8x768xf32> -> vector<8x768xf32>
    %347 = arith.addf %343, %346 : vector<8x768xf32>
    %348 = vector.extract_strided_slice %328 {offsets = [0, 129], sizes = [8, 768], strides = [1, 1]} : vector<8x1024xf32> to vector<8x768xf32>
    %c40_214 = arith.constant 40 : index
    %c0_215 = arith.constant 0 : index
    %349 = vector.load %arg4[%c40_214, %c0_215] : memref<72x8xf32, #tpu.memory_space<vmem>>, vector<8x8xf32>
    %cst_216 = arith.constant dense<0.000000e+00> : vector<8x768xf32>
    %350 = tpu.matmul %349, %348, %cst_216 {dimension_numbers = #tpu.dot_dimension_numbers<[1], [0], [0], [1], [0, 0, 1, 1], [], []>} : vector<8x8xf32>, vector<8x768xf32>, vector<8x768xf32> -> vector<8x768xf32>
    %351 = arith.addf %347, %350 : vector<8x768xf32>
    %352 = vector.extract_strided_slice %328 {offsets = [0, 145], sizes = [8, 768], strides = [1, 1]} : vector<8x1024xf32> to vector<8x768xf32>
    %c48_217 = arith.constant 48 : index
    %c0_218 = arith.constant 0 : index
    %353 = vector.load %arg4[%c48_217, %c0_218] : memref<72x8xf32, #tpu.memory_space<vmem>>, vector<8x8xf32>
    %cst_219 = arith.constant dense<0.000000e+00> : vector<8x768xf32>
    %354 = tpu.matmul %353, %352, %cst_219 {dimension_numbers = #tpu.dot_dimension_numbers<[1], [0], [0], [1], [0, 0, 1, 1], [], []>} : vector<8x8xf32>, vector<8x768xf32>, vector<8x768xf32> -> vector<8x768xf32>
    %355 = arith.addf %351, %354 : vector<8x768xf32>
    %356 = vector.extract_strided_slice %328 {offsets = [0, 146], sizes = [8, 768], strides = [1, 1]} : vector<8x1024xf32> to vector<8x768xf32>
    %c56_220 = arith.constant 56 : index
    %c0_221 = arith.constant 0 : index
    %357 = vector.load %arg4[%c56_220, %c0_221] : memref<72x8xf32, #tpu.memory_space<vmem>>, vector<8x8xf32>
    %cst_222 = arith.constant dense<0.000000e+00> : vector<8x768xf32>
    %358 = tpu.matmul %357, %356, %cst_222 {dimension_numbers = #tpu.dot_dimension_numbers<[1], [0], [0], [1], [0, 0, 1, 1], [], []>} : vector<8x8xf32>, vector<8x768xf32>, vector<8x768xf32> -> vector<8x768xf32>
    %359 = arith.addf %355, %358 : vector<8x768xf32>
    %360 = vector.extract_strided_slice %328 {offsets = [0, 147], sizes = [8, 768], strides = [1, 1]} : vector<8x1024xf32> to vector<8x768xf32>
    %c64_223 = arith.constant 64 : index
    %c0_224 = arith.constant 0 : index
    %361 = vector.load %arg4[%c64_223, %c0_224] : memref<72x8xf32, #tpu.memory_space<vmem>>, vector<8x8xf32>
    %cst_225 = arith.constant dense<0.000000e+00> : vector<8x768xf32>
    %362 = tpu.matmul %361, %360, %cst_225 {dimension_numbers = #tpu.dot_dimension_numbers<[1], [0], [0], [1], [0, 0, 1, 1], [], []>} : vector<8x8xf32>, vector<8x768xf32>, vector<8x768xf32> -> vector<8x768xf32>
    %363 = arith.addf %359, %362 : vector<8x768xf32>
    %364 = arith.mulf %363, %0 : vector<8x768xf32>
    %cst_226 = arith.constant dense<0.000000e+00> : vector<8xf32>
    %365 = vector.multi_reduction <add>, %364, %cst_226 [1] : vector<8x768xf32> to vector<8xf32>
    %366 = vector.shape_cast %365 : vector<8xf32> to vector<8x1xf32>
    %cst_227 = arith.constant 0.00222222228 : f32
    %367 = vector.broadcast %cst_227 : f32 to vector<8x1xf32>
    %368 = arith.mulf %366, %367 : vector<8x1xf32>
    %369 = arith.mulf %364, %364 : vector<8x768xf32>
    %cst_228 = arith.constant dense<0.000000e+00> : vector<8xf32>
    %370 = vector.multi_reduction <add>, %369, %cst_228 [1] : vector<8x768xf32> to vector<8xf32>
    %371 = vector.shape_cast %370 : vector<8xf32> to vector<8x1xf32>
    %cst_229 = arith.constant 0.00222222228 : f32
    %372 = vector.broadcast %cst_229 : f32 to vector<8x1xf32>
    %373 = arith.mulf %371, %372 : vector<8x1xf32>
    %374 = arith.mulf %368, %368 : vector<8x1xf32>
    %375 = arith.subf %373, %374 : vector<8x1xf32>
    %cst_230 = arith.constant 9.99999974E-6 : f32
    %376 = vector.broadcast %cst_230 : f32 to vector<8x1xf32>
    %377 = arith.addf %375, %376 : vector<8x1xf32>
    %378 = math.rsqrt %377 : vector<8x1xf32>
    %379 = arith.mulf %73, %378 : vector<8x1xf32>
    %380 = arith.mulf %368, %379 : vector<8x1xf32>
    %381 = arith.subf %74, %380 : vector<8x1xf32>
    %382 = vector.broadcast %379 : vector<8x1xf32> to vector<8x768xf32>
    %383 = arith.mulf %364, %382 : vector<8x768xf32>
    %384 = vector.broadcast %381 : vector<8x1xf32> to vector<8x768xf32>
    %385 = arith.mulf %384, %0 : vector<8x768xf32>
    %386 = arith.addf %383, %385 : vector<8x768xf32>
    %cst_231 = arith.constant 0.000000e+00 : f32
    %387 = vector.broadcast %cst_231 : f32 to vector<8x768xf32>
    %388 = arith.maximumf %386, %387 : vector<8x768xf32>
    %389 = arith.addf %326, %388 : vector<8x768xf32>
    %390 = tpu.iota {dimensions = array<i32: 1>} : vector<8x768xi32>
    %c0_i32 = arith.constant 0 : i32
    %391 = vector.broadcast %c0_i32 : i32 to vector<8x768xi32>
    %392 = arith.cmpi sge, %390, %391 : vector<8x768xi32>
    %c324_i32 = arith.constant 324 : i32
    %393 = vector.broadcast %c324_i32 : i32 to vector<8x768xi32>
    %394 = arith.cmpi slt, %390, %393 : vector<8x768xi32>
    %395 = arith.andi %392, %394 : vector<8x768xi1>
    %cst_232 = arith.constant 0.000000e+00 : f32
    %396 = vector.broadcast %cst_232 : f32 to vector<8x768xf32>
    %397 = arith.select %395, %389, %396 : vector<8x768xi1>, vector<8x768xf32>
    %cst_233 = arith.constant dense<0.000000e+00> : vector<8xf32>
    %398 = vector.multi_reduction <add>, %397, %cst_233 [1] : vector<8x768xf32> to vector<8xf32>
    %399 = vector.shape_cast %398 : vector<8xf32> to vector<8x1xf32>
    %c324_i32_234 = arith.constant 324 : i32
    %400 = vector.broadcast %c324_i32_234 : i32 to vector<8x768xi32>
    %401 = arith.cmpi sge, %390, %400 : vector<8x768xi32>
    %c648_i32 = arith.constant 648 : i32
    %402 = vector.broadcast %c648_i32 : i32 to vector<8x768xi32>
    %403 = arith.cmpi slt, %390, %402 : vector<8x768xi32>
    %404 = arith.andi %401, %403 : vector<8x768xi1>
    %cst_235 = arith.constant 0.000000e+00 : f32
    %405 = vector.broadcast %cst_235 : f32 to vector<8x768xf32>
    %406 = arith.select %404, %389, %405 : vector<8x768xi1>, vector<8x768xf32>
    %cst_236 = arith.constant dense<0.000000e+00> : vector<8xf32>
    %407 = vector.multi_reduction <add>, %406, %cst_236 [1] : vector<8x768xf32> to vector<8xf32>
    %408 = vector.shape_cast %407 : vector<8xf32> to vector<8x1xf32>
    %409 = tpu.concatenate %399, %408 in 1 : vector<8x1xf32>, vector<8x1xf32> -> vector<8x2xf32>
    %cst_237 = arith.constant 0.00444444455 : f32
    %410 = vector.broadcast %cst_237 : f32 to vector<8x2xf32>
    %411 = arith.mulf %409, %410 : vector<8x2xf32>
    %c0_238 = arith.constant 0 : index
    %c0_239 = arith.constant 0 : index
    %412 = vector.load %arg7[%c0_238, %c0_239] : memref<4x8xf32, #tpu.memory_space<vmem>>, vector<4x8xf32>
    %cst_240 = arith.constant dense<0.000000e+00> : vector<4x2xf32>
    %413 = tpu.matmul %412, %411, %cst_240 {dimension_numbers = #tpu.dot_dimension_numbers<[1], [0], [0], [1], [0, 0, 1, 1], [], []>} : vector<4x8xf32>, vector<8x2xf32>, vector<4x2xf32> -> vector<4x2xf32>
    %c0_241 = arith.constant 0 : index
    %c0_242 = arith.constant 0 : index
    %414 = vector.load %arg8[%c0_241, %c0_242] : memref<4x1xf32, #tpu.memory_space<vmem>>, vector<4x1xf32>
    %415 = vector.broadcast %414 : vector<4x1xf32> to vector<4x2xf32>
    %416 = arith.addf %413, %415 : vector<4x2xf32>
    %c0_243 = arith.constant 0 : index
    %c0_244 = arith.constant 0 : index
    %417 = vector.load %arg9[%c0_243, %c0_244] : memref<4x2xf32, #tpu.memory_space<vmem>>, vector<4x2xf32>
    tpu.vector_store %arg9[%c0_243, %c0_244], %416 {strides = array<i32>} : memref<4x2xf32, #tpu.memory_space<vmem>>, vector<4x2xf32>,
    return
  }
}

</mosaic_0001>

<bundles_post_ra>
// kernel: resnet_forward.1
= control target key start
LH: loop header
LB: loop body
LE: loop exit
PB: predicated region body
PF: predicated region fallthrough
CT: control target
= control target key end

     0   :  { %v16280_v0 = vmov 0.0   ;;  %s16281_s30 = smov 18   ;;  %s16282_s22 = smov 19   ;;  %vm102_vm0 = vcmask 64512   ;;  %vm89_vm1 = vcmask 146432   ;;  %vm333_vm2 = vcmask 154624   ;;  %s18455_s0 = inlined_call_operand.vmem [shape: f32[8,768], index: 0, kind: input, shape index: {}]   ;;  %s18456_s2 = inlined_call_operand.vmem [shape: f32[128,8], index: 2, kind: input, shape index: {}]   ;;  %s18457_s3 = inlined_call_operand.vmem [shape: f32[8,1], index: 3, kind: input, shape index: {}]   ;;  %s18458_s1 = inlined_call_operand.vmem [shape: f32[8,768], index: 1, kind: input, shape index: {}]   ;;  %s18459_s4 = inlined_call_operand.vmem [shape: f32[72,8], index: 4, kind: input, shape index: {}]   ;;  %s18460_s5 = inlined_call_operand.vmem [shape: f32[8,1], index: 5, kind: input, shape index: {}]   ;;  %s18461_s6 = inlined_call_operand.vmem [shape: f32[8,1], index: 6, kind: input, shape index: {}]   ;;  %s18462_s8 = inlined_call_operand.vmem [shape: f32[4,1], index: 8, kind: input, shape index: {}]   ;;  %s18463_s7 = inlined_call_operand.vmem [shape: f32[4,8], index: 7, kind: input, shape index: {}]   ;;  %s18464_s9 = inlined_call_operand.vmem [shape: f32[4,2], index: 9, kind: output, shape index: {}]  }
   0x1   :  { %75 = vrot.lane.b32.xlu1 %v16280_v0, %s16281_s30  ;;  %v16353_v1 = vld [vmem:[%s18455_s0] sm:$0xff]  ;;  %170 = vmatprep.mubr.f32.mxu0 %v16280_v0  ;;  %v16361_v2 = vld [vmem:[%s18455_s0 + $0x10] sm:$0xff]  ;;  %v16366_v3 = vld [vmem:[%s18455_s0 + $0x18] sm:$0xff]  ;;  %s16284_s23 = smov 16   ;;  %s16285_s24 = smov 1   ;;  %vm577_vm3 = vcmask 138240  }
   0x2   :  { %77 = vrot.lane.b32.xlu0 %v16353_v1, %s16281_s30  ;;  %1451 = vmatprep.mubr.f32.mxu1 %v16280_v0  ;;  %v16372_v4 = vld [vmem:[%s18455_s0 + $0x8] sm:$0xff]  ;;  %v16383_v5 = vld [vmem:[%s18455_s0 + $0x20] sm:$0xff]  ;;  %s16286_s27 = smov 127   ;;  %s16287_s28 = smov 126   ;;  %v562_v41 = vld [vmem:[%s18456_s2 + $0x10] sm:$0xff]  ;;  %vm827_vm4 = vcmask 130048  }
   0x3   :  { %1387 = vmatprep.subr.mxu1 %v16366_v3  ;;  %v16392_v6 = vld [vmem:[%s18455_s0 + $0x28] sm:$0xff]  ;;  %s16283_s0 = smov 17   ;;  %s16288_s29 = smov 111   ;;  %v66_v27 = vld [vmem:[%s18456_s2] sm:$0xff]  ;;  %v812_v55 = vld [vmem:[%s18456_s2 + $0x18] sm:$0xff]  ;;  %vm1077_vm5 = vcmask 7168  }
   0x4   :  { %1388 = vmatpush1.msra.mxu1 %v16361_v2  ;;  %v16442_v7 = vld [vmem:[%s18456_s2 + $0x28] sm:$0xff]  ;;  %s16289_s10 = smov 110   ;;  %s16290_s13 = smov 109   ;;  %vm1551_vm6 = vcmask 1039360   ;;  %vm1801_vm7 = vcmask 1031168   ;;  %vm2051_vm8 = vcmask 908288  }
   0x5   :  { %81 = vrot.lane.b32.xlu1 %v16361_v2, %s16281_s30  ;;  %15729 = vmatmul.mubr.msk.f32.vlgmr.msra.gmra.mrb[0].mxu1 %vm102_vm0, %v16442_v7  ;;  %v67_v13 = vld [vmem:[%s18456_s2 + $0x8] sm:$0xff]  ;;  %s16291_s16 = smov 108   ;;  %s16292_s19 = smov 93   ;;  %vm2301_vm9 = vcmask 900096   ;;  %vm2551_vm10 = vcmask 891904   ;;  %vm2801_vm11 = vcmask 883712  }
   0x6   :  { %79 = vrot.lane.b32.xlu0 %v16372_v4, %s16281_s30  ;;  %1702 = vmatprep.mubr.f32.mxu1 %v16280_v0  ;;  %s16295_s11 = smov 90   ;;  %vm3051_vm12 = vcmask 760832   ;;  %vm3301_vm13 = vcmask 752640   ;;  %vm3551_vm14 = vcmask 744448   ;;  %vm3801_vm15 = vcmask 736256  }
   0x9   :  { %85 = vrot.lane.b32.xlu1 %v16383_v5, %s16281_s30 }
   0xa   :  { %83 = vrot.lane.b32.xlu0 %v16366_v3, %s16281_s30 }
   0xd   :  { %321 = vrot.lane.b32.xlu1 %v16353_v1, %s16282_s22 }
   0xe   :  { %87 = vrot.lane.b32.xlu0 %v16392_v6, %s16281_s30 }
  0x11   :  { %319 = vrot.lane.b32.xlu1 %v16280_v0, %s16282_s22 }
  0x12   :  { %323 = vrot.lane.b32.xlu0 %v16372_v4, %s16282_s22 }
  0x15   :  { %327 = vrot.lane.b32.xlu1 %v16366_v3, %s16282_s22 }
  0x16   :  { %325 = vrot.lane.b32.xlu0 %v16361_v2, %s16282_s22 }
  0x19   :  { %331 = vrot.lane.b32.xlu1 %v16392_v6, %s16282_s22 }
  0x1a   :  { %329 = vrot.lane.b32.xlu0 %v16383_v5, %s16282_s22 }
  0x1d   :  { %567 = vrot.lane.b32.xlu1 %v16372_v4, %s16283_s0 }
  0x1e   :  { %565 = vrot.lane.b32.xlu0 %v16353_v1, %s16283_s0 }
  0x21   :  { %569 = vrot.lane.b32.xlu1 %v16361_v2, %s16283_s0 }
  0x22   :  { %563 = vrot.lane.b32.xlu0 %v16280_v0, %s16283_s0 }
  0x25   :  { %573 = vrot.lane.b32.xlu1 %v16383_v5, %s16283_s0 }
  0x26   :  { %571 = vrot.lane.b32.xlu0 %v16366_v3, %s16283_s0 }
  0x29   :  { %815 = vrot.lane.b32.xlu1 %v16353_v1, %s16284_s23 }
  0x2a   :  { %575 = vrot.lane.b32.xlu0 %v16392_v6, %s16283_s0 }
  0x2d   :  { %813 = vrot.lane.b32.xlu1 %v16280_v0, %s16284_s23 }
  0x2e   :  { %817 = vrot.lane.b32.xlu0 %v16372_v4, %s16284_s23 }
  0x31   :  { %821 = vrot.lane.b32.xlu1 %v16366_v3, %s16284_s23 }
  0x32   :  { %819 = vrot.lane.b32.xlu0 %v16361_v2, %s16284_s23 }
  0x35   :  { %825 = vrot.lane.b32.xlu1 %v16392_v6, %s16284_s23 }
  0x36   :  { %823 = vrot.lane.b32.xlu0 %v16383_v5, %s16284_s23  ;;  %s16293_s23 = smov 92  }
  0x39   :  { %1067 = vrot.lane.b32.xlu1 %v16372_v4, %s16285_s24 }
  0x3a   :  { %1065 = vrot.lane.b32.xlu0 %v16353_v1, %s16285_s24 }
  0x3d   :  { %1069 = vrot.lane.b32.xlu1 %v16361_v2, %s16285_s24 }
  0x3e   :  { %1063 = vrot.lane.b32.xlu0 %v16280_v0, %s16285_s24 }
  0x41   :  { %1073 = vrot.lane.b32.xlu1 %v16383_v5, %s16285_s24 }
  0x42   :  { %1071 = vrot.lane.b32.xlu0 %v16366_v3, %s16285_s24 }
  0x45   :  { %1539 = vrot.lane.b32.xlu1 %v16372_v4, %s16286_s27 }
  0x46   :  { %1075 = vrot.lane.b32.xlu0 %v16392_v6, %s16285_s24 }
  0x49   :  { %1537 = vrot.lane.b32.xlu1 %v16353_v1, %s16286_s27 }
  0x4a   :  { %1541 = vrot.lane.b32.xlu0 %v16361_v2, %s16286_s27 }
  0x4d   :  { %1545 = vrot.lane.b32.xlu1 %v16383_v5, %s16286_s27 }
  0x4e   :  { %1543 = vrot.lane.b32.xlu0 %v16366_v3, %s16286_s27 }
  0x51   :  { %1549 = vrot.lane.b32.xlu1 %v16280_v0, %s16286_s27 }
  0x52   :  { %1547 = vrot.lane.b32.xlu0 %v16392_v6, %s16286_s27 }
  0x55   :  { %1791 = vrot.lane.b32.xlu1 %v16361_v2, %s16287_s28 }
  0x56   :  { %1789 = vrot.lane.b32.xlu0 %v16372_v4, %s16287_s28 }
  0x59   :  { %1793 = vrot.lane.b32.xlu1 %v16366_v3, %s16287_s28 }
  0x5a   :  { %1787 = vrot.lane.b32.xlu0 %v16353_v1, %s16287_s28 }
  0x5d   :  { %1797 = vrot.lane.b32.xlu1 %v16392_v6, %s16287_s28 }
  0x5e   :  { %1795 = vrot.lane.b32.xlu0 %v16383_v5, %s16287_s28 }
  0x61   :  { %2039 = vrot.lane.b32.xlu1 %v16372_v4, %s16288_s29 }
  0x62   :  { %1799 = vrot.lane.b32.xlu0 %v16280_v0, %s16287_s28  ;;  %s16294_s28 = smov 91  }
  0x65   :  { %2037 = vrot.lane.b32.xlu1 %v16353_v1, %s16288_s29 }
  0x66   :  { %2041 = vrot.lane.b32.xlu0 %v16361_v2, %s16288_s29 }
  0x69   :  { %2045 = vrot.lane.b32.xlu1 %v16383_v5, %s16288_s29 }
  0x6a   :  { %2043 = vrot.lane.b32.xlu0 %v16366_v3, %s16288_s29 }
  0x6d   :  { %2049 = vrot.lane.b32.xlu1 %v16280_v0, %s16288_s29 }
  0x6e   :  { %2047 = vrot.lane.b32.xlu0 %v16392_v6, %s16288_s29 }
  0x71   :  { %2291 = vrot.lane.b32.xlu1 %v16361_v2, %s16289_s10 }
  0x72   :  { %2289 = vrot.lane.b32.xlu0 %v16372_v4, %s16289_s10 }
  0x73   :  { %v76_v8 = vpop.permute.xlu1 %75 }
  0x74   :  { %v78_v9 = vpop.permute.xlu0 %77 }
  0x75   :  { %2293 = vrot.lane.b32.xlu1 %v16366_v3, %s16289_s10  ;;  %v90_v14 = vsel %vm89_vm1, %v76_v8, %v78_v9 }
  0x76   :  { %2287 = vrot.lane.b32.xlu0 %v16353_v1, %s16289_s10 }
  0x77   :  { %v82_v10 = vpop.permute.xlu1 %81 }
  0x78   :  { %v80_v11 = vpop.permute.xlu0 %79 }
  0x79   :  { %2297 = vrot.lane.b32.xlu1 %v16392_v6, %s16289_s10  ;;  %v91_v12 = vsel %vm89_vm1, %v78_v9, %v80_v11  ;;  %v92_v18 = vsel %vm89_vm1, %v80_v11, %v82_v10 }
  0x7a   :  { %2295 = vrot.lane.b32.xlu0 %v16383_v5, %s16289_s10  ;;  %106 = vmatprep.subr.mxu0 %v91_v12 }
  0x7b   :  { %107 = vmatpush1.msra.mxu0 %v90_v14  ;;  %v86_v15 = vpop.permute.xlu1 %85 }
  0x7c   :  { %v84_v16 = vpop.permute.xlu0 %83  ;;  %15713 = vmatmul.mubr.msk.f32.vlgmr.msra.gmra.mrb[0].mxu0 %vm102_vm0, %v67_v13 }
  0x7d   :  { %2539 = vrot.lane.b32.xlu1 %v16372_v4, %s16290_s13  ;;  %v93_v17 = vsel %vm89_vm1, %v82_v10, %v84_v16  ;;  %241 = vmatprep.mubr.f32.mxu0 %v16280_v0  ;;  %v94_v22 = vsel %vm89_vm1, %v84_v16, %v86_v15 }
  0x7e   :  { %2299 = vrot.lane.b32.xlu0 %v16280_v0, %s16289_s10  ;;  %177 = vmatprep.subr.mxu0 %v93_v17 }
  0x7f   :  { %178 = vmatpush1.msra.mxu0 %v92_v18  ;;  %v322_v19 = vpop.permute.xlu1 %321 }
  0x80   :  { %v88_v20 = vpop.permute.xlu0 %87  ;;  %15714 = vmatmul.mubr.msk.f32.vlgmr.msra.gmra.mrb[2].mxu0 %vm102_vm0, %v67_v13 }
  0x81   :  { %2537 = vrot.lane.b32.xlu1 %v16353_v1, %s16290_s13  ;;  %v95_v21 = vsel %vm89_vm1, %v86_v15, %v88_v20  ;;  %312 = vmatprep.mubr.f32.mxu0 %v16280_v0 }
  0x82   :  { %2541 = vrot.lane.b32.xlu0 %v16361_v2, %s16290_s13  ;;  %248 = vmatprep.subr.mxu0 %v95_v21 }
  0x83   :  { %249 = vmatpush1.msra.mxu0 %v94_v22  ;;  %v320_v23 = vpop.permute.xlu1 %319 }
  0x84   :  { %v334_v24 = vsel %vm333_vm2, %v320_v23, %v322_v19  ;;  %v324_v25 = vpop.permute.xlu0 %323  ;;  %15715 = vmatmul.mubr.msk.f32.vlgmr.msra.gmra.mrb[4].mxu0 %vm102_vm0, %v67_v13  ;;  %v1062_v13 = vld [vmem:[%s18456_s2 + $0x20] sm:$0xff] }
  0x85   :  { %2545 = vrot.lane.b32.xlu1 %v16383_v5, %s16290_s13  ;;  %v335_v26 = vsel %vm333_vm2, %v322_v19, %v324_v25  ;;  %413 = vmatprep.mubr.f32.mxu0 %v16280_v0 }
  0x86   :  { %2543 = vrot.lane.b32.xlu0 %v16366_v3, %s16290_s13  ;;  %349 = vmatprep.subr.mxu0 %v335_v26 }
  0x87   :  { %350 = vmatpush1.msra.mxu0 %v334_v24  ;;  %v328_v28 = vpop.permute.xlu1 %327 }
  0x88   :  { %v326_v29 = vpop.permute.xlu0 %325  ;;  %15716 = vmatmul.mubr.msk.f32.vlgmr.msra.gmra.mrb[0].mxu0 %vm102_vm0, %v66_v27 }
  0x89   :  { %2549 = vrot.lane.b32.xlu1 %v16280_v0, %s16290_s13  ;;  %v337_v30 = vsel %vm333_vm2, %v326_v29, %v328_v28  ;;  %v336_v31 = vsel %vm333_vm2, %v324_v25, %v326_v29  ;;  %484 = vmatprep.mubr.f32.mxu0 %v16280_v0 }
  0x8a   :  { %2547 = vrot.lane.b32.xlu0 %v16392_v6, %s16290_s13  ;;  %420 = vmatprep.subr.mxu0 %v337_v30 }
  0x8b   :  { %421 = vmatpush1.msra.mxu0 %v336_v31  ;;  %v332_v32 = vpop.permute.xlu1 %331 }
  0x8c   :  { %v330_v33 = vpop.permute.xlu0 %329  ;;  %15717 = vmatmul.mubr.msk.f32.vlgmr.msra.gmra.mrb[2].mxu0 %vm102_vm0, %v66_v27 }
  0x8d   :  { %2791 = vrot.lane.b32.xlu1 %v16361_v2, %s16291_s16  ;;  %v339_v34 = vsel %vm333_vm2, %v330_v33, %v332_v32  ;;  %v338_v35 = vsel %vm333_vm2, %v328_v28, %v330_v33  ;;  %555 = vmatprep.mubr.f32.mxu0 %v16280_v0 }
  0x8e   :  { %2789 = vrot.lane.b32.xlu0 %v16372_v4, %s16291_s16  ;;  %491 = vmatprep.subr.mxu0 %v339_v34  ;;  %v1535_v34 = vld [vmem:[%s18456_s2 + $0x30] sm:$0xff] }
  0x8f   :  { %492 = vmatpush1.msra.mxu0 %v338_v35  ;;  %v568_v36 = vpop.permute.xlu1 %567 }
  0x90   :  { %v566_v37 = vpop.permute.xlu0 %565  ;;  %15718 = vmatmul.mubr.msk.f32.vlgmr.msra.gmra.mrb[4].mxu0 %vm102_vm0, %v66_v27 }
  0x91   :  { %2793 = vrot.lane.b32.xlu1 %v16366_v3, %s16291_s16  ;;  %v579_v38 = vsel %vm577_vm3, %v566_v37, %v568_v36  ;;  %657 = vmatprep.mubr.f32.mxu0 %v16280_v0 }
  0x92   :  { %2787 = vrot.lane.b32.xlu0 %v16353_v1, %s16291_s16  ;;  %593 = vmatprep.subr.mxu0 %v579_v38 }
  0x93   :  { %v570_v39 = vpop.permute.xlu1 %569 }
  0x94   :  { %v564_v40 = vpop.permute.xlu0 %563  ;;  %v580_v46 = vsel %vm577_vm3, %v568_v36, %v570_v39 }
  0x95   :  { %v578_v42 = vsel %vm577_vm3, %v564_v40, %v566_v37  ;;  %2797 = vrot.lane.b32.xlu1 %v16392_v6, %s16291_s16  ;;  %v16296_v37 = vmov 0  }
  0x96   :  { %2795 = vrot.lane.b32.xlu0 %v16383_v5, %s16291_s16  ;;  %594 = vmatpush1.msra.mxu0 %v578_v42 }
  0x97   :  { %v574_v43 = vpop.permute.xlu1 %573  ;;  %15719 = vmatmul.mubr.msk.f32.vlgmr.msra.gmra.mrb[0].mxu0 %vm102_vm0, %v562_v41  ;;  %16252 = vset.pattern.permute.xlu1 %v16296_v37 }
  0x98   :  { %v572_v44 = vpop.permute.xlu0 %571  ;;  %728 = vmatprep.mubr.f32.mxu0 %v16280_v0  ;;  %16253 = vset.pattern.permute.xlu0 %v16296_v37 }
  0x99   :  { %3039 = vrot.lane.b32.xlu1 %v16372_v4, %s16292_s19  ;;  %v581_v45 = vsel %vm577_vm3, %v570_v39, %v572_v44  ;;  %v582_v50 = vsel %vm577_vm3, %v572_v44, %v574_v43 }
  0x9a   :  { %2799 = vrot.lane.b32.xlu0 %v16280_v0, %s16291_s16  ;;  %664 = vmatprep.subr.mxu0 %v581_v45 }
  0x9b   :  { %665 = vmatpush1.msra.mxu0 %v580_v46  ;;  %v816_v47 = vpop.permute.xlu1 %815 }
  0x9c   :  { %v576_v48 = vpop.permute.xlu0 %575  ;;  %15720 = vmatmul.mubr.msk.f32.vlgmr.msra.gmra.mrb[2].mxu0 %vm102_vm0, %v562_v41 }
  0x9d   :  { %3037 = vrot.lane.b32.xlu1 %v16353_v1, %s16292_s19  ;;  %v583_v49 = vsel %vm577_vm3, %v574_v43, %v576_v48  ;;  %799 = vmatprep.mubr.f32.mxu0 %v16280_v0 }
  0x9e   :  { %3041 = vrot.lane.b32.xlu0 %v16361_v2, %s16292_s19  ;;  %735 = vmatprep.subr.mxu0 %v583_v49 }
  0x9f   :  { %736 = vmatpush1.msra.mxu0 %v582_v50  ;;  %v814_v51 = vpop.permute.xlu1 %813  ;;  %v2036_v50 = vld [vmem:[%s18456_s2 + $0x40] sm:$0xff] }
  0xa0   :  { %v828_v52 = vsel %vm827_vm4, %v814_v51, %v816_v47  ;;  %v818_v53 = vpop.permute.xlu0 %817  ;;  %15721 = vmatmul.mubr.msk.f32.vlgmr.msra.gmra.mrb[4].mxu0 %vm102_vm0, %v562_v41 }
  0xa1   :  { %3045 = vrot.lane.b32.xlu1 %v16383_v5, %s16292_s19  ;;  %v829_v54 = vsel %vm827_vm4, %v816_v47, %v818_v53  ;;  %907 = vmatprep.mubr.f32.mxu0 %v16280_v0 }
  0xa2   :  { %3043 = vrot.lane.b32.xlu0 %v16366_v3, %s16292_s19  ;;  %843 = vmatprep.subr.mxu0 %v829_v54 }
  0xa3   :  { %844 = vmatpush1.msra.mxu0 %v828_v52  ;;  %v822_v56 = vpop.permute.xlu1 %821 }
  0xa4   :  { %v820_v57 = vpop.permute.xlu0 %819  ;;  %15722 = vmatmul.mubr.msk.f32.vlgmr.msra.gmra.mrb[0].mxu0 %vm102_vm0, %v812_v55 }
  0xa5   :  { %3049 = vrot.lane.b32.xlu1 %v16280_v0, %s16292_s19  ;;  %v831_v58 = vsel %vm827_vm4, %v820_v57, %v822_v56  ;;  %v830_v59 = vsel %vm827_vm4, %v818_v53, %v820_v57  ;;  %978 = vmatprep.mubr.f32.mxu0 %v16280_v0 }
  0xa6   :  { %3047 = vrot.lane.b32.xlu0 %v16392_v6, %s16292_s19  ;;  %914 = vmatprep.subr.mxu0 %v831_v58 }
  0xa7   :  { %915 = vmatpush1.msra.mxu0 %v830_v59  ;;  %v826_v60 = vpop.permute.xlu1 %825 }
  0xa8   :  { %v824_v61 = vpop.permute.xlu0 %823  ;;  %15723 = vmatmul.mubr.msk.f32.vlgmr.msra.gmra.mrb[2].mxu0 %vm102_vm0, %v812_v55 }
  0xa9   :  { %3291 = vrot.lane.b32.xlu1 %v16361_v2, %s16293_s23  ;;  %v833_v62 = vsel %vm827_vm4, %v824_v61, %v826_v60  ;;  %v832_v63 = vsel %vm827_vm4, %v822_v56, %v824_v61  ;;  %1049 = vmatprep.mubr.f32.mxu0 %v16280_v0  ;;  %vm16297_vm4 = vmmov 0  }
  0xaa   :  { %3289 = vrot.lane.b32.xlu0 %v16372_v4, %s16293_s23  ;;  %985 = vmatprep.subr.mxu0 %v833_v62 }
  0xab   :  { %986 = vmatpush1.msra.mxu0 %v832_v63  ;;  %v1068_v8 = vpop.permute.xlu1 %1067 }
  0xac   :  { %v1066_v9 = vpop.permute.xlu0 %1065  ;;  %15724 = vmatmul.mubr.msk.f32.vlgmr.msra.gmra.mrb[4].mxu0 %vm102_vm0, %v812_v55 }
  0xad   :  { %3293 = vrot.lane.b32.xlu1 %v16366_v3, %s16293_s23  ;;  %v1079_v10 = vsel %vm1077_vm5, %v1066_v9, %v1068_v8  ;;  %1157 = vmatprep.mubr.f32.mxu0 %v16280_v0 }
  0xae   :  { %3287 = vrot.lane.b32.xlu0 %v16353_v1, %s16293_s23  ;;  %1093 = vmatprep.subr.mxu0 %v1079_v10 }
  0xaf   :  { %v1070_v11 = vpop.permute.xlu1 %1069 }
  0xb0   :  { %v1064_v12 = vpop.permute.xlu0 %1063  ;;  %v1080_v18 = vsel %vm1077_vm5, %v1068_v8, %v1070_v11  ;;  %v2286_v8 = vld [vmem:[%s18456_s2 + $0x48] sm:$0xff] }
  0xb1   :  { %v1078_v14 = vsel %vm1077_vm5, %v1064_v12, %v1066_v9  ;;  %3297 = vrot.lane.b32.xlu1 %v16392_v6, %s16293_s23 }
  0xb2   :  { %3295 = vrot.lane.b32.xlu0 %v16383_v5, %s16293_s23  ;;  %1094 = vmatpush1.msra.mxu0 %v1078_v14 }
  0xb3   :  { %v1074_v15 = vpop.permute.xlu1 %1073  ;;  %15725 = vmatmul.mubr.msk.f32.vlgmr.msra.gmra.mrb[0].mxu0 %vm102_vm0, %v1062_v13 }
  0xb4   :  { %v1072_v16 = vpop.permute.xlu0 %1071  ;;  %1228 = vmatprep.mubr.f32.mxu0 %v16280_v0 }
  0xb5   :  { %3539 = vrot.lane.b32.xlu1 %v16372_v4, %s16294_s28  ;;  %v1081_v17 = vsel %vm1077_vm5, %v1070_v11, %v1072_v16  ;;  %v1082_v22 = vsel %vm1077_vm5, %v1072_v16, %v1074_v15 }
  0xb6   :  { %3299 = vrot.lane.b32.xlu0 %v16280_v0, %s16293_s23  ;;  %1164 = vmatprep.subr.mxu0 %v1081_v17 }
  0xb7   :  { %1165 = vmatpush1.msra.mxu0 %v1080_v18  ;;  %v1540_v19 = vpop.permute.xlu1 %1539 }
  0xb8   :  { %15726 = vmatmul.mubr.msk.f32.vlgmr.msra.gmra.mrb[2].mxu0 %vm102_vm0, %v1062_v13  ;;  %v1076_v20 = vpop.permute.xlu0 %1075 }
  0xb9   :  { %3537 = vrot.lane.b32.xlu1 %v16353_v1, %s16294_s28  ;;  %v1083_v21 = vsel %vm1077_vm5, %v1074_v15, %v1076_v20  ;;  %1299 = vmatprep.mubr.f32.mxu0 %v16280_v0 }
  0xba   :  { %3541 = vrot.lane.b32.xlu0 %v16361_v2, %s16294_s28  ;;  %1235 = vmatprep.subr.mxu0 %v1083_v21 }
  0xbb   :  { %1236 = vmatpush1.msra.mxu0 %v1082_v22  ;;  %v1538_v23 = vpop.permute.xlu1 %1537  ;;  %v2536_v22 = vld [vmem:[%s18456_s2 + $0x50] sm:$0xff] }
  0xbc   :  { %15727 = vmatmul.mubr.msk.f32.vlgmr.msra.gmra.mrb[4].mxu0 %vm102_vm0, %v1062_v13  ;;  %v1542_v24 = vpop.permute.xlu0 %1541  ;;  %1316 = vmatprep.subr.mxu0 %v16372_v4  ;;  %v1552_v31 = vsel %vm1551_vm6, %v1538_v23, %v1540_v19 }
  0xbd   :  { %3545 = vrot.lane.b32.xlu1 %v16383_v5, %s16294_s28  ;;  %1317 = vmatpush1.msra.mxu0 %v16353_v1  ;;  %v1553_v27 = vsel %vm1551_vm6, %v1540_v19, %v1542_v24 }
  0xbe   :  { %3543 = vrot.lane.b32.xlu0 %v16366_v3, %s16294_s28  ;;  %1380 = vmatprep.mubr.f32.mxu0 %v16280_v0 }
  0xbf   :  { %1458 = vmatprep.subr.mxu0 %v16392_v6  ;;  %v1546_v25 = vpop.permute.xlu1 %1545 }
  0xc0   :  { %15728 = vmatmul.mubr.msk.f32.vlgmr.msra.gmra.mrb[0].mxu0 %vm102_vm0, %v16442_v7  ;;  %v1544_v26 = vpop.permute.xlu0 %1543 }
  0xc1   :  { %1459 = vmatpush1.msra.mxu0 %v16383_v5  ;;  %3549 = vrot.lane.b32.xlu1 %v16280_v0, %s16294_s28  ;;  %v1555_v28 = vsel %vm1551_vm6, %v1544_v26, %v1546_v25  ;;  %v1554_v29 = vsel %vm1551_vm6, %v1542_v24, %v1544_v26 }
  0xc2   :  { %1567 = vmatprep.subr.mxu0 %v1553_v27  ;;  %3547 = vrot.lane.b32.xlu0 %v16392_v6, %s16294_s28 }
  0xc3   :  { %1638 = vmatprep.subr.mxu1 %v1555_v28  ;;  %1522 = vmatprep.mubr.f32.mxu0 %v16280_v0  ;;  %v1550_v30 = vpop.permute.xlu1 %1549 }
  0xc4   :  { %1639 = vmatpush1.msra.mxu1 %v1554_v29  ;;  %15730 = vmatmul.mubr.msk.f32.vlgmr.msra.gmra.mrb[4].mxu0 %vm102_vm0, %v16442_v7  ;;  %v1548_v32 = vpop.permute.xlu0 %1547 }
  0xc5   :  { %1568 = vmatpush1.msra.mxu0 %v1552_v31  ;;  %3791 = vrot.lane.b32.xlu1 %v16361_v2, %s16295_s11  ;;  %v1557_v33 = vsel %vm1551_vm6, %v1548_v32, %v1550_v30  ;;  %v1556_v2 = vsel %vm1551_vm6, %v1546_v25, %v1548_v32 }
  0xc6   :  { %3789 = vrot.lane.b32.xlu0 %v16372_v4, %s16295_s11  ;;  %1709 = vmatprep.subr.mxu0 %v1557_v33 }
  0xc7   :  { %1631 = vmatprep.mubr.f32.mxu0 %v16280_v0  ;;  %v1792_v7 = vpop.permute.xlu1 %1791  ;;  %15732 = vmatmul.mubr.msk.f32.vlgmr.msra.gmra.mrb[0].mxu1 %vm102_vm0, %v1535_v34 }
  0xc8   :  { %15731 = vmatmul.mubr.msk.f32.vlgmr.msra.gmra.mrb[0].mxu0 %vm102_vm0, %v1535_v34  ;;  %v1790_v35 = vpop.permute.xlu0 %1789  ;;  %1952 = vmatprep.mubr.f32.mxu1 %v16280_v0 }
  0xc9   :  { %1710 = vmatpush1.msra.mxu0 %v1556_v2  ;;  %3793 = vrot.lane.b32.xlu1 %v16366_v3, %s16295_s11  ;;  %v1803_v4 = vsel %vm1801_vm7, %v1790_v35, %v1792_v7  ;;  %v4036_v3 = vld [vmem:[%s18457_s3] sm:$0xff]  ;;  %v2786_v2 = vld [vmem:[%s18456_s2 + $0x58] sm:$0xff] }
  0xca   :  { %3787 = vrot.lane.b32.xlu0 %v16353_v1, %s16295_s11  ;;  %1817 = vmatprep.subr.mxu0 %v1803_v4  ;;  %v1786_v1 = vld [vmem:[%s18456_s2 + $0x38] sm:$0xff] }
  0xcb   :  { %v1794_v36 = vpop.permute.xlu1 %1793  ;;  %1773 = vmatprep.mubr.f32.mxu0 %v16280_v0 }
  0xcc   :  { %v1788_v38 = vpop.permute.xlu0 %1787  ;;  %15733 = vmatmul.mubr.msk.f32.vlgmr.msra.gmra.mrb[4].mxu0 %vm102_vm0, %v1535_v34 }
  0xcd   :  { %v1802_v39 = vsel %vm1801_vm7, %v1788_v38, %v1790_v35  ;;  %3797 = vrot.lane.b32.xlu1 %v16392_v6, %s16295_s11  ;;  %1881 = vmatprep.mubr.f32.mxu0 %v16280_v0 }
  0xce   :  { %3795 = vrot.lane.b32.xlu0 %v16383_v5, %s16295_s11  ;;  %1818 = vmatpush1.msra.mxu0 %v1802_v39  ;;  %v1804_v5 = vsel %vm1801_vm7, %v1792_v7, %v1794_v36 }
  0xcf   :  { %v1798_v40 = vpop.permute.xlu1 %1797 }
  0xd0   :  { %v1796_v41 = vpop.permute.xlu0 %1795  ;;  %15734 = vmatmul.mubr.msk.f32.vlgmr.msra.gmra.mrb[0].mxu0 %vm102_vm0, %v1786_v1 }
  0xd1   :  { %v1805_v6 = vsel %vm1801_vm7, %v1794_v36, %v1796_v41  ;;  %2023 = vmatprep.mubr.f32.mxu0 %v16280_v0  ;;  %4039 = vperm.xlu1 %16252, %v4036_v3   ;;  %v1806_v45 = vsel %vm1801_vm7, %v1796_v41, %v1798_v40 }
  0xd2   :  { %3799 = vrot.lane.b32.xlu0 %v16280_v0, %s16295_s11  ;;  %1888 = vmatprep.subr.mxu1 %v1805_v6 }
  0xd3   :  { %1889 = vmatpush1.msra.mxu1 %v1804_v5  ;;  %v2040_v42 = vpop.permute.xlu1 %2039 }
  0xd4   :  { %v1800_v43 = vpop.permute.xlu0 %1799  ;;  %15735 = vmatmul.mubr.msk.f32.vlgmr.msra.gmra.mrb[0].mxu1 %vm102_vm0, %v1786_v1 }
  0xd5   :  { %v1807_v44 = vsel %vm1801_vm7, %v1798_v40, %v1800_v43  ;;  %2202 = vmatprep.mubr.f32.mxu1 %v16280_v0  ;;  %v3036_v43 = vld [vmem:[%s18456_s2 + $0x60] sm:$0xff] }
  0xd6   :  { %1959 = vmatprep.subr.mxu0 %v1807_v44  ;;  %4079 = vrot.lane.b32.xlu0 %v16280_v0, %s16281_s30 }
  0xd7   :  { %1960 = vmatpush1.msra.mxu0 %v1806_v45  ;;  %v2038_v46 = vpop.permute.xlu1 %2037 }
  0xd8   :  { %v2052_v47 = vsel %vm2051_vm8, %v2038_v46, %v2040_v42  ;;  %v2042_v48 = vpop.permute.xlu0 %2041  ;;  %15736 = vmatmul.mubr.msk.f32.vlgmr.msra.gmra.mrb[4].mxu0 %vm102_vm0, %v1786_v1 }
  0xd9   :  { %v2053_v49 = vsel %vm2051_vm8, %v2040_v42, %v2042_v48  ;;  %2131 = vmatprep.mubr.f32.mxu0 %v16280_v0 }
  0xda   :  { %2067 = vmatprep.subr.mxu0 %v2053_v49 }
  0xdb   :  { %2068 = vmatpush1.msra.mxu0 %v2052_v47  ;;  %v2046_v51 = vpop.permute.xlu1 %2045 }
  0xdc   :  { %v2044_v52 = vpop.permute.xlu0 %2043  ;;  %15737 = vmatmul.mubr.msk.f32.vlgmr.msra.gmra.mrb[0].mxu0 %vm102_vm0, %v2036_v50 }
  0xdd   :  { %v2055_v53 = vsel %vm2051_vm8, %v2044_v52, %v2046_v51  ;;  %v2054_v54 = vsel %vm2051_vm8, %v2042_v48, %v2044_v52  ;;  %2273 = vmatprep.mubr.f32.mxu0 %v16280_v0 }
  0xde   :  { %2138 = vmatprep.subr.mxu1 %v2055_v53 }
  0xdf   :  { %2139 = vmatpush1.msra.mxu1 %v2054_v54  ;;  %v2050_v55 = vpop.permute.xlu1 %2049 }
  0xe0   :  { %v2048_v56 = vpop.permute.xlu0 %2047  ;;  %15738 = vmatmul.mubr.msk.f32.vlgmr.msra.gmra.mrb[0].mxu1 %vm102_vm0, %v2036_v50 }
  0xe1   :  { %v2057_v57 = vsel %vm2051_vm8, %v2048_v56, %v2050_v55  ;;  %v2056_v58 = vsel %vm2051_vm8, %v2046_v51, %v2048_v56  ;;  %2452 = vmatprep.mubr.f32.mxu1 %v16280_v0 }
  0xe2   :  { %2209 = vmatprep.subr.mxu0 %v2057_v57  ;;  %v3286_v57 = vld [vmem:[%s18456_s2 + $0x68] sm:$0xff] }
  0xe3   :  { %2210 = vmatpush1.msra.mxu0 %v2056_v58  ;;  %v2292_v59 = vpop.permute.xlu1 %2291 }
  0xe4   :  { %v2290_v60 = vpop.permute.xlu0 %2289  ;;  %15739 = vmatmul.mubr.msk.f32.vlgmr.msra.gmra.mrb[4].mxu0 %vm102_vm0, %v2036_v50 }
  0xe5   :  { %v2303_v61 = vsel %vm2301_vm9, %v2290_v60, %v2292_v59  ;;  %2381 = vmatprep.mubr.f32.mxu0 %v16280_v0 }
  0xe6   :  { %2317 = vmatprep.subr.mxu0 %v2303_v61 }
  0xe7   :  { %v2294_v62 = vpop.permute.xlu1 %2293 }
  0xe8   :  { %v2288_v63 = vpop.permute.xlu0 %2287  ;;  %v2304_v13 = vsel %vm2301_vm9, %v2292_v59, %v2294_v62 }
  0xe9   :  { %v2302_v9 = vsel %vm2301_vm9, %v2288_v63, %v2290_v60 }
  0xea   :  { %2318 = vmatpush1.msra.mxu0 %v2302_v9 }
  0xeb   :  { %v2298_v10 = vpop.permute.xlu1 %2297  ;;  %15740 = vmatmul.mubr.msk.f32.vlgmr.msra.gmra.mrb[0].mxu0 %vm102_vm0, %v2286_v8 }
  0xec   :  { %v2296_v11 = vpop.permute.xlu0 %2295  ;;  %2523 = vmatprep.mubr.f32.mxu0 %v16280_v0 }
  0xed   :  { %v2305_v12 = vsel %vm2301_vm9, %v2294_v62, %v2296_v11  ;;  %v2306_v17 = vsel %vm2301_vm9, %v2296_v11, %v2298_v10 }
  0xee   :  { %2388 = vmatprep.subr.mxu1 %v2305_v12 }
  0xef   :  { %2389 = vmatpush1.msra.mxu1 %v2304_v13  ;;  %v2540_v14 = vpop.permute.xlu1 %2539 }
  0xf0   :  { %v2300_v15 = vpop.permute.xlu0 %2299  ;;  %15741 = vmatmul.mubr.msk.f32.vlgmr.msra.gmra.mrb[0].mxu1 %vm102_vm0, %v2286_v8 }
  0xf1   :  { %v2307_v16 = vsel %vm2301_vm9, %v2298_v10, %v2300_v15  ;;  %2702 = vmatprep.mubr.f32.mxu1 %v16280_v0  ;;  %v3536_v15 = vld [vmem:[%s18456_s2 + $0x70] sm:$0xff] }
  0xf2   :  { %2459 = vmatprep.subr.mxu0 %v2307_v16 }
  0xf3   :  { %2460 = vmatpush1.msra.mxu0 %v2306_v17  ;;  %v2538_v18 = vpop.permute.xlu1 %2537 }
  0xf4   :  { %v2552_v19 = vsel %vm2551_vm10, %v2538_v18, %v2540_v14  ;;  %v2542_v20 = vpop.permute.xlu0 %2541  ;;  %15742 = vmatmul.mubr.msk.f32.vlgmr.msra.gmra.mrb[4].mxu0 %vm102_vm0, %v2286_v8 }
  0xf5   :  { %v2553_v21 = vsel %vm2551_vm10, %v2540_v14, %v2542_v20  ;;  %2631 = vmatprep.mubr.f32.mxu0 %v16280_v0 }
  0xf6   :  { %2567 = vmatprep.subr.mxu0 %v2553_v21 }
  0xf7   :  { %2568 = vmatpush1.msra.mxu0 %v2552_v19  ;;  %v2546_v23 = vpop.permute.xlu1 %2545 }
  0xf8   :  { %v2544_v24 = vpop.permute.xlu0 %2543  ;;  %15743 = vmatmul.mubr.msk.f32.vlgmr.msra.gmra.mrb[0].mxu0 %vm102_vm0, %v2536_v22 }
  0xf9   :  { %v2555_v25 = vsel %vm2551_vm10, %v2544_v24, %v2546_v23  ;;  %v2554_v26 = vsel %vm2551_vm10, %v2542_v20, %v2544_v24  ;;  %2773 = vmatprep.mubr.f32.mxu0 %v16280_v0 }
  0xfa   :  { %2638 = vmatprep.subr.mxu1 %v2555_v25 }
  0xfb   :  { %2639 = vmatpush1.msra.mxu1 %v2554_v26  ;;  %v2550_v27 = vpop.permute.xlu1 %2549 }
  0xfc   :  { %v2548_v28 = vpop.permute.xlu0 %2547  ;;  %15744 = vmatmul.mubr.msk.f32.vlgmr.msra.gmra.mrb[0].mxu1 %vm102_vm0, %v2536_v22 }
  0xfd   :  { %v2557_v29 = vsel %vm2551_vm10, %v2548_v28, %v2550_v27  ;;  %v2556_v30 = vsel %vm2551_vm10, %v2546_v23, %v2548_v28  ;;  %2952 = vmatprep.mubr.f32.mxu1 %v16280_v0  ;;  %v3786_v28 = vld [vmem:[%s18456_s2 + $0x78] sm:$0xff] }
  0xfe   :  { %2709 = vmatprep.subr.mxu0 %v2557_v29 }
  0xff   :  { %2710 = vmatpush1.msra.mxu0 %v2556_v30  ;;  %v2792_v31 = vpop.permute.xlu1 %2791 }
 0x100   :  { %v2790_v32 = vpop.permute.xlu0 %2789  ;;  %15745 = vmatmul.mubr.msk.f32.vlgmr.msra.gmra.mrb[4].mxu0 %vm102_vm0, %v2536_v22 }
 0x101   :  { %v2803_v33 = vsel %vm2801_vm11, %v2790_v32, %v2792_v31  ;;  %2881 = vmatprep.mubr.f32.mxu0 %v16280_v0 }
 0x102   :  { %2817 = vmatprep.subr.mxu0 %v2803_v33 }
 0x103   :  { %v2794_v34 = vpop.permute.xlu1 %2793 }
 0x104   :  { %v2788_v7 = vpop.permute.xlu0 %2787  ;;  %v2804_v38 = vsel %vm2801_vm11, %v2792_v31, %v2794_v34 }
 0x105   :  { %v2802_v35 = vsel %vm2801_vm11, %v2788_v7, %v2790_v32 }
 0x106   :  { %2818 = vmatpush1.msra.mxu0 %v2802_v35 }
 0x107   :  { %v2798_v4 = vpop.permute.xlu1 %2797  ;;  %15746 = vmatmul.mubr.msk.f32.vlgmr.msra.gmra.mrb[0].mxu0 %vm102_vm0, %v2786_v2 }
 0x108   :  { %v2796_v36 = vpop.permute.xlu0 %2795  ;;  %3023 = vmatprep.mubr.f32.mxu0 %v16280_v0 }
 0x109   :  { %v2805_v37 = vsel %vm2801_vm11, %v2794_v34, %v2796_v36  ;;  %v2806_v40 = vsel %vm2801_vm11, %v2796_v36, %v2798_v4 }
 0x10a   :  { %2888 = vmatprep.subr.mxu1 %v2805_v37 }
 0x10b   :  { %2889 = vmatpush1.msra.mxu1 %v2804_v38  ;;  %v3040_v39 = vpop.permute.xlu1 %3039 }
 0x10c   :  { %v2800_v1 = vpop.permute.xlu0 %2799  ;;  %15747 = vmatmul.mubr.msk.f32.vlgmr.msra.gmra.mrb[0].mxu1 %vm102_vm0, %v2786_v2 }
 0x10d   :  { %v2807_v3 = vsel %vm2801_vm11, %v2798_v4, %v2800_v1  ;;  %3202 = vmatprep.mubr.f32.mxu1 %v16280_v0 }
 0x10e   :  { %2959 = vmatprep.subr.mxu0 %v2807_v3 }
 0x10f   :  { %2960 = vmatpush1.msra.mxu0 %v2806_v40  ;;  %v3038_v41 = vpop.permute.xlu1 %3037 }
 0x110   :  { %v3052_v6 = vsel %vm3051_vm12, %v3038_v41, %v3040_v39  ;;  %v3042_v5 = vpop.permute.xlu0 %3041  ;;  %15748 = vmatmul.mubr.msk.f32.vlgmr.msra.gmra.mrb[4].mxu0 %vm102_vm0, %v2786_v2  ;;  %v16829_v41 = vld [vmem:[%s18458_s1 + $0x10] sm:$0xff] }
 0x111   :  { %v3053_v42 = vsel %vm3051_vm12, %v3040_v39, %v3042_v5  ;;  %3131 = vmatprep.mubr.f32.mxu0 %v16280_v0 }
 0x112   :  { %3067 = vmatprep.subr.mxu0 %v3053_v42  ;;  %v16834_v42 = vld [vmem:[%s18458_s1 + $0x18] sm:$0xff] }
 0x113   :  { %3068 = vmatpush1.msra.mxu0 %v3052_v6  ;;  %v3046_v44 = vpop.permute.xlu1 %3045 }
 0x114   :  { %v3044_v45 = vpop.permute.xlu0 %3043  ;;  %15749 = vmatmul.mubr.msk.f32.vlgmr.msra.gmra.mrb[0].mxu0 %vm102_vm0, %v3036_v43 }
 0x115   :  { %v3055_v46 = vsel %vm3051_vm12, %v3044_v45, %v3046_v44  ;;  %v3054_v47 = vsel %vm3051_vm12, %v3042_v5, %v3044_v45  ;;  %3273 = vmatprep.mubr.f32.mxu0 %v16280_v0 }
 0x116   :  { %3138 = vmatprep.subr.mxu1 %v3055_v46 }
 0x117   :  { %3139 = vmatpush1.msra.mxu1 %v3054_v47  ;;  %v3050_v48 = vpop.permute.xlu1 %3049 }
 0x118   :  { %v3048_v49 = vpop.permute.xlu0 %3047  ;;  %15750 = vmatmul.mubr.msk.f32.vlgmr.msra.gmra.mrb[0].mxu1 %vm102_vm0, %v3036_v43 }
 0x119   :  { %v3057_v50 = vsel %vm3051_vm12, %v3048_v49, %v3050_v48  ;;  %v3056_v51 = vsel %vm3051_vm12, %v3046_v44, %v3048_v49  ;;  %3452 = vmatprep.mubr.f32.mxu1 %v16280_v0  ;;  %v16842_v48 = vld [vmem:[%s18458_s1] sm:$0xff] }
 0x11a   :  { %3209 = vmatprep.subr.mxu0 %v3057_v50 }
 0x11b   :  { %3210 = vmatpush1.msra.mxu0 %v3056_v51  ;;  %v3292_v52 = vpop.permute.xlu1 %3291 }
 0x11c   :  { %v3290_v53 = vpop.permute.xlu0 %3289  ;;  %15751 = vmatmul.mubr.msk.f32.vlgmr.msra.gmra.mrb[4].mxu0 %vm102_vm0, %v3036_v43 }
 0x11d   :  { %v3303_v54 = vsel %vm3301_vm13, %v3290_v53, %v3292_v52  ;;  %3381 = vmatprep.mubr.f32.mxu0 %v16280_v0 }
 0x11e   :  { %3317 = vmatprep.subr.mxu0 %v3303_v54 }
 0x11f   :  { %v3294_v55 = vpop.permute.xlu1 %3293 }
 0x120   :  { %v3288_v56 = vpop.permute.xlu0 %3287  ;;  %v3304_v62 = vsel %vm3301_vm13, %v3292_v52, %v3294_v55  ;;  %v16857_v52 = vld [vmem:[%s18458_s1 + $0x8] sm:$0xff] }
 0x121   :  { %v3302_v58 = vsel %vm3301_vm13, %v3288_v56, %v3290_v53 }
 0x122   :  { %3318 = vmatpush1.msra.mxu0 %v3302_v58 }
 0x123   :  { %v3298_v59 = vpop.permute.xlu1 %3297  ;;  %15752 = vmatmul.mubr.msk.f32.vlgmr.msra.gmra.mrb[0].mxu0 %vm102_vm0, %v3286_v57 }
 0x124   :  { %v3296_v60 = vpop.permute.xlu0 %3295  ;;  %3523 = vmatprep.mubr.f32.mxu0 %v16280_v0 }
 0x125   :  { %v3305_v61 = vsel %vm3301_vm13, %v3294_v55, %v3296_v60  ;;  %v3306_v10 = vsel %vm3301_vm13, %v3296_v60, %v3298_v59  ;;  %v16869_v55 = vld [vmem:[%s18458_s1 + $0x28] sm:$0xff] }
 0x126   :  { %3388 = vmatprep.subr.mxu1 %v3305_v61 }
 0x127   :  { %3389 = vmatpush1.msra.mxu1 %v3304_v62  ;;  %v3540_v63 = vpop.permute.xlu1 %3539 }
 0x128   :  { %v3300_v8 = vpop.permute.xlu0 %3299  ;;  %15753 = vmatmul.mubr.msk.f32.vlgmr.msra.gmra.mrb[0].mxu1 %vm102_vm0, %v3286_v57 }
 0x129   :  { %v3307_v9 = vsel %vm3301_vm13, %v3298_v59, %v3300_v8  ;;  %3702 = vmatprep.mubr.f32.mxu1 %v16280_v0 }
 0x12a   :  { %3459 = vmatprep.subr.mxu0 %v3307_v9 }
 0x12b   :  { %3460 = vmatpush1.msra.mxu0 %v3306_v10  ;;  %v3538_v11 = vpop.permute.xlu1 %3537 }
 0x12c   :  { %v3552_v12 = vsel %vm3551_vm14, %v3538_v11, %v3540_v63  ;;  %v3542_v13 = vpop.permute.xlu0 %3541  ;;  %15754 = vmatmul.mubr.msk.f32.vlgmr.msra.gmra.mrb[4].mxu0 %vm102_vm0, %v3286_v57  ;;  %v16878_v57 = vld [vmem:[%s18458_s1 + $0x20] sm:$0xff] }
 0x12d   :  { %v3553_v14 = vsel %vm3551_vm14, %v3540_v63, %v3542_v13  ;;  %3631 = vmatprep.mubr.f32.mxu0 %v16280_v0 }
 0x12e   :  { %3567 = vmatprep.subr.mxu0 %v3553_v14 }
 0x12f   :  { %3568 = vmatpush1.msra.mxu0 %v3552_v12  ;;  %v3546_v16 = vpop.permute.xlu1 %3545  ;;  %v16988_v12 = vld [vmem:[%s18459_s4 + $0x8] sm:$0xff] }
 0x130   :  { %v3544_v17 = vpop.permute.xlu0 %3543  ;;  %15755 = vmatmul.mubr.msk.f32.vlgmr.msra.gmra.mrb[0].mxu0 %vm102_vm0, %v3536_v15 }
 0x131   :  { %v3555_v18 = vsel %vm3551_vm14, %v3544_v17, %v3546_v16  ;;  %v3554_v19 = vsel %vm3551_vm14, %v3542_v13, %v3544_v17  ;;  %3773 = vmatprep.mubr.f32.mxu0 %v16280_v0 }
 0x132   :  { %3638 = vmatprep.subr.mxu1 %v3555_v18 }
 0x133   :  { %3639 = vmatpush1.msra.mxu1 %v3554_v19  ;;  %v3550_v20 = vpop.permute.xlu1 %3549 }
 0x134   :  { %v3548_v21 = vpop.permute.xlu0 %3547  ;;  %15756 = vmatmul.mubr.msk.f32.vlgmr.msra.gmra.mrb[0].mxu1 %vm102_vm0, %v3536_v15 }
 0x135   :  { %v3557_v22 = vsel %vm3551_vm14, %v3548_v21, %v3550_v20  ;;  %v3556_v23 = vsel %vm3551_vm14, %v3546_v16, %v3548_v21  ;;  %3952 = vmatprep.mubr.f32.mxu1 %v16280_v0 }
 0x136   :  { %3709 = vmatprep.subr.mxu0 %v3557_v22 }
 0x137   :  { %3710 = vmatpush1.msra.mxu0 %v3556_v23  ;;  %v3792_v24 = vpop.permute.xlu1 %3791 }
 0x138   :  { %v3790_v25 = vpop.permute.xlu0 %3789  ;;  %15757 = vmatmul.mubr.msk.f32.vlgmr.msra.gmra.mrb[4].mxu0 %vm102_vm0, %v3536_v15 }
 0x139   :  { %v3803_v26 = vsel %vm3801_vm15, %v3790_v25, %v3792_v24  ;;  %3881 = vmatprep.mubr.f32.mxu0 %v16280_v0 }
 0x13a   :  { %3817 = vmatprep.subr.mxu0 %v3803_v26 }
 0x13b   :  { %v3794_v29 = vpop.permute.xlu1 %3793 }
 0x13c   :  { %v3788_v27 = vpop.permute.xlu0 %3787  ;;  %v3804_v33 = vsel %vm3801_vm15, %v3792_v24, %v3794_v29 }
 0x13d   :  { %v3802_v30 = vsel %vm3801_vm15, %v3788_v27, %v3790_v25  ;;  %v17010_v27 = vld [vmem:[%s18459_s4] sm:$0xff] }
 0x13e   :  { %3818 = vmatpush1.msra.mxu0 %v3802_v30 }
 0x13f   :  { %15758 = vmatmul.mubr.msk.f32.vlgmr.msra.gmra.mrb[0].mxu0 %vm102_vm0, %v3786_v28  ;;  %v3798_v34 = vpop.permute.xlu1 %3797 }
 0x140   :  { %v3796_v31 = vpop.permute.xlu0 %3795  ;;  %4023 = vmatprep.mubr.f32.mxu0 %v16280_v0 }
 0x141   :  { %v3805_v32 = vsel %vm3801_vm15, %v3794_v29, %v3796_v31  ;;  %v3806_v35 = vsel %vm3801_vm15, %v3796_v31, %v3798_v34 }
 0x142   :  { %3888 = vmatprep.subr.mxu1 %v3805_v32 }
 0x143   :  { %3889 = vmatpush1.msra.mxu1 %v3804_v33 }
 0x144   :  { %15759 = vmatmul.mubr.msk.f32.vlgmr.msra.gmra.mrb[0].mxu1 %vm102_vm0, %v3786_v28  ;;  %v3800_v7 = vpop.permute.xlu0 %3799 }
 0x145   :  { %v3807_v2 = vsel %vm3801_vm15, %v3798_v34, %v3800_v7  ;;  %4172 = vmatprep.mubr.f32.mxu1 %v16280_v0 }
 0x146   :  { %3959 = vmatprep.subr.mxu0 %v3807_v2 }
 0x147   :  { %3960 = vmatpush1.msra.mxu0 %v3806_v35 }
 0x148   :  { %15760 = vmatmul.mubr.msk.f32.vlgmr.msra.gmra.mrb[4].mxu0 %vm102_vm0, %v3786_v28  ;;  %v4080_v60 = vpop.permute.xlu0 %4079 }
 0x149   :  { %6472 = vmatprep.mubr.f32.mxu0 %v16280_v0 }
 0x150   :  { %v4040_v40 = vpop.permute.xlu1 %4039 }
 0x18b   :  { %v1230_v4 = vpop.f32.mrb[2].mxu0 }
 0x18c   :  { %v1232_v36 = vpop.f32.mrb[3].mxu0 }
 0x212   :  { %v3883_v37 = vpop.f32.mrb[0].mxu0 }
 0x213   :  { %v3885_v38 = vpop.f32.mrb[1].mxu0  ;;  %v4042_v45 = vadd.f32 %v4040_v40, %v3883_v37 }
 0x214   :  { %v4043_v51 = vadd.f32 %v4040_v40, %v3885_v38 }
 0x215   :  { %v16852_v50 = vmul.f32 %v4042_v45, %v16842_v48 }
 0x216   :  { %v16864_v53 = vmul.f32 %v4043_v51, %v16857_v52  ;;  %v17049_v51 = vld [vmem:[%s18459_s4 + $0x18] sm:$0xff] }
 0x217   :  { %v3954_v39 = vpop.f32.mrb[0].mxu1 }
 0x218   :  { %v15904_v1 = vadd.f32 %v3954_v39, %v1230_v4  ;;  %v3956_v3 = vpop.f32.mrb[1].mxu1 }
 0x219   :  { %v15905_v6 = vadd.f32 %v3956_v3, %v1232_v36  ;;  %v17029_v36 = vld [vmem:[%s18459_s4 + $0x10] sm:$0xff] }
 0x21a   :  { %v4044_v5 = vadd.f32 %v15904_v1, %v4040_v40 }
 0x21b   :  { %v4045_v43 = vadd.f32 %v15905_v6, %v4040_v40  ;;  %v4025_v44 = vpop.f32.mrb[4].mxu0 }
 0x21c   :  { %v16837_v46 = vmul.f32 %v4044_v5, %v16829_v41  ;;  %v4027_v47 = vpop.f32.mrb[5].mxu0  ;;  %v4046_v56 = vadd.f32 %v4040_v40, %v4025_v44 }
 0x21d   :  { %v16845_v49 = vmul.f32 %v4045_v43, %v16834_v42  ;;  %v4047_v54 = vadd.f32 %v4040_v40, %v4027_v47 }
 0x21e   :  { %4085 = vrot.lane.b32.xlu1 %v16837_v46, %s16281_s30  ;;  %v16888_v59 = vmul.f32 %v4046_v56, %v16878_v57 }
 0x21f   :  { %4087 = vrot.lane.b32.xlu0 %v16845_v49, %s16281_s30  ;;  %v16881_v58 = vmul.f32 %v4047_v54, %v16869_v55 }
 0x222   :  { %4323 = vrot.lane.b32.xlu1 %v16852_v50, %s16282_s22 }
 0x223   :  { %4081 = vrot.lane.b32.xlu0 %v16852_v50, %s16281_s30 }
 0x226   :  { %4083 = vrot.lane.b32.xlu1 %v16864_v53, %s16281_s30 }
 0x227   :  { %4325 = vrot.lane.b32.xlu0 %v16864_v53, %s16282_s22 }
 0x22a   :  { %4321 = vrot.lane.b32.xlu1 %v16280_v0, %s16282_s22 }
 0x22b   :  { %4091 = vrot.lane.b32.xlu0 %v16881_v58, %s16281_s30 }
 0x22e   :  { %4089 = vrot.lane.b32.xlu1 %v16888_v59, %s16281_s30 }
 0x22f   :  { %4327 = vrot.lane.b32.xlu0 %v16837_v46, %s16282_s22 }
 0x232   :  { %4329 = vrot.lane.b32.xlu1 %v16845_v49, %s16282_s22 }
 0x233   :  { %4331 = vrot.lane.b32.xlu0 %v16888_v59, %s16282_s22 }
 0x236   :  { %4568 = vrot.lane.b32.xlu1 %v16864_v53, %s16283_s0 }
 0x237   :  { %4566 = vrot.lane.b32.xlu0 %v16852_v50, %s16283_s0 }
 0x23a   :  { %4333 = vrot.lane.b32.xlu1 %v16881_v58, %s16282_s22 }
 0x23b   :  { %4564 = vrot.lane.b32.xlu0 %v16280_v0, %s16283_s0 }
 0x23e   :  { %4570 = vrot.lane.b32.xlu1 %v16837_v46, %s16283_s0 }
 0x23f   :  { %4572 = vrot.lane.b32.xlu0 %v16845_v49, %s16283_s0 }
 0x242   :  { %4574 = vrot.lane.b32.xlu1 %v16888_v59, %s16283_s0 }
 0x243   :  { %4576 = vrot.lane.b32.xlu0 %v16881_v58, %s16283_s0 }
 0x246   :  { %4815 = vrot.lane.b32.xlu1 %v16852_v50, %s16285_s24 }
 0x247   :  { %4817 = vrot.lane.b32.xlu0 %v16864_v53, %s16285_s24 }
 0x24a   :  { %4813 = vrot.lane.b32.xlu1 %v16280_v0, %s16285_s24 }
 0x24b   :  { %4819 = vrot.lane.b32.xlu0 %v16837_v46, %s16285_s24 }
 0x24e   :  { %4821 = vrot.lane.b32.xlu1 %v16845_v49, %s16285_s24 }
 0x24f   :  { %4823 = vrot.lane.b32.xlu0 %v16888_v59, %s16285_s24 }
 0x252   :  { %4825 = vrot.lane.b32.xlu1 %v16881_v58, %s16285_s24 }
 0x253   :  { %5288 = vrot.lane.b32.xlu0 %v16864_v53, %s16286_s27 }
 0x256   :  { %5290 = vrot.lane.b32.xlu1 %v16837_v46, %s16286_s27 }
 0x257   :  { %5286 = vrot.lane.b32.xlu0 %v16852_v50, %s16286_s27 }
 0x25a   :  { %5292 = vrot.lane.b32.xlu1 %v16845_v49, %s16286_s27 }
 0x25b   :  { %5294 = vrot.lane.b32.xlu0 %v16888_v59, %s16286_s27 }
 0x25e   :  { %5537 = vrot.lane.b32.xlu1 %v16864_v53, %s16288_s29 }
 0x25f   :  { %5298 = vrot.lane.b32.xlu0 %v16280_v0, %s16286_s27 }
 0x262   :  { %5535 = vrot.lane.b32.xlu1 %v16852_v50, %s16288_s29 }
 0x263   :  { %5539 = vrot.lane.b32.xlu0 %v16837_v46, %s16288_s29 }
 0x266   :  { %5296 = vrot.lane.b32.xlu1 %v16881_v58, %s16286_s27 }
 0x267   :  { %5541 = vrot.lane.b32.xlu0 %v16845_v49, %s16288_s29 }
 0x26a   :  { %5543 = vrot.lane.b32.xlu1 %v16888_v59, %s16288_s29 }
 0x26b   :  { %5786 = vrot.lane.b32.xlu0 %v16864_v53, %s16289_s10 }
 0x26e   :  { %5547 = vrot.lane.b32.xlu1 %v16280_v0, %s16288_s29 }
 0x26f   :  { %5545 = vrot.lane.b32.xlu0 %v16881_v58, %s16288_s29 }
 0x272   :  { %5788 = vrot.lane.b32.xlu1 %v16837_v46, %s16289_s10 }
 0x273   :  { %5784 = vrot.lane.b32.xlu0 %v16852_v50, %s16289_s10 }
 0x276   :  { %5790 = vrot.lane.b32.xlu1 %v16845_v49, %s16289_s10 }
 0x277   :  { %5792 = vrot.lane.b32.xlu0 %v16888_v59, %s16289_s10 }
 0x27a   :  { %6035 = vrot.lane.b32.xlu1 %v16864_v53, %s16290_s13 }
 0x27b   :  { %5796 = vrot.lane.b32.xlu0 %v16280_v0, %s16289_s10 }
 0x27e   :  { %5794 = vrot.lane.b32.xlu1 %v16881_v58, %s16289_s10 }
 0x27f   :  { %6037 = vrot.lane.b32.xlu0 %v16837_v46, %s16290_s13 }
 0x282   :  { %6033 = vrot.lane.b32.xlu1 %v16852_v50, %s16290_s13 }
 0x283   :  { %6039 = vrot.lane.b32.xlu0 %v16845_v49, %s16290_s13 }
 0x286   :  { %6041 = vrot.lane.b32.xlu1 %v16888_v59, %s16290_s13 }
 0x287   :  { %6043 = vrot.lane.b32.xlu0 %v16881_v58, %s16290_s13 }
 0x28a   :  { %6045 = vrot.lane.b32.xlu1 %v16280_v0, %s16290_s13 }
 0x290   :  { %v4086_v61 = vpop.permute.xlu1 %4085 }
 0x291   :  { %v4088_v62 = vpop.permute.xlu0 %4087 }
 0x292   :  { %v4096_v14 = vsel %vm89_vm1, %v4086_v61, %v4088_v62 }
 0x294   :  { %v4324_v63 = vpop.permute.xlu1 %4323 }
 0x295   :  { %v4082_v8 = vpop.permute.xlu0 %4081 }
 0x296   :  { %v4093_v13 = vsel %vm89_vm1, %v4080_v60, %v4082_v8 }
 0x298   :  { %v4084_v9 = vpop.permute.xlu1 %4083 }
 0x299   :  { %v4326_v10 = vpop.permute.xlu0 %4325  ;;  %v4094_v11 = vsel %vm89_vm1, %v4082_v8, %v4084_v9  ;;  %v4095_v16 = vsel %vm89_vm1, %v4084_v9, %v4086_v61 }
 0x29a   :  { %4108 = vmatprep.subr.mxu1 %v4094_v11  ;;  %v4336_v22 = vsel %vm333_vm2, %v4324_v63, %v4326_v10 }
 0x29b   :  { %4109 = vmatpush1.msra.mxu1 %v4093_v13  ;;  %v17069_v13 = vld [vmem:[%s18459_s4 + $0x20] sm:$0xff] }
 0x29c   :  { %v4322_v15 = vpop.permute.xlu1 %4321  ;;  %15761 = vmatmul.mubr.msk.f32.vlgmr.msra.gmra.mrb[2].mxu1 %vm102_vm0, %v16988_v12  ;;  %4179 = vmatprep.subr.mxu1 %v4096_v14 }
 0x29d   :  { %4180 = vmatpush1.msra.mxu1 %v4095_v16  ;;  %v4092_v17 = vpop.permute.xlu0 %4091  ;;  %4243 = vmatprep.mubr.f32.mxu1 %v16280_v0  ;;  %v4335_v23 = vsel %vm333_vm2, %v4322_v15, %v4324_v63 }
 0x2a0   :  { %v4090_v18 = vpop.permute.xlu1 %4089  ;;  %15762 = vmatmul.mubr.msk.f32.vlgmr.msra.gmra.mrb[4].mxu1 %vm102_vm0, %v16988_v12 }
 0x2a1   :  { %v4328_v19 = vpop.permute.xlu0 %4327  ;;  %v4098_v20 = vsel %vm89_vm1, %v4090_v18, %v4092_v17  ;;  %v4097_v21 = vsel %vm89_vm1, %v4088_v62, %v4090_v18  ;;  %4314 = vmatprep.mubr.f32.mxu1 %v16280_v0 }
 0x2a2   :  { %4250 = vmatprep.subr.mxu1 %v4098_v20  ;;  %v4337_v29 = vsel %vm333_vm2, %v4326_v10, %v4328_v19 }
 0x2a3   :  { %4251 = vmatpush1.msra.mxu1 %v4097_v21 }
 0x2a4   :  { %v4330_v24 = vpop.permute.xlu1 %4329  ;;  %15763 = vmatmul.mubr.msk.f32.vlgmr.msra.gmra.mrb[6].mxu1 %vm102_vm0, %v16988_v12  ;;  %4350 = vmatprep.subr.mxu1 %v4336_v22 }
 0x2a5   :  { %4351 = vmatpush1.msra.mxu1 %v4335_v23  ;;  %v4332_v25 = vpop.permute.xlu0 %4331  ;;  %v4338_v26 = vsel %vm333_vm2, %v4328_v19, %v4330_v24  ;;  %4414 = vmatprep.mubr.f32.mxu1 %v16280_v0  ;;  %v17090_v23 = vld [vmem:[%s18459_s4 + $0x28] sm:$0xff] }
 0x2a6   :  { %4421 = vmatprep.subr.mxu1 %v4338_v26  ;;  %v4339_v34 = vsel %vm333_vm2, %v4330_v24, %v4332_v25 }
 0x2a8   :  { %v4569_v28 = vpop.permute.xlu1 %4568  ;;  %15764 = vmatmul.mubr.msk.f32.vlgmr.msra.gmra.mrb[2].mxu1 %vm102_vm0, %v17010_v27 }
 0x2a9   :  { %4422 = vmatpush1.msra.mxu1 %v4337_v29  ;;  %v4567_v30 = vpop.permute.xlu0 %4566  ;;  %4485 = vmatprep.mubr.f32.mxu1 %v16280_v0 }
 0x2aa   :  { %v4579_v7 = vsel %vm577_vm3, %v4567_v30, %v4569_v28 }
 0x2ac   :  { %v4334_v31 = vpop.permute.xlu1 %4333  ;;  %15765 = vmatmul.mubr.msk.f32.vlgmr.msra.gmra.mrb[4].mxu1 %vm102_vm0, %v17010_v27 }
 0x2ad   :  { %v4565_v32 = vpop.permute.xlu0 %4564  ;;  %v4340_v33 = vsel %vm333_vm2, %v4332_v25, %v4334_v31  ;;  %4556 = vmatprep.mubr.f32.mxu1 %v16280_v0 }
 0x2ae   :  { %4492 = vmatprep.subr.mxu1 %v4340_v33  ;;  %v4578_v2 = vsel %vm577_vm3, %v4565_v32, %v4567_v30 }
 0x2af   :  { %4493 = vmatpush1.msra.mxu1 %v4339_v34 }
 0x2b0   :  { %v4571_v35 = vpop.permute.xlu1 %4570  ;;  %15766 = vmatmul.mubr.msk.f32.vlgmr.msra.gmra.mrb[6].mxu1 %vm102_vm0, %v17010_v27  ;;  %4593 = vmatprep.subr.mxu1 %v4579_v7 }
 0x2b1   :  { %4594 = vmatpush1.msra.mxu1 %v4578_v2  ;;  %v4573_v4 = vpop.permute.xlu0 %4572  ;;  %4657 = vmatprep.mubr.f32.mxu1 %v16280_v0  ;;  %v4580_v39 = vsel %vm577_vm3, %v4569_v28, %v4571_v35 }
 0x2b2   :  { %v4581_v37 = vsel %vm577_vm3, %v4571_v35, %v4573_v4  ;;  %v17110_v35 = vld [vmem:[%s18459_s4 + $0x30] sm:$0xff] }
 0x2b3   :  { %4664 = vmatprep.subr.mxu1 %v4581_v37 }
 0x2b4   :  { %v4575_v38 = vpop.permute.xlu1 %4574  ;;  %15767 = vmatmul.mubr.msk.f32.vlgmr.msra.gmra.mrb[2].mxu1 %vm102_vm0, %v17029_v36 }
 0x2b5   :  { %4665 = vmatpush1.msra.mxu1 %v4580_v39  ;;  %v4577_v1 = vpop.permute.xlu0 %4576  ;;  %4728 = vmatprep.mubr.f32.mxu1 %v16280_v0  ;;  %v4582_v6 = vsel %vm577_vm3, %v4573_v4, %v4575_v38 }
 0x2b6   :  { %v4583_v3 = vsel %vm577_vm3, %v4575_v38, %v4577_v1 }
 0x2b7   :  { %4735 = vmatprep.subr.mxu1 %v4583_v3 }
 0x2b8   :  { %v4816_v40 = vpop.permute.xlu1 %4815  ;;  %15768 = vmatmul.mubr.msk.f32.vlgmr.msra.gmra.mrb[4].mxu1 %vm102_vm0, %v17029_v36 }
 0x2b9   :  { %4736 = vmatpush1.msra.mxu1 %v4582_v6  ;;  %v4818_v5 = vpop.permute.xlu0 %4817  ;;  %4799 = vmatprep.mubr.f32.mxu1 %v16280_v0 }
 0x2ba   :  { %v4828_v43 = vsel %vm1077_vm5, %v4816_v40, %v4818_v5 }
 0x2bb   :  { %4842 = vmatprep.subr.mxu1 %v4828_v43 }
 0x2bc   :  { %v4814_v44 = vpop.permute.xlu1 %4813  ;;  %15769 = vmatmul.mubr.msk.f32.vlgmr.msra.gmra.mrb[6].mxu1 %vm102_vm0, %v17029_v36 }
 0x2bd   :  { %v4827_v45 = vsel %vm1077_vm5, %v4814_v44, %v4816_v40  ;;  %v4820_v47 = vpop.permute.xlu0 %4819  ;;  %4906 = vmatprep.mubr.f32.mxu1 %v16280_v0 }
 0x2be   :  { %4843 = vmatpush1.msra.mxu1 %v4827_v45  ;;  %v4829_v61 = vsel %vm1077_vm5, %v4818_v5, %v4820_v47 }
 0x2c0   :  { %v4822_v54 = vpop.permute.xlu1 %4821  ;;  %15770 = vmatmul.mubr.msk.f32.vlgmr.msra.gmra.mrb[2].mxu1 %vm102_vm0, %v17049_v51 }
 0x2c1   :  { %v4824_v56 = vpop.permute.xlu0 %4823  ;;  %v4830_v60 = vsel %vm1077_vm5, %v4820_v47, %v4822_v54  ;;  %4977 = vmatprep.mubr.f32.mxu1 %v16280_v0  ;;  %v17130_v47 = vld [vmem:[%s18459_s4 + $0x38] sm:$0xff] }
 0x2c2   :  { %4913 = vmatprep.subr.mxu1 %v4830_v60  ;;  %v4831_v9 = vsel %vm1077_vm5, %v4822_v54, %v4824_v56 }
 0x2c3   :  { %4914 = vmatpush1.msra.mxu1 %v4829_v61 }
 0x2c4   :  { %v4826_v62 = vpop.permute.xlu1 %4825  ;;  %15771 = vmatmul.mubr.msk.f32.vlgmr.msra.gmra.mrb[4].mxu1 %vm102_vm0, %v17049_v51 }
 0x2c5   :  { %v5289_v63 = vpop.permute.xlu0 %5288  ;;  %v4832_v8 = vsel %vm1077_vm5, %v4824_v56, %v4826_v62  ;;  %5048 = vmatprep.mubr.f32.mxu1 %v16280_v0 }
 0x2c6   :  { %4984 = vmatprep.subr.mxu1 %v4832_v8 }
 0x2c7   :  { %4985 = vmatpush1.msra.mxu1 %v4831_v9 }
 0x2c8   :  { %v5291_v10 = vpop.permute.xlu1 %5290  ;;  %15772 = vmatmul.mubr.msk.f32.vlgmr.msra.gmra.mrb[6].mxu1 %vm102_vm0, %v17049_v51  ;;  %5065 = vmatprep.subr.mxu1 %v16864_v53 }
 0x2c9   :  { %5066 = vmatpush1.msra.mxu1 %v16852_v50  ;;  %v5287_v11 = vpop.permute.xlu0 %5286  ;;  %5129 = vmatprep.mubr.f32.mxu1 %v16280_v0  ;;  %v5301_v17 = vsel %vm1551_vm6, %v5289_v63, %v5291_v10 }
 0x2ca   :  { %5136 = vmatprep.subr.mxu1 %v16845_v49  ;;  %v5300_v19 = vsel %vm1551_vm6, %v5287_v11, %v5289_v63 }
 0x2cc   :  { %v5293_v14 = vpop.permute.xlu1 %5292  ;;  %15773 = vmatmul.mubr.msk.f32.vlgmr.msra.gmra.mrb[2].mxu1 %vm102_vm0, %v17069_v13 }
 0x2cd   :  { %5137 = vmatpush1.msra.mxu1 %v16837_v46  ;;  %v5295_v15 = vpop.permute.xlu0 %5294  ;;  %5200 = vmatprep.mubr.f32.mxu1 %v16280_v0  ;;  %v5302_v25 = vsel %vm1551_vm6, %v5291_v10, %v5293_v14 }
 0x2ce   :  { %5207 = vmatprep.subr.mxu1 %v16881_v58  ;;  %v5303_v21 = vsel %vm1551_vm6, %v5293_v14, %v5295_v15 }
 0x2d0   :  { %v5538_v16 = vpop.permute.xlu1 %5537  ;;  %15774 = vmatmul.mubr.msk.f32.vlgmr.msra.gmra.mrb[4].mxu1 %vm102_vm0, %v17069_v13 }
 0x2d1   :  { %5208 = vmatpush1.msra.mxu1 %v16888_v59  ;;  %v5299_v18 = vpop.permute.xlu0 %5298  ;;  %5271 = vmatprep.mubr.f32.mxu1 %v16280_v0 }
 0x2d2   :  { %5315 = vmatprep.subr.mxu1 %v5301_v17 }
 0x2d4   :  { %v5536_v20 = vpop.permute.xlu1 %5535  ;;  %15775 = vmatmul.mubr.msk.f32.vlgmr.msra.gmra.mrb[6].mxu1 %vm102_vm0, %v17069_v13 }
 0x2d5   :  { %5316 = vmatpush1.msra.mxu1 %v5300_v19  ;;  %v5540_v22 = vpop.permute.xlu0 %5539  ;;  %5379 = vmatprep.mubr.f32.mxu1 %v16280_v0  ;;  %v5549_v33 = vsel %vm2051_vm8, %v5536_v20, %v5538_v16 }
 0x2d6   :  { %5386 = vmatprep.subr.mxu1 %v5303_v21  ;;  %v5550_v31 = vsel %vm2051_vm8, %v5538_v16, %v5540_v22 }
 0x2d8   :  { %v5297_v24 = vpop.permute.xlu1 %5296  ;;  %15776 = vmatmul.mubr.msk.f32.vlgmr.msra.gmra.mrb[2].mxu1 %vm102_vm0, %v17090_v23 }
 0x2d9   :  { %5387 = vmatpush1.msra.mxu1 %v5302_v25  ;;  %v5542_v26 = vpop.permute.xlu0 %5541  ;;  %v5305_v28 = vsel %vm1551_vm6, %v5297_v24, %v5299_v18  ;;  %5450 = vmatprep.mubr.f32.mxu1 %v16280_v0  ;;  %v5304_v30 = vsel %vm1551_vm6, %v5295_v15, %v5297_v24  ;;  %v17150_v15 = vld [vmem:[%s18459_s4 + $0x40] sm:$0xff] }
 0x2da   :  { %5457 = vmatprep.subr.mxu1 %v5305_v28  ;;  %v5551_v37 = vsel %vm2051_vm8, %v5540_v22, %v5542_v26 }
 0x2dc   :  { %v5544_v29 = vpop.permute.xlu1 %5543  ;;  %15777 = vmatmul.mubr.msk.f32.vlgmr.msra.gmra.mrb[4].mxu1 %vm102_vm0, %v17090_v23 }
 0x2dd   :  { %5458 = vmatpush1.msra.mxu1 %v5304_v30  ;;  %v5787_v32 = vpop.permute.xlu0 %5786  ;;  %5521 = vmatprep.mubr.f32.mxu1 %v16280_v0  ;;  %v5552_v7 = vsel %vm2051_vm8, %v5542_v26, %v5544_v29 }
 0x2de   :  { %5564 = vmatprep.subr.mxu1 %v5550_v31 }
 0x2e0   :  { %v5548_v34 = vpop.permute.xlu1 %5547  ;;  %15778 = vmatmul.mubr.msk.f32.vlgmr.msra.gmra.mrb[6].mxu1 %vm102_vm0, %v17090_v23 }
 0x2e1   :  { %5565 = vmatpush1.msra.mxu1 %v5549_v33  ;;  %v5546_v2 = vpop.permute.xlu0 %5545  ;;  %5628 = vmatprep.mubr.f32.mxu1 %v16280_v0 }
 0x2e2   :  { %5635 = vmatprep.subr.mxu1 %v5552_v7  ;;  %v5554_v38 = vsel %vm2051_vm8, %v5546_v2, %v5548_v34  ;;  %v5553_v3 = vsel %vm2051_vm8, %v5544_v29, %v5546_v2 }
 0x2e4   :  { %v5789_v4 = vpop.permute.xlu1 %5788  ;;  %15779 = vmatmul.mubr.msk.f32.vlgmr.msra.gmra.mrb[2].mxu1 %vm102_vm0, %v17110_v35 }
 0x2e5   :  { %5636 = vmatpush1.msra.mxu1 %v5551_v37  ;;  %v5785_v39 = vpop.permute.xlu0 %5784  ;;  %5699 = vmatprep.mubr.f32.mxu1 %v16280_v0  ;;  %v5799_v40 = vsel %vm2301_vm9, %v5787_v32, %v5789_v4 }
 0x2e6   :  { %5706 = vmatprep.subr.mxu1 %v5554_v38  ;;  %v5798_v5 = vsel %vm2301_vm9, %v5785_v39, %v5787_v32 }
 0x2e8   :  { %v5791_v1 = vpop.permute.xlu1 %5790  ;;  %15780 = vmatmul.mubr.msk.f32.vlgmr.msra.gmra.mrb[4].mxu1 %vm102_vm0, %v17110_v35 }
 0x2e9   :  { %5707 = vmatpush1.msra.mxu1 %v5553_v3  ;;  %v5793_v6 = vpop.permute.xlu0 %5792  ;;  %5770 = vmatprep.mubr.f32.mxu1 %v16280_v0  ;;  %v5800_v56 = vsel %vm2301_vm9, %v5789_v4, %v5791_v1 }
 0x2ea   :  { %5813 = vmatprep.subr.mxu1 %v5799_v40  ;;  %v5801_v44 = vsel %vm2301_vm9, %v5791_v1, %v5793_v6 }
 0x2ec   :  { %v6036_v43 = vpop.permute.xlu1 %6035  ;;  %15781 = vmatmul.mubr.msk.f32.vlgmr.msra.gmra.mrb[6].mxu1 %vm102_vm0, %v17110_v35 }
 0x2ed   :  { %5814 = vmatpush1.msra.mxu1 %v5798_v5  ;;  %v5797_v45 = vpop.permute.xlu0 %5796  ;;  %5877 = vmatprep.mubr.f32.mxu1 %v16280_v0 }
 0x2ee   :  { %5884 = vmatprep.subr.mxu1 %v5801_v44 }
 0x2f0   :  { %v5795_v54 = vpop.permute.xlu1 %5794  ;;  %15782 = vmatmul.mubr.msk.f32.vlgmr.msra.gmra.mrb[2].mxu1 %vm102_vm0, %v17130_v47 }
 0x2f1   :  { %5885 = vmatpush1.msra.mxu1 %v5800_v56  ;;  %v6038_v60 = vpop.permute.xlu0 %6037  ;;  %v5803_v61 = vsel %vm2301_vm9, %v5795_v54, %v5797_v45  ;;  %5948 = vmatprep.mubr.f32.mxu1 %v16280_v0  ;;  %v5802_v63 = vsel %vm2301_vm9, %v5793_v6, %v5795_v54 }
 0x2f2   :  { %5955 = vmatprep.subr.mxu1 %v5803_v61  ;;  %v6048_v8 = vsel %vm2551_vm10, %v6036_v43, %v6038_v60 }
 0x2f4   :  { %v6034_v62 = vpop.permute.xlu1 %6033  ;;  %15783 = vmatmul.mubr.msk.f32.vlgmr.msra.gmra.mrb[4].mxu1 %vm102_vm0, %v17130_v47 }
 0x2f5   :  { %5956 = vmatpush1.msra.mxu1 %v5802_v63  ;;  %6019 = vmatprep.mubr.f32.mxu1 %v16280_v0  ;;  %v6040_v9 = vpop.permute.xlu0 %6039  ;;  %v6047_v10 = vsel %vm2551_vm10, %v6034_v62, %v6036_v43 }
 0x2f6   :  { %6062 = vmatprep.subr.mxu1 %v6048_v8  ;;  %v6049_v18 = vsel %vm2551_vm10, %v6038_v60, %v6040_v9 }
 0x2f8   :  { %v6042_v11 = vpop.permute.xlu1 %6041  ;;  %15784 = vmatmul.mubr.msk.f32.vlgmr.msra.gmra.mrb[6].mxu1 %vm102_vm0, %v17130_v47 }
 0x2f9   :  { %6063 = vmatpush1.msra.mxu1 %v6047_v10  ;;  %v6050_v14 = vsel %vm2551_vm10, %v6040_v9, %v6042_v11  ;;  %6126 = vmatprep.mubr.f32.mxu1 %v16280_v0  ;;  %v6044_v16 = vpop.permute.xlu0 %6043 }
 0x2fa   :  { %6133 = vmatprep.subr.mxu1 %v6050_v14  ;;  %v6051_v20 = vsel %vm2551_vm10, %v6042_v11, %v6044_v16  ;;  %v17173_v11 = vld [vmem:[%s18460_s5] sm:$0xff] }
 0x2fc   :  { %v6046_v17 = vpop.permute.xlu1 %6045  ;;  %15785 = vmatmul.mubr.msk.f32.vlgmr.msra.gmra.mrb[2].mxu1 %vm102_vm0, %v17150_v15 }
 0x2fd   :  { %6134 = vmatpush1.msra.mxu1 %v6049_v18  ;;  %v6052_v19 = vsel %vm2551_vm10, %v6044_v16, %v6046_v17  ;;  %6197 = vmatprep.mubr.f32.mxu1 %v16280_v0  ;;  %v17179_v17 = vld [vmem:[%s18461_s6] sm:$0xff] }
 0x2fe   :  { %6204 = vmatprep.subr.mxu1 %v6052_v19 }
 0x300   :  { %15786 = vmatmul.mubr.msk.f32.vlgmr.msra.gmra.mrb[4].mxu1 %vm102_vm0, %v17150_v15 }
 0x301   :  { %6205 = vmatpush1.msra.mxu1 %v6051_v20  ;;  %6268 = vmatprep.mubr.f32.mxu1 %v16280_v0 }
 0x304   :  { %15787 = vmatmul.mubr.msk.f32.vlgmr.msra.gmra.mrb[6].mxu1 %vm102_vm0, %v17150_v15 }
 0x305   :  { %8772 = vmatprep.mubr.f32.mxu1 %v16280_v0 }
 0x3cf   :  { %v6128_v21 = vpop.f32.mrb[2].mxu1 }
 0x3d0   :  { %v6281_v22 = vmul.f32 %v6128_v21, %v16842_v48  ;;  %v6130_v24 = vpop.f32.mrb[3].mxu1 }
 0x3d1   :  { %v6282_v25 = vmul.f32 %v6130_v24, %v16857_v52 }
 0x3d2   :  { %v6295_v26 = vmul.f32 %v6281_v22, %v6281_v22 }
 0x3d3   :  { %v6287_v28 = vadd.f32 %v6282_v25, %v6281_v22  ;;  %v6296_v29 = vmul.f32 %v6282_v25, %v6282_v25  ;;  %v6199_v30 = vpop.f32.mrb[4].mxu1 }
 0x3d4   :  { %v6283_v31 = vmul.f32 %v6199_v30, %v16829_v41  ;;  %v6201_v32 = vpop.f32.mrb[5].mxu1 }
 0x3d5   :  { %v6301_v33 = vadd.f32 %v6296_v29, %v6295_v26  ;;  %v6284_v34 = vmul.f32 %v6201_v32, %v16834_v42 }
 0x3d6   :  { %v6288_v7 = vadd.f32 %v6287_v28, %v6283_v31  ;;  %v6297_v2 = vmul.f32 %v6283_v31, %v6283_v31 }
 0x3d7   :  { %v6298_v4 = vmul.f32 %v6284_v34, %v6284_v34  ;;  %v6270_v37 = vpop.f32.mrb[6].mxu1 }
 0x3d8   :  { %v6302_v38 = vadd.f32 %v6301_v33, %v6297_v2  ;;  %v6289_v39 = vadd.f32 %v6288_v7, %v6284_v34  ;;  %v6285_v1 = vmul.f32 %v6270_v37, %v16878_v57  ;;  %v6272_v3 = vpop.f32.mrb[7].mxu1 }
 0x3d9   :  { %v6286_v40 = vmul.f32 %v6272_v3, %v16869_v55 }
 0x3da   :  { %v6303_v6 = vadd.f32 %v6302_v38, %v6298_v4  ;;  %v6290_v5 = vadd.f32 %v6289_v39, %v6285_v1  ;;  %v6299_v43 = vmul.f32 %v6285_v1, %v6285_v1 }
 0x3db   :  { %v6300_v44 = vmul.f32 %v6286_v40, %v6286_v40 }
 0x3dc   :  { %v6291_v45 = vadd.f32 %v6290_v5, %v6286_v40  ;;  %v6304_v54 = vadd.f32 %v6303_v6, %v6299_v43 }
 0x3de   :  { %6292 = vadd.xlane.f32.xlu0 %v6291_v45  ;;  %v6305_v56 = vadd.f32 %v6304_v54, %v6300_v44 }
 0x3e0   :  { %6306 = vadd.xlane.f32.xlu1 %v6305_v56 }
 0x46b   :  { %v6293_v60 = vpop.xlane.xlu0 %6292 }
 0x46c   :  { %v6294_v61 = vmul.f32 0.0022222223, %v6293_v60 }
 0x46d   :  { %v6307_v62 = vpop.xlane.xlu1 %6306 }
 0x46e   :  { %v6309_v63 = vmul.f32 %v6294_v61, %v6294_v61  ;;  %v6308_v8 = vmul.f32 0.0022222223, %v6307_v62 }
 0x470   :  { %v6310_v9 = vsub.f32 %v6308_v8, %v6309_v63 }
 0x472   :  { %v6311_v10 = vadd.f32 1e-05, %v6310_v9 }
 0x474   :  { %16254 = vrsqrt.f32 %v6311_v10 }
 0x47e   :  { %v16255_v14 = vpop.eup %16254 }
 0x47f   :  { %v6313_v16 = vmul.f32 %v16255_v14, %v17173_v11 }
 0x481   :  { %6318 = vperm.xlu0 %16253, %v6313_v16   ;;  %v6314_v18 = vmul.f32 %v6313_v16, %v6294_v61 }
 0x483   :  { %v6315_v19 = vsub.f32 %v17179_v17, %v6314_v18 }
 0x485   :  { %6329 = vperm.xlu1 %16252, %v6315_v19   ;;  %6864 = vrot.lane.b32.xlu0 %v16280_v0, %s16283_s0 }
 0x489   :  { %6379 = vrot.lane.b32.xlu1 %v16280_v0, %s16281_s30 }
 0x48d   :  { %6621 = vrot.lane.b32.xlu1 %v16280_v0, %s16282_s22 }
 0x491   :  { %7113 = vrot.lane.b32.xlu1 %v16280_v0, %s16285_s24 }
 0x500   :  { %v6319_v20 = vpop.permute.xlu0 %6318 }
 0x501   :  { %v6321_v24 = vmul.f32 %v6319_v20, %v6281_v22  ;;  %v6322_v26 = vmul.f32 %v6319_v20, %v6282_v25  ;;  %v6326_v30 = vmul.f32 %v6319_v20, %v6286_v40  ;;  %v6323_v37 = vmul.f32 %v6319_v20, %v6283_v31 }
 0x504   :  { %v6330_v21 = vpop.permute.xlu1 %6329  ;;  %v6865_v5 = vpop.permute.xlu0 %6864 }
 0x505   :  { %v6332_v28 = vmul.f32 %v6330_v21, %v16842_v48  ;;  %v6333_v29 = vmul.f32 %v6330_v21, %v16857_v52  ;;  %v6337_v32 = vmul.f32 %v6330_v21, %v16869_v55  ;;  %v6334_v33 = vmul.f32 %v6330_v21, %v16829_v41 }
 0x506   :  { %v6335_v3 = vmul.f32 %v6330_v21, %v16834_v42  ;;  %v6336_v48 = vmul.f32 %v6330_v21, %v16878_v57  ;;  %v6324_v55 = vmul.f32 %v6319_v20, %v6284_v34  ;;  %v6325_v41 = vmul.f32 %v6319_v20, %v6285_v1 }
 0x507   :  { %v6338_v7 = vadd.f32 %v6332_v28, %v6321_v24  ;;  %v6339_v2 = vadd.f32 %v6333_v29, %v6322_v26  ;;  %v6343_v4 = vadd.f32 %v6337_v32, %v6326_v30  ;;  %v6340_v6 = vadd.f32 %v6334_v33, %v6323_v37 }
 0x508   :  { %v6341_v31 = vadd.f32 %v6335_v3, %v6324_v55 }
 0x509   :  { %v6344_v38 = vmax.f32 %v6338_v7, 0.0  ;;  %v6349_v39 = vmax.f32 %v6343_v4, 0.0  ;;  %v6345_v22 = vmax.f32 %v6339_v2, 0.0  ;;  %v6346_v42 = vmax.f32 %v6340_v6, 0.0 }
 0x50a   :  { %v6347_v57 = vmax.f32 %v6341_v31, 0.0 }
 0x50b   :  { %v17196_v25 = vadd.f32 %v6344_v38, %v16852_v50  ;;  %v17200_v52 = vadd.f32 %v6349_v39, %v16881_v58  ;;  %v17207_v40 = vadd.f32 %v6345_v22, %v16864_v53  ;;  %v6342_v50 = vadd.f32 %v6336_v48, %v6325_v41 }
 0x50c   :  { %v17214_v58 = vadd.f32 %v6346_v42, %v16837_v46  ;;  %v17221_v53 = vadd.f32 %v6347_v57, %v16845_v49  ;;  %v6380_v46 = vpop.permute.xlu1 %6379 }
 0x50d   :  { %6381 = vrot.lane.b32.xlu1 %v17196_v25, %s16281_s30  ;;  %6391 = vrot.lane.b32.xlu0 %v17200_v52, %s16281_s30  ;;  %v6348_v34 = vmax.f32 %v6342_v50, 0.0 }
 0x50f   :  { %v17224_v1 = vadd.f32 %v6348_v34, %v16888_v59 }
 0x510   :  { %v6622_v49 = vpop.permute.xlu1 %6621 }
 0x511   :  { %6383 = vrot.lane.b32.xlu1 %v17207_v40, %s16281_s30  ;;  %6625 = vrot.lane.b32.xlu0 %v17207_v40, %s16282_s22 }
 0x514   :  { %v17318_v59 = vpop.permute.xlu1 %7113 }
 0x515   :  { %6385 = vrot.lane.b32.xlu1 %v17214_v58, %s16281_s30  ;;  %6627 = vrot.lane.b32.xlu0 %v17214_v58, %s16282_s22 }
 0x519   :  { %6387 = vrot.lane.b32.xlu1 %v17221_v53, %s16281_s30  ;;  %6631 = vrot.lane.b32.xlu0 %v17224_v1, %s16282_s22 }
 0x51d   :  { %6389 = vrot.lane.b32.xlu1 %v17224_v1, %s16281_s30  ;;  %6866 = vrot.lane.b32.xlu0 %v17196_v25, %s16283_s0 }
 0x521   :  { %6623 = vrot.lane.b32.xlu1 %v17196_v25, %s16282_s22  ;;  %6872 = vrot.lane.b32.xlu0 %v17221_v53, %s16283_s0 }
 0x525   :  { %6629 = vrot.lane.b32.xlu1 %v17221_v53, %s16282_s22  ;;  %6876 = vrot.lane.b32.xlu0 %v17200_v52, %s16283_s0 }
 0x529   :  { %6633 = vrot.lane.b32.xlu1 %v17200_v52, %s16282_s22  ;;  %7117 = vrot.lane.b32.xlu0 %v17207_v40, %s16285_s24 }
 0x52d   :  { %6868 = vrot.lane.b32.xlu1 %v17207_v40, %s16283_s0  ;;  %7119 = vrot.lane.b32.xlu0 %v17214_v58, %s16285_s24 }
 0x531   :  { %6870 = vrot.lane.b32.xlu1 %v17214_v58, %s16283_s0  ;;  %7123 = vrot.lane.b32.xlu0 %v17224_v1, %s16285_s24 }
 0x535   :  { %6874 = vrot.lane.b32.xlu1 %v17224_v1, %s16283_s0  ;;  %7598 = vrot.lane.b32.xlu0 %v16280_v0, %s16286_s27 }
 0x539   :  { %7115 = vrot.lane.b32.xlu1 %v17196_v25, %s16285_s24  ;;  %7588 = vrot.lane.b32.xlu0 %v17207_v40, %s16286_s27 }
 0x53d   :  { %7121 = vrot.lane.b32.xlu1 %v17221_v53, %s16285_s24  ;;  %7586 = vrot.lane.b32.xlu0 %v17196_v25, %s16286_s27 }
 0x541   :  { %7125 = vrot.lane.b32.xlu1 %v17200_v52, %s16285_s24  ;;  %7594 = vrot.lane.b32.xlu0 %v17224_v1, %s16286_s27 }
 0x545   :  { %7847 = vrot.lane.b32.xlu1 %v16280_v0, %s16288_s29  ;;  %7839 = vrot.lane.b32.xlu0 %v17214_v58, %s16288_s29 }
 0x549   :  { %7590 = vrot.lane.b32.xlu1 %v17214_v58, %s16286_s27  ;;  %7841 = vrot.lane.b32.xlu0 %v17221_v53, %s16288_s29 }
 0x54d   :  { %7592 = vrot.lane.b32.xlu1 %v17221_v53, %s16286_s27  ;;  %7845 = vrot.lane.b32.xlu0 %v17200_v52, %s16288_s29 }
 0x551   :  { %7596 = vrot.lane.b32.xlu1 %v17200_v52, %s16286_s27  ;;  %8086 = vrot.lane.b32.xlu0 %v17207_v40, %s16289_s10 }
 0x555   :  { %7837 = vrot.lane.b32.xlu1 %v17207_v40, %s16288_s29  ;;  %8084 = vrot.lane.b32.xlu0 %v17196_v25, %s16289_s10 }
 0x559   :  { %7835 = vrot.lane.b32.xlu1 %v17196_v25, %s16288_s29  ;;  %8092 = vrot.lane.b32.xlu0 %v17224_v1, %s16289_s10 }
 0x55d   :  { %7843 = vrot.lane.b32.xlu1 %v17224_v1, %s16288_s29  ;;  %8096 = vrot.lane.b32.xlu0 %v16280_v0, %s16289_s10 }
 0x561   :  { %8088 = vrot.lane.b32.xlu1 %v17214_v58, %s16289_s10  ;;  %8337 = vrot.lane.b32.xlu0 %v17214_v58, %s16290_s13 }
 0x565   :  { %8090 = vrot.lane.b32.xlu1 %v17221_v53, %s16289_s10  ;;  %8339 = vrot.lane.b32.xlu0 %v17221_v53, %s16290_s13 }
 0x569   :  { %8094 = vrot.lane.b32.xlu1 %v17200_v52, %s16289_s10  ;;  %8343 = vrot.lane.b32.xlu0 %v17200_v52, %s16290_s13 }
 0x56d   :  { %8335 = vrot.lane.b32.xlu1 %v17207_v40, %s16290_s13 }
 0x571   :  { %8333 = vrot.lane.b32.xlu1 %v17196_v25, %s16290_s13 }
 0x575   :  { %8341 = vrot.lane.b32.xlu1 %v17224_v1, %s16290_s13 }
 0x579   :  { %8345 = vrot.lane.b32.xlu1 %v16280_v0, %s16290_s13 }
 0x57f   :  { %v6382_v43 = vpop.permute.xlu1 %6381  ;;  %v6392_v44 = vpop.permute.xlu0 %6391 }
 0x580   :  { %v6393_v60 = vsel %vm89_vm1, %v6380_v46, %v6382_v43 }
 0x583   :  { %v6384_v45 = vpop.permute.xlu1 %6383  ;;  %v6626_v54 = vpop.permute.xlu0 %6625 }
 0x584   :  { %v6394_v56 = vsel %vm89_vm1, %v6382_v43, %v6384_v45 }
 0x585   :  { %6408 = vmatprep.subr.mxu0 %v6394_v56 }
 0x586   :  { %6409 = vmatpush1.msra.mxu0 %v6393_v60 }
 0x587   :  { %v6386_v61 = vpop.permute.xlu1 %6385  ;;  %15788 = vmatmul.mubr.msk.f32.vlgmr.msra.gmra.mrb[6].mxu0 %vm102_vm0, %v16988_v12  ;;  %v6628_v62 = vpop.permute.xlu0 %6627 }
 0x588   :  { %6543 = vmatprep.mubr.f32.mxu0 %v16280_v0  ;;  %v6395_v10 = vsel %vm89_vm1, %v6384_v45, %v6386_v61 }
 0x58b   :  { %v6388_v63 = vpop.permute.xlu1 %6387  ;;  %v6632_v8 = vpop.permute.xlu0 %6631 }
 0x58c   :  { %v6396_v9 = vsel %vm89_vm1, %v6386_v61, %v6388_v63 }
 0x58d   :  { %6479 = vmatprep.subr.mxu0 %v6396_v9 }
 0x58e   :  { %6480 = vmatpush1.msra.mxu0 %v6395_v10 }
 0x58f   :  { %15789 = vmatmul.mubr.msk.f32.vlgmr.msra.gmra.mrb[8].mxu0 %vm102_vm0, %v16988_v12  ;;  %v6390_v14 = vpop.permute.xlu1 %6389  ;;  %v6867_v16 = vpop.permute.xlu0 %6866 }
 0x590   :  { %v6398_v18 = vsel %vm89_vm1, %v6390_v14, %v6392_v44  ;;  %v6397_v19 = vsel %vm89_vm1, %v6388_v63, %v6390_v14  ;;  %6614 = vmatprep.mubr.f32.mxu0 %v16280_v0  ;;  %v6878_v39 = vsel %vm577_vm3, %v6865_v5, %v6867_v16 }
 0x591   :  { %6550 = vmatprep.subr.mxu0 %v6398_v18 }
 0x592   :  { %6551 = vmatpush1.msra.mxu0 %v6397_v19 }
 0x593   :  { %15790 = vmatmul.mubr.msk.f32.vlgmr.msra.gmra.mrb[10].mxu0 %vm102_vm0, %v16988_v12  ;;  %v6624_v20 = vpop.permute.xlu1 %6623  ;;  %v6873_v21 = vpop.permute.xlu0 %6872  ;;  %v6637_v12 = vsel %vm333_vm2, %v6626_v54, %v6628_v62 }
 0x594   :  { %v6636_v24 = vsel %vm333_vm2, %v6624_v20, %v6626_v54  ;;  %v6635_v26 = vsel %vm333_vm2, %v6622_v49, %v6624_v20  ;;  %6714 = vmatprep.mubr.f32.mxu0 %v16280_v0 }
 0x595   :  { %6650 = vmatprep.subr.mxu0 %v6636_v24 }
 0x596   :  { %6651 = vmatpush1.msra.mxu0 %v6635_v26 }
 0x597   :  { %15791 = vmatmul.mubr.msk.f32.vlgmr.msra.gmra.mrb[6].mxu0 %vm102_vm0, %v17010_v27  ;;  %v6630_v28 = vpop.permute.xlu1 %6629  ;;  %v6877_v29 = vpop.permute.xlu0 %6876 }
 0x598   :  { %v6638_v30 = vsel %vm333_vm2, %v6628_v62, %v6630_v28  ;;  %6785 = vmatprep.mubr.f32.mxu0 %v16280_v0  ;;  %v6639_v2 = vsel %vm333_vm2, %v6630_v28, %v6632_v8 }
 0x599   :  { %6721 = vmatprep.subr.mxu0 %v6638_v30 }
 0x59a   :  { %6722 = vmatpush1.msra.mxu0 %v6637_v12 }
 0x59b   :  { %15792 = vmatmul.mubr.msk.f32.vlgmr.msra.gmra.mrb[8].mxu0 %vm102_vm0, %v17010_v27  ;;  %v6634_v32 = vpop.permute.xlu1 %6633  ;;  %v7118_v33 = vpop.permute.xlu0 %7117 }
 0x59c   :  { %v6640_v7 = vsel %vm333_vm2, %v6632_v8, %v6634_v32  ;;  %6856 = vmatprep.mubr.f32.mxu0 %v16280_v0 }
 0x59d   :  { %6792 = vmatprep.subr.mxu0 %v6640_v7 }
 0x59e   :  { %6793 = vmatpush1.msra.mxu0 %v6639_v2 }
 0x59f   :  { %15793 = vmatmul.mubr.msk.f32.vlgmr.msra.gmra.mrb[10].mxu0 %vm102_vm0, %v17010_v27  ;;  %v6869_v4 = vpop.permute.xlu1 %6868  ;;  %v7120_v37 = vpop.permute.xlu0 %7119 }
 0x5a0   :  { %v6879_v38 = vsel %vm577_vm3, %v6867_v16, %v6869_v4  ;;  %6957 = vmatprep.mubr.f32.mxu0 %v16280_v0 }
 0x5a1   :  { %6893 = vmatprep.subr.mxu0 %v6879_v38 }
 0x5a2   :  { %6894 = vmatpush1.msra.mxu0 %v6878_v39 }
 0x5a3   :  { %15794 = vmatmul.mubr.msk.f32.vlgmr.msra.gmra.mrb[6].mxu0 %vm102_vm0, %v17029_v36  ;;  %v6871_v3 = vpop.permute.xlu1 %6870  ;;  %v7124_v6 = vpop.permute.xlu0 %7123 }
 0x5a4   :  { %v6881_v22 = vsel %vm577_vm3, %v6871_v3, %v6873_v21  ;;  %v6880_v48 = vsel %vm577_vm3, %v6869_v4, %v6871_v3  ;;  %7028 = vmatprep.mubr.f32.mxu0 %v16280_v0 }
 0x5a5   :  { %6964 = vmatprep.subr.mxu0 %v6881_v22 }
 0x5a6   :  { %6965 = vmatpush1.msra.mxu0 %v6880_v48 }
 0x5a7   :  { %15795 = vmatmul.mubr.msk.f32.vlgmr.msra.gmra.mrb[8].mxu0 %vm102_vm0, %v17029_v36  ;;  %v6875_v27 = vpop.permute.xlu1 %6874  ;;  %v17359_v55 = vpop.permute.xlu0 %7598 }
 0x5a8   :  { %v6883_v41 = vsel %vm577_vm3, %v6875_v27, %v6877_v29  ;;  %v6882_v31 = vsel %vm577_vm3, %v6873_v21, %v6875_v27  ;;  %7099 = vmatprep.mubr.f32.mxu0 %v16280_v0 }
 0x5a9   :  { %7035 = vmatprep.subr.mxu0 %v6883_v41 }
 0x5aa   :  { %7036 = vmatpush1.msra.mxu0 %v6882_v31 }
 0x5ab   :  { %15796 = vmatmul.mubr.msk.f32.vlgmr.msra.gmra.mrb[10].mxu0 %vm102_vm0, %v17029_v36  ;;  %v7116_v42 = vpop.permute.xlu1 %7115  ;;  %v7589_v50 = vpop.permute.xlu0 %7588  ;;  %v7129_v36 = vsel %vm1077_vm5, %v7118_v33, %v7120_v37 }
 0x5ac   :  { %v7128_v57 = vsel %vm1077_vm5, %v7116_v42, %v7118_v33  ;;  %v7127_v34 = vsel %vm1077_vm5, %v17318_v59, %v7116_v42  ;;  %7206 = vmatprep.mubr.f32.mxu0 %v16280_v0 }
 0x5ad   :  { %7142 = vmatprep.subr.mxu0 %v7128_v57 }
 0x5ae   :  { %7143 = vmatpush1.msra.mxu0 %v7127_v34 }
 0x5af   :  { %15797 = vmatmul.mubr.msk.f32.vlgmr.msra.gmra.mrb[6].mxu0 %vm102_vm0, %v17049_v51  ;;  %v7122_v46 = vpop.permute.xlu1 %7121  ;;  %v7587_v49 = vpop.permute.xlu0 %7586 }
 0x5b0   :  { %v7130_v5 = vsel %vm1077_vm5, %v7120_v37, %v7122_v46  ;;  %7277 = vmatprep.mubr.f32.mxu0 %v16280_v0  ;;  %v7131_v45 = vsel %vm1077_vm5, %v7122_v46, %v7124_v6  ;;  %v7600_v8 = vsel %vm1551_vm6, %v7587_v49, %v7589_v50 }
 0x5b1   :  { %7213 = vmatprep.subr.mxu0 %v7130_v5 }
 0x5b2   :  { %7214 = vmatpush1.msra.mxu0 %v7129_v36  ;;  %v17462_v36 = vld [vmem:[%s18458_s1] sm:$0xff] }
 0x5b3   :  { %15798 = vmatmul.mubr.msk.f32.vlgmr.msra.gmra.mrb[8].mxu0 %vm102_vm0, %v17049_v51  ;;  %v7126_v59 = vpop.permute.xlu1 %7125  ;;  %v7595_v43 = vpop.permute.xlu0 %7594 }
 0x5b4   :  { %v7132_v44 = vsel %vm1077_vm5, %v7124_v6, %v7126_v59  ;;  %7348 = vmatprep.mubr.f32.mxu0 %v16280_v0 }
 0x5b5   :  { %7284 = vmatprep.subr.mxu0 %v7132_v44  ;;  %v17468_v44 = vld [vmem:[%s18458_s1 + $0x8] sm:$0xff] }
 0x5b6   :  { %7285 = vmatpush1.msra.mxu0 %v7131_v45 }
 0x5b7   :  { %15799 = vmatmul.mubr.msk.f32.vlgmr.msra.gmra.mrb[10].mxu0 %vm102_vm0, %v17049_v51  ;;  %7365 = vmatprep.subr.mxu0 %v17207_v40  ;;  %v7848_v54 = vpop.permute.xlu1 %7847  ;;  %v7840_v56 = vpop.permute.xlu0 %7839 }
 0x5b8   :  { %7366 = vmatpush1.msra.mxu0 %v17196_v25  ;;  %7429 = vmatprep.mubr.f32.mxu0 %v16280_v0 }
 0x5b9   :  { %7436 = vmatprep.subr.mxu0 %v17221_v53 }
 0x5bb   :  { %15800 = vmatmul.mubr.msk.f32.vlgmr.msra.gmra.mrb[6].mxu0 %vm102_vm0, %v17069_v13  ;;  %v7591_v60 = vpop.permute.xlu1 %7590  ;;  %v7842_v61 = vpop.permute.xlu0 %7841 }
 0x5bc   :  { %7437 = vmatpush1.msra.mxu0 %v17214_v58  ;;  %7500 = vmatprep.mubr.f32.mxu0 %v16280_v0  ;;  %v7601_v62 = vsel %vm1551_vm6, %v7589_v50, %v7591_v60  ;;  %v7851_v12 = vsel %vm2051_vm8, %v7840_v56, %v7842_v61 }
 0x5bd   :  { %7507 = vmatprep.subr.mxu0 %v17200_v52 }
 0x5bf   :  { %15801 = vmatmul.mubr.msk.f32.vlgmr.msra.gmra.mrb[8].mxu0 %vm102_vm0, %v17069_v13  ;;  %v7593_v51 = vpop.permute.xlu1 %7592  ;;  %v7846_v63 = vpop.permute.xlu0 %7845 }
 0x5c0   :  { %7508 = vmatpush1.msra.mxu0 %v17224_v1  ;;  %7571 = vmatprep.mubr.f32.mxu0 %v16280_v0  ;;  %v7603_v10 = vsel %vm1551_vm6, %v7593_v51, %v7595_v43  ;;  %v7602_v16 = vsel %vm1551_vm6, %v7591_v60, %v7593_v51  ;;  %v7854_v33 = vsel %vm2051_vm8, %v7846_v63, %v7848_v54 }
 0x5c1   :  { %7615 = vmatprep.subr.mxu0 %v7601_v62 }
 0x5c3   :  { %15802 = vmatmul.mubr.msk.f32.vlgmr.msra.gmra.mrb[10].mxu0 %vm102_vm0, %v17069_v13  ;;  %v7597_v9 = vpop.permute.xlu1 %7596  ;;  %v8087_v14 = vpop.permute.xlu0 %8086 }
 0x5c4   :  { %7616 = vmatpush1.msra.mxu0 %v7600_v8  ;;  %7679 = vmatprep.mubr.f32.mxu0 %v16280_v0  ;;  %v7605_v19 = vsel %vm1551_vm6, %v7597_v9, %v17359_v55  ;;  %v7604_v13 = vsel %vm1551_vm6, %v7595_v43, %v7597_v9  ;;  %v17480_v8 = vld [vmem:[%s18458_s1 + $0x18] sm:$0xff] }
 0x5c5   :  { %7686 = vmatprep.subr.mxu0 %v7603_v10 }
 0x5c7   :  { %15803 = vmatmul.mubr.msk.f32.vlgmr.msra.gmra.mrb[6].mxu0 %vm102_vm0, %v17090_v23  ;;  %v7838_v18 = vpop.permute.xlu1 %7837  ;;  %v8085_v24 = vpop.permute.xlu0 %8084 }
 0x5c8   :  { %7687 = vmatpush1.msra.mxu0 %v7602_v16  ;;  %7750 = vmatprep.mubr.f32.mxu0 %v16280_v0  ;;  %v7850_v21 = vsel %vm2051_vm8, %v7838_v18, %v7840_v56  ;;  %v8098_v37 = vsel %vm2301_vm9, %v8085_v24, %v8087_v14 }
 0x5c9   :  { %7757 = vmatprep.subr.mxu0 %v7605_v19 }
 0x5cb   :  { %15804 = vmatmul.mubr.msk.f32.vlgmr.msra.gmra.mrb[8].mxu0 %vm102_vm0, %v17090_v23  ;;  %v7836_v20 = vpop.permute.xlu1 %7835  ;;  %v8093_v30 = vpop.permute.xlu0 %8092 }
 0x5cc   :  { %7758 = vmatpush1.msra.mxu0 %v7604_v13  ;;  %7821 = vmatprep.mubr.f32.mxu0 %v16280_v0  ;;  %v7849_v26 = vsel %vm2051_vm8, %v7836_v20, %v7838_v18  ;;  %v17486_v20 = vld [vmem:[%s18458_s1 + $0x20] sm:$0xff] }
 0x5cd   :  { %7864 = vmatprep.subr.mxu0 %v7850_v21 }
 0x5cf   :  { %15805 = vmatmul.mubr.msk.f32.vlgmr.msra.gmra.mrb[10].mxu0 %vm102_vm0, %v17090_v23  ;;  %v7844_v28 = vpop.permute.xlu1 %7843  ;;  %v8097_v4 = vpop.permute.xlu0 %8096 }
 0x5d0   :  { %7865 = vmatpush1.msra.mxu0 %v7849_v26  ;;  %v7852_v29 = vsel %vm2051_vm8, %v7842_v61, %v7844_v28  ;;  %7928 = vmatprep.mubr.f32.mxu0 %v16280_v0  ;;  %v7853_v23 = vsel %vm2051_vm8, %v7844_v28, %v7846_v63  ;;  %v17474_v61 = vld [vmem:[%s18458_s1 + $0x10] sm:$0xff]  ;;  %v17492_v26 = vld [vmem:[%s18458_s1 + $0x28] sm:$0xff] }
 0x5d1   :  { %7935 = vmatprep.subr.mxu0 %v7852_v29 }
 0x5d3   :  { %15806 = vmatmul.mubr.msk.f32.vlgmr.msra.gmra.mrb[6].mxu0 %vm102_vm0, %v17110_v35  ;;  %v8089_v32 = vpop.permute.xlu1 %8088  ;;  %v8338_v3 = vpop.permute.xlu0 %8337 }
 0x5d4   :  { %7936 = vmatpush1.msra.mxu0 %v7851_v12  ;;  %7999 = vmatprep.mubr.f32.mxu0 %v16280_v0  ;;  %v8099_v2 = vsel %vm2301_vm9, %v8087_v14, %v8089_v32 }
 0x5d5   :  { %8006 = vmatprep.subr.mxu0 %v7854_v33 }
 0x5d7   :  { %15807 = vmatmul.mubr.msk.f32.vlgmr.msra.gmra.mrb[8].mxu0 %vm102_vm0, %v17110_v35  ;;  %v8091_v7 = vpop.permute.xlu1 %8090  ;;  %v8340_v41 = vpop.permute.xlu0 %8339 }
 0x5d8   :  { %8007 = vmatpush1.msra.mxu0 %v7853_v23  ;;  %8070 = vmatprep.mubr.f32.mxu0 %v16280_v0  ;;  %v8101_v39 = vsel %vm2301_vm9, %v8091_v7, %v8093_v30  ;;  %v8100_v6 = vsel %vm2301_vm9, %v8089_v32, %v8091_v7  ;;  %v8349_v34 = vsel %vm2551_vm10, %v8338_v3, %v8340_v41 }
 0x5d9   :  { %8113 = vmatprep.subr.mxu0 %v8099_v2 }
 0x5db   :  { %15808 = vmatmul.mubr.msk.f32.vlgmr.msra.gmra.mrb[10].mxu0 %vm102_vm0, %v17110_v35  ;;  %v8095_v38 = vpop.permute.xlu1 %8094  ;;  %v8344_v57 = vpop.permute.xlu0 %8343 }
 0x5dc   :  { %8114 = vmatpush1.msra.mxu0 %v8098_v37  ;;  %8177 = vmatprep.mubr.f32.mxu0 %v16280_v0  ;;  %v8103_v48 = vsel %vm2301_vm9, %v8095_v38, %v8097_v4  ;;  %v8102_v35 = vsel %vm2301_vm9, %v8093_v30, %v8095_v38 }
 0x5dd   :  { %8184 = vmatprep.subr.mxu0 %v8101_v39 }
 0x5df   :  { %15809 = vmatmul.mubr.msk.f32.vlgmr.msra.gmra.mrb[6].mxu0 %vm102_vm0, %v17130_v47  ;;  %v8336_v22 = vpop.permute.xlu1 %8335 }
 0x5e0   :  { %8185 = vmatpush1.msra.mxu0 %v8100_v6  ;;  %8248 = vmatprep.mubr.f32.mxu0 %v16280_v0  ;;  %v8348_v55 = vsel %vm2551_vm10, %v8336_v22, %v8338_v3 }
 0x5e1   :  { %8255 = vmatprep.subr.mxu0 %v8103_v48 }
 0x5e3   :  { %15810 = vmatmul.mubr.msk.f32.vlgmr.msra.gmra.mrb[8].mxu0 %vm102_vm0, %v17130_v47  ;;  %v8334_v27 = vpop.permute.xlu1 %8333 }
 0x5e4   :  { %8256 = vmatpush1.msra.mxu0 %v8102_v35  ;;  %8319 = vmatprep.mubr.f32.mxu0 %v16280_v0  ;;  %v8347_v31 = vsel %vm2551_vm10, %v8334_v27, %v8336_v22 }
 0x5e5   :  { %8362 = vmatprep.subr.mxu0 %v8348_v55 }
 0x5e7   :  { %15811 = vmatmul.mubr.msk.f32.vlgmr.msra.gmra.mrb[10].mxu0 %vm102_vm0, %v17130_v47  ;;  %v8342_v42 = vpop.permute.xlu1 %8341 }
 0x5e8   :  { %8363 = vmatpush1.msra.mxu0 %v8347_v31  ;;  %v8350_v50 = vsel %vm2551_vm10, %v8340_v41, %v8342_v42  ;;  %8426 = vmatprep.mubr.f32.mxu0 %v16280_v0  ;;  %v8351_v47 = vsel %vm2551_vm10, %v8342_v42, %v8344_v57 }
 0x5e9   :  { %8433 = vmatprep.subr.mxu0 %v8350_v50 }
 0x5eb   :  { %15812 = vmatmul.mubr.msk.f32.vlgmr.msra.gmra.mrb[6].mxu0 %vm102_vm0, %v17150_v15  ;;  %v8346_v46 = vpop.permute.xlu1 %8345 }
 0x5ec   :  { %8434 = vmatpush1.msra.mxu0 %v8349_v34  ;;  %v8352_v49 = vsel %vm2551_vm10, %v8344_v57, %v8346_v46  ;;  %8497 = vmatprep.mubr.f32.mxu0 %v16280_v0 }
 0x5ed   :  { %8504 = vmatprep.subr.mxu0 %v8352_v49 }
 0x5ef   :  { %15813 = vmatmul.mubr.msk.f32.vlgmr.msra.gmra.mrb[8].mxu0 %vm102_vm0, %v17150_v15 }
 0x5f0   :  { %8505 = vmatpush1.msra.mxu0 %v8351_v47  ;;  %8568 = vmatprep.mubr.f32.mxu0 %v16280_v0 }
 0x5f3   :  { %15814 = vmatmul.mubr.msk.f32.vlgmr.msra.gmra.mrb[10].mxu0 %vm102_vm0, %v17150_v15 }
 0x5f4   :  { %11072 = vmatprep.mubr.f32.mxu0 %v16280_v0 }
 0x6be   :  { %v8428_v5 = vpop.f32.mrb[6].mxu0 }
 0x6bf   :  { %v8581_v59 = vmul.f32 %v17462_v36, %v8428_v5  ;;  %v8430_v43 = vpop.f32.mrb[7].mxu0 }
 0x6c0   :  { %v8582_v45 = vmul.f32 %v17468_v44, %v8430_v43 }
 0x6c1   :  { %v8595_v54 = vmul.f32 %v8581_v59, %v8581_v59 }
 0x6c2   :  { %v8587_v15 = vadd.f32 %v8582_v45, %v8581_v59  ;;  %v8596_v56 = vmul.f32 %v8582_v45, %v8582_v45  ;;  %v8499_v60 = vpop.f32.mrb[8].mxu0 }
 0x6c3   :  { %v8583_v51 = vmul.f32 %v17474_v61, %v8499_v60  ;;  %v8501_v62 = vpop.f32.mrb[9].mxu0 }
 0x6c4   :  { %v8601_v63 = vadd.f32 %v8596_v56, %v8595_v54  ;;  %v8584_v9 = vmul.f32 %v17480_v8, %v8501_v62 }
 0x6c5   :  { %v8588_v10 = vadd.f32 %v8587_v15, %v8583_v51  ;;  %v8597_v14 = vmul.f32 %v8583_v51, %v8583_v51 }
 0x6c6   :  { %v8598_v16 = vmul.f32 %v8584_v9, %v8584_v9  ;;  %v8570_v18 = vpop.f32.mrb[10].mxu0 }
 0x6c7   :  { %v8602_v19 = vadd.f32 %v8601_v63, %v8597_v14  ;;  %v8589_v13 = vadd.f32 %v8588_v10, %v8584_v9  ;;  %v8585_v21 = vmul.f32 %v17486_v20, %v8570_v18  ;;  %v8572_v24 = vpop.f32.mrb[11].mxu0 }
 0x6c8   :  { %v8586_v28 = vmul.f32 %v17492_v26, %v8572_v24 }
 0x6c9   :  { %v8603_v29 = vadd.f32 %v8602_v19, %v8598_v16  ;;  %v8590_v30 = vadd.f32 %v8589_v13, %v8585_v21  ;;  %v8599_v12 = vmul.f32 %v8585_v21, %v8585_v21 }
 0x6ca   :  { %v8600_v32 = vmul.f32 %v8586_v28, %v8586_v28 }
 0x6cb   :  { %v8591_v33 = vadd.f32 %v8590_v30, %v8586_v28  ;;  %v8604_v23 = vadd.f32 %v8603_v29, %v8599_v12  ;;  %v17640_v30 = vld [vmem:[%s18459_s4 + $0x8] sm:$0xff] }
 0x6cd   :  { %8592 = vadd.xlane.f32.xlu0 %v8591_v33  ;;  %v8605_v7 = vadd.f32 %v8604_v23, %v8600_v32 }
 0x6cf   :  { %8606 = vadd.xlane.f32.xlu1 %v8605_v7 }
 0x75a   :  { %v8593_v2 = vpop.xlane.xlu0 %8592 }
 0x75b   :  { %v8594_v4 = vmul.f32 0.0022222223, %v8593_v2 }
 0x75c   :  { %v8607_v37 = vpop.xlane.xlu1 %8606 }
 0x75d   :  { %v8609_v38 = vmul.f32 %v8594_v4, %v8594_v4  ;;  %v8608_v39 = vmul.f32 0.0022222223, %v8607_v37 }
 0x75f   :  { %v8610_v3 = vsub.f32 %v8608_v39, %v8609_v38 }
 0x761   :  { %v8611_v6 = vadd.f32 1e-05, %v8610_v3 }
 0x763   :  { %16256 = vrsqrt.f32 %v8611_v6 }
 0x76d   :  { %v16257_v22 = vpop.eup %16256 }
 0x76e   :  { %v8613_v48 = vmul.f32 %v16257_v22, %v17173_v11  ;;  %v17660_v22 = vld [vmem:[%s18459_s4] sm:$0xff] }
 0x770   :  { %8618 = vperm.xlu0 %16253, %v8613_v48   ;;  %v8614_v35 = vmul.f32 %v8613_v48, %v8594_v4 }
 0x772   :  { %v8615_v27 = vsub.f32 %v17179_v17, %v8614_v35 }
 0x774   :  { %8629 = vperm.xlu1 %16252, %v8615_v27   ;;  %8679 = vrot.lane.b32.xlu0 %v16280_v0, %s16281_s30 }
 0x778   :  { %8921 = vrot.lane.b32.xlu1 %v16280_v0, %s16282_s22  ;;  %9164 = vrot.lane.b32.xlu0 %v16280_v0, %s16283_s0 }
 0x77c   :  { %9413 = vrot.lane.b32.xlu1 %v16280_v0, %s16285_s24 }
 0x7ef   :  { %v8619_v55 = vpop.permute.xlu0 %8618 }
 0x7f0   :  { %v8621_v41 = vmul.f32 %v8619_v55, %v8581_v59  ;;  %v8622_v11 = vmul.f32 %v8619_v55, %v8582_v45  ;;  %v8623_v31 = vmul.f32 %v8619_v55, %v8583_v51  ;;  %v8624_v42 = vmul.f32 %v8619_v55, %v8584_v9 }
 0x7f1   :  { %v8625_v45 = vmul.f32 %v8619_v55, %v8585_v21  ;;  %v8626_v15 = vmul.f32 %v8619_v55, %v8586_v28 }
 0x7f3   :  { %v8630_v50 = vpop.permute.xlu1 %8629 }
 0x7f4   :  { %v8632_v17 = vmul.f32 %v17462_v36, %v8630_v50  ;;  %v8633_v57 = vmul.f32 %v17468_v44, %v8630_v50  ;;  %v8634_v34 = vmul.f32 %v17474_v61, %v8630_v50  ;;  %v8635_v46 = vmul.f32 %v17480_v8, %v8630_v50 }
 0x7f5   :  { %v8636_v49 = vmul.f32 %v17486_v20, %v8630_v50  ;;  %v8637_v47 = vmul.f32 %v17492_v26, %v8630_v50 }
 0x7f6   :  { %v8638_v5 = vadd.f32 %v8632_v17, %v8621_v41  ;;  %v8639_v43 = vadd.f32 %v8633_v57, %v8622_v11  ;;  %v8640_v54 = vadd.f32 %v8634_v34, %v8623_v31  ;;  %v8641_v59 = vadd.f32 %v8635_v46, %v8624_v42  ;;  %v17680_v46 = vld [vmem:[%s18459_s4 + $0x10] sm:$0xff] }
 0x7f7   :  { %v8642_v51 = vadd.f32 %v8636_v49, %v8625_v45  ;;  %v8643_v62 = vadd.f32 %v8637_v47, %v8626_v15 }
 0x7f8   :  { %v8644_v56 = vmax.f32 %v8638_v5, 0.0  ;;  %v8645_v60 = vmax.f32 %v8639_v43, 0.0  ;;  %v8646_v63 = vmax.f32 %v8640_v54, 0.0  ;;  %v8647_v9 = vmax.f32 %v8641_v59, 0.0 }
 0x7f9   :  { %v8648_v16 = vmax.f32 %v8642_v51, 0.0  ;;  %v8649_v18 = vmax.f32 %v8643_v62, 0.0 }
 0x7fa   :  { %v17512_v10 = vadd.f32 %v8644_v56, %v17196_v25  ;;  %v17515_v14 = vadd.f32 %v8645_v60, %v17207_v40  ;;  %v17522_v19 = vadd.f32 %v8646_v63, %v17214_v58  ;;  %v17525_v13 = vadd.f32 %v8647_v9, %v17221_v53  ;;  %v8922_v58 = vpop.permute.xlu1 %8921  ;;  %v17701_v63 = vld [vmem:[%s18459_s4 + $0x18] sm:$0xff] }
 0x7fb   :  { %v17532_v25 = vadd.f32 %v8648_v16, %v17224_v1  ;;  %v17535_v40 = vadd.f32 %v8649_v18, %v17200_v52  ;;  %v8680_v52 = vpop.permute.xlu0 %8679 }
 0x7fc   :  { %8683 = vrot.lane.b32.xlu1 %v17515_v14, %s16281_s30  ;;  %8681 = vrot.lane.b32.xlu0 %v17512_v10, %s16281_s30 }
 0x7fe   :  { %v17633_v1 = vpop.permute.xlu1 %9413 }
 0x7ff   :  { %v9165_v53 = vpop.permute.xlu0 %9164 }
 0x800   :  { %8685 = vrot.lane.b32.xlu1 %v17522_v19, %s16281_s30  ;;  %8687 = vrot.lane.b32.xlu0 %v17525_v13, %s16281_s30 }
 0x804   :  { %8689 = vrot.lane.b32.xlu1 %v17532_v25, %s16281_s30  ;;  %8691 = vrot.lane.b32.xlu0 %v17535_v40, %s16281_s30 }
 0x808   :  { %8923 = vrot.lane.b32.xlu1 %v17512_v10, %s16282_s22  ;;  %8925 = vrot.lane.b32.xlu0 %v17515_v14, %s16282_s22 }
 0x80c   :  { %8929 = vrot.lane.b32.xlu1 %v17525_v13, %s16282_s22  ;;  %8927 = vrot.lane.b32.xlu0 %v17522_v19, %s16282_s22 }
 0x810   :  { %8933 = vrot.lane.b32.xlu1 %v17535_v40, %s16282_s22  ;;  %8931 = vrot.lane.b32.xlu0 %v17532_v25, %s16282_s22 }
 0x814   :  { %9168 = vrot.lane.b32.xlu1 %v17515_v14, %s16283_s0  ;;  %9166 = vrot.lane.b32.xlu0 %v17512_v10, %s16283_s0 }
 0x818   :  { %9170 = vrot.lane.b32.xlu1 %v17522_v19, %s16283_s0  ;;  %9172 = vrot.lane.b32.xlu0 %v17525_v13, %s16283_s0 }
 0x81c   :  { %9174 = vrot.lane.b32.xlu1 %v17532_v25, %s16283_s0  ;;  %9176 = vrot.lane.b32.xlu0 %v17535_v40, %s16283_s0 }
 0x820   :  { %9415 = vrot.lane.b32.xlu1 %v17512_v10, %s16285_s24  ;;  %9417 = vrot.lane.b32.xlu0 %v17515_v14, %s16285_s24 }
 0x824   :  { %9421 = vrot.lane.b32.xlu1 %v17525_v13, %s16285_s24  ;;  %9419 = vrot.lane.b32.xlu0 %v17522_v19, %s16285_s24 }
 0x828   :  { %9425 = vrot.lane.b32.xlu1 %v17535_v40, %s16285_s24  ;;  %9423 = vrot.lane.b32.xlu0 %v17532_v25, %s16285_s24 }
 0x82c   :  { %10147 = vrot.lane.b32.xlu1 %v16280_v0, %s16288_s29  ;;  %9898 = vrot.lane.b32.xlu0 %v16280_v0, %s16286_s27 }
 0x830   :  { %9890 = vrot.lane.b32.xlu1 %v17522_v19, %s16286_s27  ;;  %9888 = vrot.lane.b32.xlu0 %v17515_v14, %s16286_s27 }
 0x834   :  { %9892 = vrot.lane.b32.xlu1 %v17525_v13, %s16286_s27  ;;  %9886 = vrot.lane.b32.xlu0 %v17512_v10, %s16286_s27 }
 0x838   :  { %9896 = vrot.lane.b32.xlu1 %v17535_v40, %s16286_s27  ;;  %9894 = vrot.lane.b32.xlu0 %v17532_v25, %s16286_s27 }
 0x83c   :  { %10137 = vrot.lane.b32.xlu1 %v17515_v14, %s16288_s29  ;;  %10139 = vrot.lane.b32.xlu0 %v17522_v19, %s16288_s29 }
 0x840   :  { %10135 = vrot.lane.b32.xlu1 %v17512_v10, %s16288_s29  ;;  %10141 = vrot.lane.b32.xlu0 %v17525_v13, %s16288_s29 }
 0x844   :  { %10143 = vrot.lane.b32.xlu1 %v17532_v25, %s16288_s29  ;;  %10145 = vrot.lane.b32.xlu0 %v17535_v40, %s16288_s29 }
 0x848   :  { %10388 = vrot.lane.b32.xlu1 %v17522_v19, %s16289_s10  ;;  %10386 = vrot.lane.b32.xlu0 %v17515_v14, %s16289_s10 }
 0x84c   :  { %10390 = vrot.lane.b32.xlu1 %v17525_v13, %s16289_s10  ;;  %10384 = vrot.lane.b32.xlu0 %v17512_v10, %s16289_s10 }
 0x850   :  { %10394 = vrot.lane.b32.xlu1 %v17535_v40, %s16289_s10  ;;  %10392 = vrot.lane.b32.xlu0 %v17532_v25, %s16289_s10 }
 0x854   :  { %10635 = vrot.lane.b32.xlu1 %v17515_v14, %s16290_s13  ;;  %10396 = vrot.lane.b32.xlu0 %v16280_v0, %s16289_s10 }
 0x858   :  { %10633 = vrot.lane.b32.xlu1 %v17512_v10, %s16290_s13  ;;  %10637 = vrot.lane.b32.xlu0 %v17522_v19, %s16290_s13 }
 0x85c   :  { %10641 = vrot.lane.b32.xlu1 %v17532_v25, %s16290_s13  ;;  %10639 = vrot.lane.b32.xlu0 %v17525_v13, %s16290_s13 }
 0x860   :  { %10645 = vrot.lane.b32.xlu1 %v16280_v0, %s16290_s13  ;;  %10643 = vrot.lane.b32.xlu0 %v17535_v40, %s16290_s13 }
 0x86e   :  { %v8682_v21 = vpop.permute.xlu0 %8681  ;;  %v8684_v24 = vpop.permute.xlu1 %8683 }
 0x86f   :  { %v8694_v28 = vsel %vm89_vm1, %v8682_v21, %v8684_v24  ;;  %v8693_v29 = vsel %vm89_vm1, %v8680_v52, %v8682_v21 }
 0x870   :  { %8708 = vmatprep.subr.mxu1 %v8694_v28 }
 0x871   :  { %8709 = vmatpush1.msra.mxu1 %v8693_v29  ;;  %v17721_v29 = vld [vmem:[%s18459_s4 + $0x20] sm:$0xff] }
 0x872   :  { %v8688_v12 = vpop.permute.xlu0 %8687  ;;  %15815 = vmatmul.mubr.msk.f32.vlgmr.msra.gmra.mrb[8].mxu1 %vm102_vm0, %v17640_v30  ;;  %v8686_v32 = vpop.permute.xlu1 %8685 }
 0x873   :  { %v8696_v33 = vsel %vm89_vm1, %v8686_v32, %v8688_v12  ;;  %v8695_v23 = vsel %vm89_vm1, %v8684_v24, %v8686_v32  ;;  %8843 = vmatprep.mubr.f32.mxu1 %v16280_v0 }
 0x874   :  { %8779 = vmatprep.subr.mxu1 %v8696_v33 }
 0x875   :  { %8780 = vmatpush1.msra.mxu1 %v8695_v23 }
 0x876   :  { %v8692_v7 = vpop.permute.xlu0 %8691  ;;  %15816 = vmatmul.mubr.msk.f32.vlgmr.msra.gmra.mrb[10].mxu1 %vm102_vm0, %v17640_v30  ;;  %v8690_v2 = vpop.permute.xlu1 %8689 }
 0x877   :  { %v8698_v4 = vsel %vm89_vm1, %v8690_v2, %v8692_v7  ;;  %v8697_v37 = vsel %vm89_vm1, %v8688_v12, %v8690_v2  ;;  %8914 = vmatprep.mubr.f32.mxu1 %v16280_v0 }
 0x878   :  { %8850 = vmatprep.subr.mxu1 %v8698_v4 }
 0x879   :  { %8851 = vmatpush1.msra.mxu1 %v8697_v37 }
 0x87a   :  { %v8926_v38 = vpop.permute.xlu0 %8925  ;;  %15817 = vmatmul.mubr.msk.f32.vlgmr.msra.gmra.mrb[12].mxu1 %vm102_vm0, %v17640_v30  ;;  %v8924_v39 = vpop.permute.xlu1 %8923 }
 0x87b   :  { %v8936_v3 = vsel %vm333_vm2, %v8924_v39, %v8926_v38  ;;  %v8935_v6 = vsel %vm333_vm2, %v8922_v58, %v8924_v39  ;;  %9014 = vmatprep.mubr.f32.mxu1 %v16280_v0  ;;  %v17742_v39 = vld [vmem:[%s18459_s4 + $0x28] sm:$0xff] }
 0x87c   :  { %8950 = vmatprep.subr.mxu1 %v8936_v3 }
 0x87d   :  { %8951 = vmatpush1.msra.mxu1 %v8935_v6 }
 0x87e   :  { %v8928_v48 = vpop.permute.xlu0 %8927  ;;  %15818 = vmatmul.mubr.msk.f32.vlgmr.msra.gmra.mrb[8].mxu1 %vm102_vm0, %v17660_v22  ;;  %v8930_v35 = vpop.permute.xlu1 %8929 }
 0x87f   :  { %v8938_v27 = vsel %vm333_vm2, %v8928_v48, %v8930_v35  ;;  %v8937_v55 = vsel %vm333_vm2, %v8926_v38, %v8928_v48  ;;  %9085 = vmatprep.mubr.f32.mxu1 %v16280_v0 }
 0x880   :  { %9021 = vmatprep.subr.mxu1 %v8938_v27 }
 0x881   :  { %9022 = vmatpush1.msra.mxu1 %v8937_v55 }
 0x882   :  { %v8932_v41 = vpop.permute.xlu0 %8931  ;;  %15819 = vmatmul.mubr.msk.f32.vlgmr.msra.gmra.mrb[10].mxu1 %vm102_vm0, %v17660_v22  ;;  %v8934_v11 = vpop.permute.xlu1 %8933 }
 0x883   :  { %v8940_v31 = vsel %vm333_vm2, %v8932_v41, %v8934_v11  ;;  %v8939_v42 = vsel %vm333_vm2, %v8930_v35, %v8932_v41  ;;  %9156 = vmatprep.mubr.f32.mxu1 %v16280_v0 }
 0x884   :  { %9092 = vmatprep.subr.mxu1 %v8940_v31 }
 0x885   :  { %9093 = vmatpush1.msra.mxu1 %v8939_v42 }
 0x886   :  { %v9167_v50 = vpop.permute.xlu0 %9166  ;;  %15820 = vmatmul.mubr.msk.f32.vlgmr.msra.gmra.mrb[12].mxu1 %vm102_vm0, %v17660_v22  ;;  %v9169_v17 = vpop.permute.xlu1 %9168 }
 0x887   :  { %v9179_v57 = vsel %vm577_vm3, %v9167_v50, %v9169_v17  ;;  %v9178_v34 = vsel %vm577_vm3, %v9165_v53, %v9167_v50  ;;  %9257 = vmatprep.mubr.f32.mxu1 %v16280_v0 }
 0x888   :  { %9193 = vmatprep.subr.mxu1 %v9179_v57  ;;  %v17762_v57 = vld [vmem:[%s18459_s4 + $0x30] sm:$0xff] }
 0x889   :  { %9194 = vmatpush1.msra.mxu1 %v9178_v34 }
 0x88a   :  { %v9173_v49 = vpop.permute.xlu0 %9172  ;;  %15821 = vmatmul.mubr.msk.f32.vlgmr.msra.gmra.mrb[8].mxu1 %vm102_vm0, %v17680_v46  ;;  %v9171_v47 = vpop.permute.xlu1 %9170 }
 0x88b   :  { %v9181_v5 = vsel %vm577_vm3, %v9171_v47, %v9173_v49  ;;  %v9180_v43 = vsel %vm577_vm3, %v9169_v17, %v9171_v47  ;;  %9328 = vmatprep.mubr.f32.mxu1 %v16280_v0 }
 0x88c   :  { %9264 = vmatprep.subr.mxu1 %v9181_v5 }
 0x88d   :  { %9265 = vmatpush1.msra.mxu1 %v9180_v43 }
 0x88e   :  { %v9177_v54 = vpop.permute.xlu0 %9176  ;;  %15822 = vmatmul.mubr.msk.f32.vlgmr.msra.gmra.mrb[10].mxu1 %vm102_vm0, %v17680_v46  ;;  %v9175_v59 = vpop.permute.xlu1 %9174 }
 0x88f   :  { %v9183_v45 = vsel %vm577_vm3, %v9175_v59, %v9177_v54  ;;  %v9182_v15 = vsel %vm577_vm3, %v9173_v49, %v9175_v59  ;;  %9399 = vmatprep.mubr.f32.mxu1 %v16280_v0 }
 0x890   :  { %9335 = vmatprep.subr.mxu1 %v9183_v45 }
 0x891   :  { %9336 = vmatpush1.msra.mxu1 %v9182_v15 }
 0x892   :  { %v9418_v56 = vpop.permute.xlu0 %9417  ;;  %15823 = vmatmul.mubr.msk.f32.vlgmr.msra.gmra.mrb[12].mxu1 %vm102_vm0, %v17680_v46  ;;  %v9416_v60 = vpop.permute.xlu1 %9415 }
 0x893   :  { %v9428_v51 = vsel %vm1077_vm5, %v9416_v60, %v9418_v56  ;;  %v9427_v62 = vsel %vm1077_vm5, %v17633_v1, %v9416_v60  ;;  %9506 = vmatprep.mubr.f32.mxu1 %v16280_v0 }
 0x894   :  { %9442 = vmatprep.subr.mxu1 %v9428_v51 }
 0x895   :  { %9443 = vmatpush1.msra.mxu1 %v9427_v62  ;;  %v17782_v62 = vld [vmem:[%s18459_s4 + $0x38] sm:$0xff] }
 0x896   :  { %v9420_v9 = vpop.permute.xlu0 %9419  ;;  %15824 = vmatmul.mubr.msk.f32.vlgmr.msra.gmra.mrb[8].mxu1 %vm102_vm0, %v17701_v63  ;;  %v9422_v16 = vpop.permute.xlu1 %9421 }
 0x897   :  { %v9430_v18 = vsel %vm1077_vm5, %v9420_v9, %v9422_v16  ;;  %v9429_v52 = vsel %vm1077_vm5, %v9418_v56, %v9420_v9  ;;  %9577 = vmatprep.mubr.f32.mxu1 %v16280_v0 }
 0x898   :  { %9513 = vmatprep.subr.mxu1 %v9430_v18 }
 0x899   :  { %9514 = vmatpush1.msra.mxu1 %v9429_v52 }
 0x89a   :  { %v9424_v58 = vpop.permute.xlu0 %9423  ;;  %15825 = vmatmul.mubr.msk.f32.vlgmr.msra.gmra.mrb[10].mxu1 %vm102_vm0, %v17701_v63  ;;  %v9426_v53 = vpop.permute.xlu1 %9425 }
 0x89b   :  { %v9432_v1 = vsel %vm1077_vm5, %v9424_v58, %v9426_v53  ;;  %v9431_v21 = vsel %vm1077_vm5, %v9422_v16, %v9424_v58  ;;  %9648 = vmatprep.mubr.f32.mxu1 %v16280_v0 }
 0x89c   :  { %9584 = vmatprep.subr.mxu1 %v9432_v1 }
 0x89d   :  { %9585 = vmatpush1.msra.mxu1 %v9431_v21 }
 0x89e   :  { %v9899_v24 = vpop.permute.xlu0 %9898  ;;  %15826 = vmatmul.mubr.msk.f32.vlgmr.msra.gmra.mrb[12].mxu1 %vm102_vm0, %v17701_v63  ;;  %9665 = vmatprep.subr.mxu1 %v17515_v14  ;;  %v10148_v28 = vpop.permute.xlu1 %10147 }
 0x89f   :  { %9666 = vmatpush1.msra.mxu1 %v17512_v10  ;;  %9729 = vmatprep.mubr.f32.mxu1 %v16280_v0 }
 0x8a0   :  { %9736 = vmatprep.subr.mxu1 %v17525_v13 }
 0x8a2   :  { %v9889_v12 = vpop.permute.xlu0 %9888  ;;  %15827 = vmatmul.mubr.msk.f32.vlgmr.msra.gmra.mrb[8].mxu1 %vm102_vm0, %v17721_v29  ;;  %v9891_v32 = vpop.permute.xlu1 %9890 }
 0x8a3   :  { %9737 = vmatpush1.msra.mxu1 %v17522_v19  ;;  %9800 = vmatprep.mubr.f32.mxu1 %v16280_v0  ;;  %v9901_v7 = vsel %vm1551_vm6, %v9889_v12, %v9891_v32 }
 0x8a4   :  { %9807 = vmatprep.subr.mxu1 %v17535_v40 }
 0x8a6   :  { %v9887_v33 = vpop.permute.xlu0 %9886  ;;  %15828 = vmatmul.mubr.msk.f32.vlgmr.msra.gmra.mrb[10].mxu1 %vm102_vm0, %v17721_v29  ;;  %v9893_v23 = vpop.permute.xlu1 %9892 }
 0x8a7   :  { %9808 = vmatpush1.msra.mxu1 %v17532_v25  ;;  %9871 = vmatprep.mubr.f32.mxu1 %v16280_v0  ;;  %v9900_v2 = vsel %vm1551_vm6, %v9887_v33, %v9889_v12  ;;  %v9902_v6 = vsel %vm1551_vm6, %v9891_v32, %v9893_v23  ;;  %v17802_v33 = vld [vmem:[%s18459_s4 + $0x40] sm:$0xff] }
 0x8a8   :  { %9915 = vmatprep.subr.mxu1 %v9901_v7 }
 0x8aa   :  { %v9895_v4 = vpop.permute.xlu0 %9894  ;;  %15829 = vmatmul.mubr.msk.f32.vlgmr.msra.gmra.mrb[12].mxu1 %vm102_vm0, %v17721_v29  ;;  %v9897_v37 = vpop.permute.xlu1 %9896 }
 0x8ab   :  { %9916 = vmatpush1.msra.mxu1 %v9900_v2  ;;  %v9903_v38 = vsel %vm1551_vm6, %v9893_v23, %v9895_v4  ;;  %9979 = vmatprep.mubr.f32.mxu1 %v16280_v0  ;;  %v9905_v35 = vsel %vm1551_vm6, %v9897_v37, %v9899_v24  ;;  %v9904_v55 = vsel %vm1551_vm6, %v9895_v4, %v9897_v37 }
 0x8ac   :  { %9986 = vmatprep.subr.mxu1 %v9903_v38 }
 0x8ae   :  { %v10140_v3 = vpop.permute.xlu0 %10139  ;;  %15830 = vmatmul.mubr.msk.f32.vlgmr.msra.gmra.mrb[8].mxu1 %vm102_vm0, %v17742_v39  ;;  %v10138_v48 = vpop.permute.xlu1 %10137 }
 0x8af   :  { %9987 = vmatpush1.msra.mxu1 %v9902_v6  ;;  %10050 = vmatprep.mubr.f32.mxu1 %v16280_v0  ;;  %v10150_v11 = vsel %vm2051_vm8, %v10138_v48, %v10140_v3 }
 0x8b0   :  { %10057 = vmatprep.subr.mxu1 %v9905_v35 }
 0x8b2   :  { %v10142_v27 = vpop.permute.xlu0 %10141  ;;  %15831 = vmatmul.mubr.msk.f32.vlgmr.msra.gmra.mrb[10].mxu1 %vm102_vm0, %v17742_v39  ;;  %v10136_v41 = vpop.permute.xlu1 %10135 }
 0x8b3   :  { %10058 = vmatpush1.msra.mxu1 %v9904_v55  ;;  %10121 = vmatprep.mubr.f32.mxu1 %v16280_v0  ;;  %v10149_v31 = vsel %vm2051_vm8, %v10136_v41, %v10138_v48  ;;  %v10151_v49 = vsel %vm2051_vm8, %v10140_v3, %v10142_v27 }
 0x8b4   :  { %10164 = vmatprep.subr.mxu1 %v10150_v11 }
 0x8b6   :  { %v10146_v42 = vpop.permute.xlu0 %10145  ;;  %15832 = vmatmul.mubr.msk.f32.vlgmr.msra.gmra.mrb[12].mxu1 %vm102_vm0, %v17742_v39  ;;  %v10144_v50 = vpop.permute.xlu1 %10143 }
 0x8b7   :  { %10165 = vmatpush1.msra.mxu1 %v10149_v31  ;;  %v10152_v17 = vsel %vm2051_vm8, %v10142_v27, %v10144_v50  ;;  %10228 = vmatprep.mubr.f32.mxu1 %v16280_v0  ;;  %v10154_v5 = vsel %vm2051_vm8, %v10146_v42, %v10148_v28  ;;  %v10153_v54 = vsel %vm2051_vm8, %v10144_v50, %v10146_v42 }
 0x8b8   :  { %10235 = vmatprep.subr.mxu1 %v10152_v17 }
 0x8ba   :  { %v10387_v34 = vpop.permute.xlu0 %10386  ;;  %15833 = vmatmul.mubr.msk.f32.vlgmr.msra.gmra.mrb[8].mxu1 %vm102_vm0, %v17762_v57  ;;  %v10389_v47 = vpop.permute.xlu1 %10388 }
 0x8bb   :  { %10236 = vmatpush1.msra.mxu1 %v10151_v49  ;;  %10299 = vmatprep.mubr.f32.mxu1 %v16280_v0  ;;  %v10399_v45 = vsel %vm2301_vm9, %v10387_v34, %v10389_v47 }
 0x8bc   :  { %10306 = vmatprep.subr.mxu1 %v10154_v5 }
 0x8be   :  { %v10385_v43 = vpop.permute.xlu0 %10384  ;;  %15834 = vmatmul.mubr.msk.f32.vlgmr.msra.gmra.mrb[10].mxu1 %vm102_vm0, %v17762_v57  ;;  %v10391_v59 = vpop.permute.xlu1 %10390 }
 0x8bf   :  { %10307 = vmatpush1.msra.mxu1 %v10153_v54  ;;  %10370 = vmatprep.mubr.f32.mxu1 %v16280_v0  ;;  %v10398_v15 = vsel %vm2301_vm9, %v10385_v43, %v10387_v34  ;;  %v10400_v16 = vsel %vm2301_vm9, %v10389_v47, %v10391_v59 }
 0x8c0   :  { %10413 = vmatprep.subr.mxu1 %v10399_v45 }
 0x8c2   :  { %v10393_v56 = vpop.permute.xlu0 %10392  ;;  %15835 = vmatmul.mubr.msk.f32.vlgmr.msra.gmra.mrb[12].mxu1 %vm102_vm0, %v17762_v57  ;;  %v10395_v60 = vpop.permute.xlu1 %10394 }
 0x8c3   :  { %10414 = vmatpush1.msra.mxu1 %v10398_v15  ;;  %v10401_v51 = vsel %vm2301_vm9, %v10391_v59, %v10393_v56  ;;  %10477 = vmatprep.mubr.f32.mxu1 %v16280_v0  ;;  %v10402_v53 = vsel %vm2301_vm9, %v10393_v56, %v10395_v60 }
 0x8c4   :  { %10484 = vmatprep.subr.mxu1 %v10401_v51 }
 0x8c6   :  { %v10397_v9 = vpop.permute.xlu0 %10396  ;;  %15836 = vmatmul.mubr.msk.f32.vlgmr.msra.gmra.mrb[8].mxu1 %vm102_vm0, %v17782_v62  ;;  %v10636_v18 = vpop.permute.xlu1 %10635 }
 0x8c7   :  { %10485 = vmatpush1.msra.mxu1 %v10400_v16  ;;  %v10403_v52 = vsel %vm2301_vm9, %v10395_v60, %v10397_v9  ;;  %10548 = vmatprep.mubr.f32.mxu1 %v16280_v0 }
 0x8c8   :  { %10555 = vmatprep.subr.mxu1 %v10403_v52 }
 0x8ca   :  { %v10638_v58 = vpop.permute.xlu0 %10637  ;;  %15837 = vmatmul.mubr.msk.f32.vlgmr.msra.gmra.mrb[10].mxu1 %vm102_vm0, %v17782_v62  ;;  %v10634_v1 = vpop.permute.xlu1 %10633 }
 0x8cb   :  { %10556 = vmatpush1.msra.mxu1 %v10402_v53  ;;  %v10648_v21 = vsel %vm2551_vm10, %v10636_v18, %v10638_v58  ;;  %10619 = vmatprep.mubr.f32.mxu1 %v16280_v0  ;;  %v10647_v24 = vsel %vm2551_vm10, %v10634_v1, %v10636_v18 }
 0x8cc   :  { %10662 = vmatprep.subr.mxu1 %v10648_v21 }
 0x8ce   :  { %v10640_v28 = vpop.permute.xlu0 %10639  ;;  %15838 = vmatmul.mubr.msk.f32.vlgmr.msra.gmra.mrb[12].mxu1 %vm102_vm0, %v17782_v62  ;;  %v10642_v12 = vpop.permute.xlu1 %10641 }
 0x8cf   :  { %10663 = vmatpush1.msra.mxu1 %v10647_v24  ;;  %v10650_v32 = vsel %vm2551_vm10, %v10640_v28, %v10642_v12  ;;  %10726 = vmatprep.mubr.f32.mxu1 %v16280_v0  ;;  %v10649_v7 = vsel %vm2551_vm10, %v10638_v58, %v10640_v28 }
 0x8d0   :  { %10733 = vmatprep.subr.mxu1 %v10650_v32  ;;  %v17825_v32 = vld [vmem:[%s18460_s5] sm:$0xff] }
 0x8d2   :  { %v10644_v23 = vpop.permute.xlu0 %10643  ;;  %15839 = vmatmul.mubr.msk.f32.vlgmr.msra.gmra.mrb[8].mxu1 %vm102_vm0, %v17802_v33  ;;  %v10646_v2 = vpop.permute.xlu1 %10645 }
 0x8d3   :  { %10734 = vmatpush1.msra.mxu1 %v10649_v7  ;;  %v10652_v4 = vsel %vm2551_vm10, %v10644_v23, %v10646_v2  ;;  %10797 = vmatprep.mubr.f32.mxu1 %v16280_v0  ;;  %v10651_v37 = vsel %vm2551_vm10, %v10642_v12, %v10644_v23  ;;  %v17831_v2 = vld [vmem:[%s18461_s6] sm:$0xff] }
 0x8d4   :  { %10804 = vmatprep.subr.mxu1 %v10652_v4 }
 0x8d6   :  { %15840 = vmatmul.mubr.msk.f32.vlgmr.msra.gmra.mrb[10].mxu1 %vm102_vm0, %v17802_v33 }
 0x8d7   :  { %10805 = vmatpush1.msra.mxu1 %v10651_v37  ;;  %10868 = vmatprep.mubr.f32.mxu1 %v16280_v0 }
 0x8da   :  { %15841 = vmatmul.mubr.msk.f32.vlgmr.msra.gmra.mrb[12].mxu1 %vm102_vm0, %v17802_v33 }
 0x8db   :  { %13372 = vmatprep.mubr.f32.mxu1 %v16280_v0 }
 0x9a5   :  { %v10728_v38 = vpop.f32.mrb[8].mxu1 }
 0x9a6   :  { %v10881_v3 = vmul.f32 %v17462_v36, %v10728_v38  ;;  %v10730_v6 = vpop.f32.mrb[9].mxu1 }
 0x9a7   :  { %v10882_v48 = vmul.f32 %v17468_v44, %v10730_v6 }
 0x9a8   :  { %v10895_v35 = vmul.f32 %v10881_v3, %v10881_v3 }
 0x9a9   :  { %v10887_v27 = vadd.f32 %v10882_v48, %v10881_v3  ;;  %v10896_v55 = vmul.f32 %v10882_v48, %v10882_v48  ;;  %v10799_v41 = vpop.f32.mrb[10].mxu1 }
 0x9aa   :  { %v10883_v11 = vmul.f32 %v17474_v61, %v10799_v41  ;;  %v10801_v31 = vpop.f32.mrb[11].mxu1 }
 0x9ab   :  { %v10901_v42 = vadd.f32 %v10896_v55, %v10895_v35  ;;  %v10884_v50 = vmul.f32 %v17480_v8, %v10801_v31 }
 0x9ac   :  { %v10888_v17 = vadd.f32 %v10887_v27, %v10883_v11  ;;  %v10897_v34 = vmul.f32 %v10883_v11, %v10883_v11 }
 0x9ad   :  { %v10898_v49 = vmul.f32 %v10884_v50, %v10884_v50  ;;  %v10870_v47 = vpop.f32.mrb[12].mxu1 }
 0x9ae   :  { %v10902_v5 = vadd.f32 %v10901_v42, %v10897_v34  ;;  %v10889_v43 = vadd.f32 %v10888_v17, %v10884_v50  ;;  %v10885_v54 = vmul.f32 %v17486_v20, %v10870_v47  ;;  %v10872_v59 = vpop.f32.mrb[13].mxu1 }
 0x9af   :  { %v10886_v45 = vmul.f32 %v17492_v26, %v10872_v59 }
 0x9b0   :  { %v10903_v15 = vadd.f32 %v10902_v5, %v10898_v49  ;;  %v10890_v56 = vadd.f32 %v10889_v43, %v10885_v54  ;;  %v10899_v60 = vmul.f32 %v10885_v54, %v10885_v54 }
 0x9b1   :  { %v10900_v51 = vmul.f32 %v10886_v45, %v10886_v45 }
 0x9b2   :  { %v10891_v9 = vadd.f32 %v10890_v56, %v10886_v45  ;;  %v10904_v16 = vadd.f32 %v10903_v15, %v10899_v60 }
 0x9b4   :  { %10892 = vadd.xlane.f32.xlu0 %v10891_v9  ;;  %v10905_v18 = vadd.f32 %v10904_v16, %v10900_v51 }
 0x9b6   :  { %10906 = vadd.xlane.f32.xlu1 %v10905_v18 }
 0xa41   :  { %v10893_v52 = vpop.xlane.xlu0 %10892 }
 0xa42   :  { %v10894_v58 = vmul.f32 0.0022222223, %v10893_v52 }
 0xa43   :  { %v10907_v53 = vpop.xlane.xlu1 %10906 }
 0xa44   :  { %v10909_v1 = vmul.f32 %v10894_v58, %v10894_v58  ;;  %v10908_v21 = vmul.f32 0.0022222223, %v10907_v53 }
 0xa46   :  { %v10910_v24 = vsub.f32 %v10908_v21, %v10909_v1 }
 0xa48   :  { %v10911_v28 = vadd.f32 1e-05, %v10910_v24 }
 0xa4a   :  { %16258 = vrsqrt.f32 %v10911_v28 }
 0xa54   :  { %v16259_v12 = vpop.eup %16258 }
 0xa55   :  { %v10913_v23 = vmul.f32 %v17825_v32, %v16259_v12 }
 0xa57   :  { %10918 = vperm.xlu0 %16253, %v10913_v23   ;;  %v10914_v7 = vmul.f32 %v10913_v23, %v10894_v58 }
 0xa59   :  { %v10915_v4 = vsub.f32 %v17831_v2, %v10914_v7 }
 0xa5b   :  { %10929 = vperm.xlu1 %16252, %v10915_v4   ;;  %10979 = vrot.lane.b32.xlu0 %v16280_v0, %s16281_s30 }
 0xa5f   :  { %11221 = vrot.lane.b32.xlu1 %v16280_v0, %s16282_s22  ;;  %11464 = vrot.lane.b32.xlu0 %v16280_v0, %s16283_s0 }
 0xa63   :  { %11713 = vrot.lane.b32.xlu1 %v16280_v0, %s16285_s24 }
 0xad6   :  { %v10919_v37 = vpop.permute.xlu0 %10918 }
 0xad7   :  { %v10921_v38 = vmul.f32 %v10919_v37, %v10881_v3  ;;  %v10922_v6 = vmul.f32 %v10919_v37, %v10882_v48  ;;  %v10923_v35 = vmul.f32 %v10919_v37, %v10883_v11  ;;  %v10924_v27 = vmul.f32 %v10919_v37, %v10884_v50 }
 0xad8   :  { %v10925_v48 = vmul.f32 %v10919_v37, %v10885_v54  ;;  %v10926_v11 = vmul.f32 %v10919_v37, %v10886_v45 }
 0xada   :  { %v10930_v55 = vpop.permute.xlu1 %10929 }
 0xadb   :  { %v10932_v41 = vmul.f32 %v17462_v36, %v10930_v55  ;;  %v10933_v31 = vmul.f32 %v17468_v44, %v10930_v55  ;;  %v10934_v42 = vmul.f32 %v17474_v61, %v10930_v55  ;;  %v10935_v17 = vmul.f32 %v17480_v8, %v10930_v55 }
 0xadc   :  { %v10936_v34 = vmul.f32 %v17486_v20, %v10930_v55  ;;  %v10937_v49 = vmul.f32 %v17492_v26, %v10930_v55 }
 0xadd   :  { %v10938_v47 = vadd.f32 %v10932_v41, %v10921_v38  ;;  %v10939_v5 = vadd.f32 %v10933_v31, %v10922_v6  ;;  %v10940_v43 = vadd.f32 %v10934_v42, %v10923_v35  ;;  %v10941_v3 = vadd.f32 %v10935_v17, %v10924_v27 }
 0xade   :  { %v10942_v15 = vadd.f32 %v10936_v34, %v10925_v48  ;;  %v10943_v36 = vadd.f32 %v10937_v49, %v10926_v11 }
 0xadf   :  { %v10944_v50 = vmax.f32 %v10938_v47, 0.0  ;;  %v10945_v59 = vmax.f32 %v10939_v5, 0.0  ;;  %v10946_v56 = vmax.f32 %v10940_v43, 0.0  ;;  %v10947_v44 = vmax.f32 %v10941_v3, 0.0 }
 0xae0   :  { %v10948_v20 = vmax.f32 %v10942_v15, 0.0  ;;  %v10949_v26 = vmax.f32 %v10943_v36, 0.0 }
 0xae1   :  { %v17849_v61 = vadd.f32 %v10944_v50, %v17512_v10  ;;  %v17852_v8 = vadd.f32 %v10945_v59, %v17515_v14  ;;  %v17859_v54 = vadd.f32 %v10946_v56, %v17522_v19  ;;  %v17862_v45 = vadd.f32 %v10947_v44, %v17525_v13  ;;  %v10980_v19 = vpop.permute.xlu0 %10979  ;;  %v11222_v13 = vpop.permute.xlu1 %11221 }
 0xae2   :  { %v17869_v10 = vadd.f32 %v10948_v20, %v17532_v25  ;;  %v17872_v14 = vadd.f32 %v10949_v26, %v17535_v40 }
 0xae3   :  { %10983 = vrot.lane.b32.xlu1 %v17852_v8, %s16281_s30  ;;  %10981 = vrot.lane.b32.xlu0 %v17849_v61, %s16281_s30 }
 0xae5   :  { %v11465_v25 = vpop.permute.xlu0 %11464  ;;  %v17970_v40 = vpop.permute.xlu1 %11713 }
 0xae7   :  { %10985 = vrot.lane.b32.xlu1 %v17859_v54, %s16281_s30  ;;  %10987 = vrot.lane.b32.xlu0 %v17862_v45, %s16281_s30 }
 0xaeb   :  { %10989 = vrot.lane.b32.xlu1 %v17869_v10, %s16281_s30  ;;  %10991 = vrot.lane.b32.xlu0 %v17872_v14, %s16281_s30 }
 0xaef   :  { %11223 = vrot.lane.b32.xlu1 %v17849_v61, %s16282_s22  ;;  %11225 = vrot.lane.b32.xlu0 %v17852_v8, %s16282_s22 }
 0xaf3   :  { %11229 = vrot.lane.b32.xlu1 %v17862_v45, %s16282_s22  ;;  %11227 = vrot.lane.b32.xlu0 %v17859_v54, %s16282_s22 }
 0xaf7   :  { %11233 = vrot.lane.b32.xlu1 %v17872_v14, %s16282_s22  ;;  %11231 = vrot.lane.b32.xlu0 %v17869_v10, %s16282_s22 }
 0xafb   :  { %11468 = vrot.lane.b32.xlu1 %v17852_v8, %s16283_s0  ;;  %11466 = vrot.lane.b32.xlu0 %v17849_v61, %s16283_s0 }
 0xaff   :  { %11470 = vrot.lane.b32.xlu1 %v17859_v54, %s16283_s0  ;;  %11472 = vrot.lane.b32.xlu0 %v17862_v45, %s16283_s0 }
 0xb03   :  { %11474 = vrot.lane.b32.xlu1 %v17869_v10, %s16283_s0  ;;  %11476 = vrot.lane.b32.xlu0 %v17872_v14, %s16283_s0 }
 0xb07   :  { %11715 = vrot.lane.b32.xlu1 %v17849_v61, %s16285_s24  ;;  %11717 = vrot.lane.b32.xlu0 %v17852_v8, %s16285_s24 }
 0xb0b   :  { %11721 = vrot.lane.b32.xlu1 %v17862_v45, %s16285_s24  ;;  %11719 = vrot.lane.b32.xlu0 %v17859_v54, %s16285_s24 }
 0xb0f   :  { %11725 = vrot.lane.b32.xlu1 %v17872_v14, %s16285_s24  ;;  %11723 = vrot.lane.b32.xlu0 %v17869_v10, %s16285_s24 }
 0xb13   :  { %12447 = vrot.lane.b32.xlu1 %v16280_v0, %s16288_s29  ;;  %12198 = vrot.lane.b32.xlu0 %v16280_v0, %s16286_s27 }
 0xb17   :  { %12190 = vrot.lane.b32.xlu1 %v17859_v54, %s16286_s27  ;;  %12188 = vrot.lane.b32.xlu0 %v17852_v8, %s16286_s27 }
 0xb1b   :  { %12192 = vrot.lane.b32.xlu1 %v17862_v45, %s16286_s27  ;;  %12186 = vrot.lane.b32.xlu0 %v17849_v61, %s16286_s27 }
 0xb1f   :  { %12196 = vrot.lane.b32.xlu1 %v17872_v14, %s16286_s27  ;;  %12194 = vrot.lane.b32.xlu0 %v17869_v10, %s16286_s27 }
 0xb23   :  { %12437 = vrot.lane.b32.xlu1 %v17852_v8, %s16288_s29  ;;  %12439 = vrot.lane.b32.xlu0 %v17859_v54, %s16288_s29 }
 0xb27   :  { %12435 = vrot.lane.b32.xlu1 %v17849_v61, %s16288_s29  ;;  %12441 = vrot.lane.b32.xlu0 %v17862_v45, %s16288_s29 }
 0xb2b   :  { %12443 = vrot.lane.b32.xlu1 %v17869_v10, %s16288_s29  ;;  %12445 = vrot.lane.b32.xlu0 %v17872_v14, %s16288_s29 }
 0xb2f   :  { %12688 = vrot.lane.b32.xlu1 %v17859_v54, %s16289_s10  ;;  %12686 = vrot.lane.b32.xlu0 %v17852_v8, %s16289_s10 }
 0xb33   :  { %12690 = vrot.lane.b32.xlu1 %v17862_v45, %s16289_s10  ;;  %12684 = vrot.lane.b32.xlu0 %v17849_v61, %s16289_s10 }
 0xb37   :  { %12694 = vrot.lane.b32.xlu1 %v17872_v14, %s16289_s10  ;;  %12692 = vrot.lane.b32.xlu0 %v17869_v10, %s16289_s10 }
 0xb3b   :  { %12935 = vrot.lane.b32.xlu1 %v17852_v8, %s16290_s13  ;;  %12696 = vrot.lane.b32.xlu0 %v16280_v0, %s16289_s10 }
 0xb3f   :  { %12933 = vrot.lane.b32.xlu1 %v17849_v61, %s16290_s13  ;;  %12937 = vrot.lane.b32.xlu0 %v17859_v54, %s16290_s13 }
 0xb43   :  { %12941 = vrot.lane.b32.xlu1 %v17869_v10, %s16290_s13  ;;  %12939 = vrot.lane.b32.xlu0 %v17862_v45, %s16290_s13 }
 0xb47   :  { %12945 = vrot.lane.b32.xlu1 %v16280_v0, %s16290_s13  ;;  %12943 = vrot.lane.b32.xlu0 %v17872_v14, %s16290_s13 }
 0xb55   :  { %v10982_v60 = vpop.permute.xlu0 %10981  ;;  %v10984_v51 = vpop.permute.xlu1 %10983 }
 0xb56   :  { %v10994_v9 = vsel %vm89_vm1, %v10982_v60, %v10984_v51  ;;  %v10993_v16 = vsel %vm89_vm1, %v10980_v19, %v10982_v60 }
 0xb57   :  { %11008 = vmatprep.subr.mxu0 %v10994_v9 }
 0xb58   :  { %11009 = vmatpush1.msra.mxu0 %v10993_v16 }
 0xb59   :  { %v10988_v18 = vpop.permute.xlu0 %10987  ;;  %15842 = vmatmul.mubr.msk.f32.vlgmr.msra.gmra.mrb[12].mxu0 %vm102_vm0, %v17640_v30  ;;  %v10986_v52 = vpop.permute.xlu1 %10985 }
 0xb5a   :  { %v10996_v58 = vsel %vm89_vm1, %v10986_v52, %v10988_v18  ;;  %v10995_v53 = vsel %vm89_vm1, %v10984_v51, %v10986_v52  ;;  %11143 = vmatprep.mubr.f32.mxu0 %v16280_v0 }
 0xb5b   :  { %11079 = vmatprep.subr.mxu0 %v10996_v58 }
 0xb5c   :  { %11080 = vmatpush1.msra.mxu0 %v10995_v53 }
 0xb5d   :  { %v10992_v1 = vpop.permute.xlu0 %10991  ;;  %15843 = vmatmul.mubr.msk.f32.vlgmr.msra.gmra.mrb[14].mxu0 %vm102_vm0, %v17640_v30  ;;  %v10990_v21 = vpop.permute.xlu1 %10989 }
 0xb5e   :  { %v10998_v24 = vsel %vm89_vm1, %v10990_v21, %v10992_v1  ;;  %v10997_v28 = vsel %vm89_vm1, %v10988_v18, %v10990_v21  ;;  %11214 = vmatprep.mubr.f32.mxu0 %v16280_v0 }
 0xb5f   :  { %11150 = vmatprep.subr.mxu0 %v10998_v24 }
 0xb60   :  { %11151 = vmatpush1.msra.mxu0 %v10997_v28 }
 0xb61   :  { %v11226_v12 = vpop.permute.xlu0 %11225  ;;  %15844 = vmatmul.mubr.msk.f32.vlgmr.msra.gmra.mrb[16].mxu0 %vm102_vm0, %v17640_v30  ;;  %v11224_v23 = vpop.permute.xlu1 %11223 }
 0xb62   :  { %v11236_v7 = vsel %vm333_vm2, %v11224_v23, %v11226_v12  ;;  %v11235_v4 = vsel %vm333_vm2, %v11222_v13, %v11224_v23  ;;  %11314 = vmatprep.mubr.f32.mxu0 %v16280_v0 }
 0xb63   :  { %11250 = vmatprep.subr.mxu0 %v11236_v7 }
 0xb64   :  { %11251 = vmatpush1.msra.mxu0 %v11235_v4 }
 0xb65   :  { %v11228_v37 = vpop.permute.xlu0 %11227  ;;  %15845 = vmatmul.mubr.msk.f32.vlgmr.msra.gmra.mrb[12].mxu0 %vm102_vm0, %v17660_v22  ;;  %v11230_v38 = vpop.permute.xlu1 %11229 }
 0xb66   :  { %v11238_v6 = vsel %vm333_vm2, %v11228_v37, %v11230_v38  ;;  %v11237_v35 = vsel %vm333_vm2, %v11226_v12, %v11228_v37  ;;  %11385 = vmatprep.mubr.f32.mxu0 %v16280_v0 }
 0xb67   :  { %11321 = vmatprep.subr.mxu0 %v11238_v6 }
 0xb68   :  { %11322 = vmatpush1.msra.mxu0 %v11237_v35 }
 0xb69   :  { %v11232_v30 = vpop.permute.xlu0 %11231  ;;  %15846 = vmatmul.mubr.msk.f32.vlgmr.msra.gmra.mrb[14].mxu0 %vm102_vm0, %v17660_v22  ;;  %v11234_v27 = vpop.permute.xlu1 %11233 }
 0xb6a   :  { %v11240_v55 = vsel %vm333_vm2, %v11232_v30, %v11234_v27  ;;  %v11239_v41 = vsel %vm333_vm2, %v11230_v38, %v11232_v30  ;;  %11456 = vmatprep.mubr.f32.mxu0 %v16280_v0 }
 0xb6b   :  { %11392 = vmatprep.subr.mxu0 %v11240_v55 }
 0xb6c   :  { %11393 = vmatpush1.msra.mxu0 %v11239_v41 }
 0xb6d   :  { %v11467_v31 = vpop.permute.xlu0 %11466  ;;  %15847 = vmatmul.mubr.msk.f32.vlgmr.msra.gmra.mrb[16].mxu0 %vm102_vm0, %v17660_v22  ;;  %v11469_v42 = vpop.permute.xlu1 %11468 }
 0xb6e   :  { %v11479_v17 = vsel %vm577_vm3, %v11467_v31, %v11469_v42  ;;  %v11478_v34 = vsel %vm577_vm3, %v11465_v25, %v11467_v31  ;;  %11557 = vmatprep.mubr.f32.mxu0 %v16280_v0 }
 0xb6f   :  { %11493 = vmatprep.subr.mxu0 %v11479_v17 }
 0xb70   :  { %11494 = vmatpush1.msra.mxu0 %v11478_v34 }
 0xb71   :  { %v11473_v49 = vpop.permute.xlu0 %11472  ;;  %15848 = vmatmul.mubr.msk.f32.vlgmr.msra.gmra.mrb[12].mxu0 %vm102_vm0, %v17680_v46  ;;  %v11471_v47 = vpop.permute.xlu1 %11470 }
 0xb72   :  { %v11481_v5 = vsel %vm577_vm3, %v11471_v47, %v11473_v49  ;;  %v11480_v43 = vsel %vm577_vm3, %v11469_v42, %v11471_v47  ;;  %11628 = vmatprep.mubr.f32.mxu0 %v16280_v0 }
 0xb73   :  { %11564 = vmatprep.subr.mxu0 %v11481_v5 }
 0xb74   :  { %11565 = vmatpush1.msra.mxu0 %v11480_v43 }
 0xb75   :  { %v11477_v22 = vpop.permute.xlu0 %11476  ;;  %15849 = vmatmul.mubr.msk.f32.vlgmr.msra.gmra.mrb[14].mxu0 %vm102_vm0, %v17680_v46  ;;  %v11475_v3 = vpop.permute.xlu1 %11474 }
 0xb76   :  { %v11483_v48 = vsel %vm577_vm3, %v11475_v3, %v11477_v22  ;;  %v11482_v11 = vsel %vm577_vm3, %v11473_v49, %v11475_v3  ;;  %11699 = vmatprep.mubr.f32.mxu0 %v16280_v0 }
 0xb77   :  { %11635 = vmatprep.subr.mxu0 %v11483_v48 }
 0xb78   :  { %11636 = vmatpush1.msra.mxu0 %v11482_v11 }
 0xb79   :  { %v11718_v50 = vpop.permute.xlu0 %11717  ;;  %15850 = vmatmul.mubr.msk.f32.vlgmr.msra.gmra.mrb[16].mxu0 %vm102_vm0, %v17680_v46  ;;  %v11716_v59 = vpop.permute.xlu1 %11715 }
 0xb7a   :  { %v11728_v15 = vsel %vm1077_vm5, %v11716_v59, %v11718_v50  ;;  %v11727_v36 = vsel %vm1077_vm5, %v17970_v40, %v11716_v59  ;;  %11806 = vmatprep.mubr.f32.mxu0 %v16280_v0 }
 0xb7b   :  { %11742 = vmatprep.subr.mxu0 %v11728_v15 }
 0xb7c   :  { %11743 = vmatpush1.msra.mxu0 %v11727_v36 }
 0xb7d   :  { %v11720_v56 = vpop.permute.xlu0 %11719  ;;  %15851 = vmatmul.mubr.msk.f32.vlgmr.msra.gmra.mrb[12].mxu0 %vm102_vm0, %v17701_v63  ;;  %v11722_v44 = vpop.permute.xlu1 %11721 }
 0xb7e   :  { %v11730_v20 = vsel %vm1077_vm5, %v11720_v56, %v11722_v44  ;;  %v11729_v26 = vsel %vm1077_vm5, %v11718_v50, %v11720_v56  ;;  %11877 = vmatprep.mubr.f32.mxu0 %v16280_v0 }
 0xb7f   :  { %11813 = vmatprep.subr.mxu0 %v11730_v20 }
 0xb80   :  { %11814 = vmatpush1.msra.mxu0 %v11729_v26 }
 0xb81   :  { %v11724_v46 = vpop.permute.xlu0 %11723  ;;  %15852 = vmatmul.mubr.msk.f32.vlgmr.msra.gmra.mrb[14].mxu0 %vm102_vm0, %v17701_v63  ;;  %v11726_v19 = vpop.permute.xlu1 %11725 }
 0xb82   :  { %v11731_v13 = vsel %vm1077_vm5, %v11722_v44, %v11724_v46  ;;  %v11732_v25 = vsel %vm1077_vm5, %v11724_v46, %v11726_v19  ;;  %11948 = vmatprep.mubr.f32.mxu0 %v16280_v0 }
 0xb83   :  { %11884 = vmatprep.subr.mxu0 %v11732_v25  ;;  %v18111_v25 = vld [vmem:[%s18458_s1] sm:$0xff] }
 0xb84   :  { %11885 = vmatpush1.msra.mxu0 %v11731_v13 }
 0xb85   :  { %v12199_v40 = vpop.permute.xlu0 %12198  ;;  %15853 = vmatmul.mubr.msk.f32.vlgmr.msra.gmra.mrb[16].mxu0 %vm102_vm0, %v17701_v63  ;;  %11965 = vmatprep.subr.mxu0 %v17852_v8  ;;  %v12448_v60 = vpop.permute.xlu1 %12447 }
 0xb86   :  { %11966 = vmatpush1.msra.mxu0 %v17849_v61  ;;  %12029 = vmatprep.mubr.f32.mxu0 %v16280_v0 }
 0xb87   :  { %12036 = vmatprep.subr.mxu0 %v17862_v45 }
 0xb89   :  { %v12189_v51 = vpop.permute.xlu0 %12188  ;;  %15854 = vmatmul.mubr.msk.f32.vlgmr.msra.gmra.mrb[12].mxu0 %vm102_vm0, %v17721_v29  ;;  %v12191_v9 = vpop.permute.xlu1 %12190 }
 0xb8a   :  { %12037 = vmatpush1.msra.mxu0 %v17859_v54  ;;  %12100 = vmatprep.mubr.f32.mxu0 %v16280_v0  ;;  %v12201_v18 = vsel %vm1551_vm6, %v12189_v51, %v12191_v9 }
 0xb8b   :  { %12107 = vmatprep.subr.mxu0 %v17872_v14 }
 0xb8d   :  { %v12187_v63 = vpop.permute.xlu0 %12186  ;;  %15855 = vmatmul.mubr.msk.f32.vlgmr.msra.gmra.mrb[14].mxu0 %vm102_vm0, %v17721_v29  ;;  %v12193_v16 = vpop.permute.xlu1 %12192 }
 0xb8e   :  { %12108 = vmatpush1.msra.mxu0 %v17869_v10  ;;  %12171 = vmatprep.mubr.f32.mxu0 %v16280_v0  ;;  %v12200_v52 = vsel %vm1551_vm6, %v12187_v63, %v12189_v51  ;;  %v12202_v21 = vsel %vm1551_vm6, %v12191_v9, %v12193_v16  ;;  %v18117_v51 = vld [vmem:[%s18458_s1 + $0x8] sm:$0xff] }
 0xb8f   :  { %12215 = vmatprep.subr.mxu0 %v12201_v18 }
 0xb91   :  { %v12195_v58 = vpop.permute.xlu0 %12194  ;;  %15856 = vmatmul.mubr.msk.f32.vlgmr.msra.gmra.mrb[16].mxu0 %vm102_vm0, %v17721_v29  ;;  %v12197_v53 = vpop.permute.xlu1 %12196 }
 0xb92   :  { %12216 = vmatpush1.msra.mxu0 %v12200_v52  ;;  %v12203_v1 = vsel %vm1551_vm6, %v12193_v16, %v12195_v58  ;;  %12279 = vmatprep.mubr.f32.mxu0 %v16280_v0  ;;  %v12205_v12 = vsel %vm1551_vm6, %v12197_v53, %v12199_v40  ;;  %v12204_v29 = vsel %vm1551_vm6, %v12195_v58, %v12197_v53  ;;  %v18123_v52 = vld [vmem:[%s18458_s1 + $0x10] sm:$0xff] }
 0xb93   :  { %12286 = vmatprep.subr.mxu0 %v12203_v1 }
 0xb95   :  { %v12440_v24 = vpop.permute.xlu0 %12439  ;;  %15857 = vmatmul.mubr.msk.f32.vlgmr.msra.gmra.mrb[12].mxu0 %vm102_vm0, %v17742_v39  ;;  %v12438_v28 = vpop.permute.xlu1 %12437 }
 0xb96   :  { %12287 = vmatpush1.msra.mxu0 %v12202_v21  ;;  %12350 = vmatprep.mubr.f32.mxu0 %v16280_v0  ;;  %v12450_v4 = vsel %vm2051_vm8, %v12438_v28, %v12440_v24  ;;  %v18129_v21 = vld [vmem:[%s18458_s1 + $0x18] sm:$0xff] }
 0xb97   :  { %12357 = vmatprep.subr.mxu0 %v12205_v12 }
 0xb99   :  { %v12442_v23 = vpop.permute.xlu0 %12441  ;;  %15858 = vmatmul.mubr.msk.f32.vlgmr.msra.gmra.mrb[14].mxu0 %vm102_vm0, %v17742_v39  ;;  %v12436_v7 = vpop.permute.xlu1 %12435 }
 0xb9a   :  { %12358 = vmatpush1.msra.mxu0 %v12204_v29  ;;  %12421 = vmatprep.mubr.f32.mxu0 %v16280_v0  ;;  %v12449_v37 = vsel %vm2051_vm8, %v12436_v7, %v12438_v28  ;;  %v12451_v30 = vsel %vm2051_vm8, %v12440_v24, %v12442_v23 }
 0xb9b   :  { %12464 = vmatprep.subr.mxu0 %v12450_v4 }
 0xb9d   :  { %v12446_v38 = vpop.permute.xlu0 %12445  ;;  %15859 = vmatmul.mubr.msk.f32.vlgmr.msra.gmra.mrb[16].mxu0 %vm102_vm0, %v17742_v39  ;;  %v12444_v6 = vpop.permute.xlu1 %12443 }
 0xb9e   :  { %12465 = vmatpush1.msra.mxu0 %v12449_v37  ;;  %v12452_v35 = vsel %vm2051_vm8, %v12442_v23, %v12444_v6  ;;  %12528 = vmatprep.mubr.f32.mxu0 %v16280_v0  ;;  %v12454_v41 = vsel %vm2051_vm8, %v12446_v38, %v12448_v60  ;;  %v12453_v39 = vsel %vm2051_vm8, %v12444_v6, %v12446_v38  ;;  %v18135_v37 = vld [vmem:[%s18458_s1 + $0x20] sm:$0xff] }
 0xb9f   :  { %12535 = vmatprep.subr.mxu0 %v12452_v35  ;;  %v18141_v35 = vld [vmem:[%s18458_s1 + $0x28] sm:$0xff] }
 0xba1   :  { %v12687_v27 = vpop.permute.xlu0 %12686  ;;  %15860 = vmatmul.mubr.msk.f32.vlgmr.msra.gmra.mrb[12].mxu0 %vm102_vm0, %v17762_v57  ;;  %v12689_v55 = vpop.permute.xlu1 %12688 }
 0xba2   :  { %12536 = vmatpush1.msra.mxu0 %v12451_v30  ;;  %12599 = vmatprep.mubr.f32.mxu0 %v16280_v0  ;;  %v12699_v17 = vsel %vm2301_vm9, %v12687_v27, %v12689_v55 }
 0xba3   :  { %12606 = vmatprep.subr.mxu0 %v12454_v41 }
 0xba5   :  { %v12685_v31 = vpop.permute.xlu0 %12684  ;;  %15861 = vmatmul.mubr.msk.f32.vlgmr.msra.gmra.mrb[14].mxu0 %vm102_vm0, %v17762_v57  ;;  %v12691_v42 = vpop.permute.xlu1 %12690 }
 0xba6   :  { %12607 = vmatpush1.msra.mxu0 %v12453_v39  ;;  %12670 = vmatprep.mubr.f32.mxu0 %v16280_v0  ;;  %v12698_v34 = vsel %vm2301_vm9, %v12685_v31, %v12687_v27  ;;  %v12700_v43 = vsel %vm2301_vm9, %v12689_v55, %v12691_v42 }
 0xba7   :  { %12713 = vmatprep.subr.mxu0 %v12699_v17 }
 0xba9   :  { %v12693_v49 = vpop.permute.xlu0 %12692  ;;  %15862 = vmatmul.mubr.msk.f32.vlgmr.msra.gmra.mrb[16].mxu0 %vm102_vm0, %v17762_v57  ;;  %v12695_v47 = vpop.permute.xlu1 %12694 }
 0xbaa   :  { %12714 = vmatpush1.msra.mxu0 %v12698_v34  ;;  %v12701_v5 = vsel %vm2301_vm9, %v12691_v42, %v12693_v49  ;;  %12777 = vmatprep.mubr.f32.mxu0 %v16280_v0  ;;  %v12702_v57 = vsel %vm2301_vm9, %v12693_v49, %v12695_v47 }
 0xbab   :  { %12784 = vmatprep.subr.mxu0 %v12701_v5 }
 0xbad   :  { %v12697_v22 = vpop.permute.xlu0 %12696  ;;  %15863 = vmatmul.mubr.msk.f32.vlgmr.msra.gmra.mrb[12].mxu0 %vm102_vm0, %v17782_v62  ;;  %v12936_v3 = vpop.permute.xlu1 %12935 }
 0xbae   :  { %12785 = vmatpush1.msra.mxu0 %v12700_v43  ;;  %v12703_v48 = vsel %vm2301_vm9, %v12695_v47, %v12697_v22  ;;  %12848 = vmatprep.mubr.f32.mxu0 %v16280_v0 }
 0xbaf   :  { %12855 = vmatprep.subr.mxu0 %v12703_v48 }
 0xbb1   :  { %v12938_v11 = vpop.permute.xlu0 %12937  ;;  %15864 = vmatmul.mubr.msk.f32.vlgmr.msra.gmra.mrb[14].mxu0 %vm102_vm0, %v17782_v62  ;;  %v12934_v50 = vpop.permute.xlu1 %12933 }
 0xbb2   :  { %12856 = vmatpush1.msra.mxu0 %v12702_v57  ;;  %v12948_v59 = vsel %vm2551_vm10, %v12936_v3, %v12938_v11  ;;  %12919 = vmatprep.mubr.f32.mxu0 %v16280_v0  ;;  %v12947_v15 = vsel %vm2551_vm10, %v12934_v50, %v12936_v3 }
 0xbb3   :  { %12962 = vmatprep.subr.mxu0 %v12948_v59 }
 0xbb5   :  { %v12940_v36 = vpop.permute.xlu0 %12939  ;;  %15865 = vmatmul.mubr.msk.f32.vlgmr.msra.gmra.mrb[16].mxu0 %vm102_vm0, %v17782_v62  ;;  %v12942_v56 = vpop.permute.xlu1 %12941 }
 0xbb6   :  { %12963 = vmatpush1.msra.mxu0 %v12947_v15  ;;  %v12950_v44 = vsel %vm2551_vm10, %v12940_v36, %v12942_v56  ;;  %13026 = vmatprep.mubr.f32.mxu0 %v16280_v0  ;;  %v12949_v20 = vsel %vm2551_vm10, %v12938_v11, %v12940_v36 }
 0xbb7   :  { %13033 = vmatprep.subr.mxu0 %v12950_v44 }
 0xbb9   :  { %v12944_v26 = vpop.permute.xlu0 %12943  ;;  %15866 = vmatmul.mubr.msk.f32.vlgmr.msra.gmra.mrb[12].mxu0 %vm102_vm0, %v17802_v33  ;;  %v12946_v46 = vpop.permute.xlu1 %12945 }
 0xbba   :  { %13034 = vmatpush1.msra.mxu0 %v12949_v20  ;;  %v12952_v19 = vsel %vm2551_vm10, %v12944_v26, %v12946_v46  ;;  %13097 = vmatprep.mubr.f32.mxu0 %v16280_v0  ;;  %v12951_v62 = vsel %vm2551_vm10, %v12942_v56, %v12944_v26 }
 0xbbb   :  { %13104 = vmatprep.subr.mxu0 %v12952_v19 }
 0xbbd   :  { %15867 = vmatmul.mubr.msk.f32.vlgmr.msra.gmra.mrb[14].mxu0 %vm102_vm0, %v17802_v33 }
 0xbbe   :  { %13105 = vmatpush1.msra.mxu0 %v12951_v62  ;;  %13168 = vmatprep.mubr.f32.mxu0 %v16280_v0 }
 0xbbf   :  { %15899 = vmatprep.subr.mxu0 %v16280_v0 }
 0xbc1   :  { %15868 = vmatmul.mubr.msk.f32.vlgmr.msra.gmra.mrb[16].mxu0 %vm102_vm0, %v17802_v33 }
 0xbc2   :  { %15901 = vmatprep.mubr.msk.f32.mxu0 %vm16297_vm4, %v16280_v0 }
 0xc8c   :  { %v13028_v13 = vpop.f32.mrb[12].mxu0 }
 0xc8d   :  { %v13181_v40 = vmul.f32 %v18111_v25, %v13028_v13  ;;  %v13030_v60 = vpop.f32.mrb[13].mxu0 }
 0xc8e   :  { %v13182_v9 = vmul.f32 %v18117_v51, %v13030_v60 }
 0xc8f   :  { %v13195_v63 = vmul.f32 %v13181_v40, %v13181_v40 }
 0xc90   :  { %v13187_v16 = vadd.f32 %v13182_v9, %v13181_v40  ;;  %v13196_v18 = vmul.f32 %v13182_v9, %v13182_v9  ;;  %v13099_v33 = vpop.f32.mrb[14].mxu0 }
 0xc91   :  { %v13183_v58 = vmul.f32 %v18123_v52, %v13099_v33  ;;  %v13101_v53 = vpop.f32.mrb[15].mxu0 }
 0xc92   :  { %v13201_v1 = vadd.f32 %v13196_v18, %v13195_v63  ;;  %v13184_v24 = vmul.f32 %v18129_v21, %v13101_v53 }
 0xc93   :  { %v13188_v28 = vadd.f32 %v13187_v16, %v13183_v58  ;;  %v13197_v12 = vmul.f32 %v13183_v58, %v13183_v58 }
 0xc94   :  { %v13198_v29 = vmul.f32 %v13184_v24, %v13184_v24  ;;  %v13170_v23 = vpop.f32.mrb[16].mxu0 }
 0xc95   :  { %v13202_v7 = vadd.f32 %v13201_v1, %v13197_v12  ;;  %v13189_v4 = vadd.f32 %v13188_v28, %v13184_v24  ;;  %v13185_v38 = vmul.f32 %v18135_v37, %v13170_v23  ;;  %v13172_v6 = vpop.f32.mrb[17].mxu0 }
 0xc96   :  { %v13186_v30 = vmul.f32 %v18141_v35, %v13172_v6 }
 0xc97   :  { %v13203_v27 = vadd.f32 %v13202_v7, %v13198_v29  ;;  %v13190_v55 = vadd.f32 %v13189_v4, %v13185_v38  ;;  %v13199_v41 = vmul.f32 %v13185_v38, %v13185_v38 }
 0xc98   :  { %v13200_v39 = vmul.f32 %v13186_v30, %v13186_v30 }
 0xc99   :  { %v13191_v31 = vadd.f32 %v13190_v55, %v13186_v30  ;;  %v13204_v42 = vadd.f32 %v13203_v27, %v13199_v41  ;;  %v13271_v55 = vld [vmem:[%s18459_s4 + $0x8] sm:$0xff] }
 0xc9b   :  { %13192 = vadd.xlane.f32.xlu0 %v13191_v31  ;;  %v13205_v17 = vadd.f32 %v13204_v42, %v13200_v39 }
 0xc9d   :  { %13206 = vadd.xlane.f32.xlu1 %v13205_v17 }
 0xd28   :  { %v13193_v34 = vpop.xlane.xlu0 %13192 }
 0xd29   :  { %v13194_v49 = vmul.f32 0.0022222223, %v13193_v34 }
 0xd2a   :  { %v13207_v47 = vpop.xlane.xlu1 %13206 }
 0xd2b   :  { %v13209_v5 = vmul.f32 %v13194_v49, %v13194_v49  ;;  %v13208_v43 = vmul.f32 0.0022222223, %v13207_v47 }
 0xd2d   :  { %v13210_v22 = vsub.f32 %v13208_v43, %v13209_v5 }
 0xd2f   :  { %v13211_v3 = vadd.f32 1e-05, %v13210_v22 }
 0xd31   :  { %16260 = vrsqrt.f32 %v13211_v3 }
 0xd3b   :  { %v16261_v48 = vpop.eup %16260 }
 0xd3c   :  { %v13213_v57 = vmul.f32 %v17825_v32, %v16261_v48  ;;  %v13270_v48 = vld [vmem:[%s18459_s4] sm:$0xff] }
 0xd3e   :  { %13218 = vperm.xlu0 %16253, %v13213_v57   ;;  %v13214_v11 = vmul.f32 %v13213_v57, %v13194_v49 }
 0xd40   :  { %v13215_v50 = vsub.f32 %v17831_v2, %v13214_v11 }
 0xd42   :  { %13229 = vperm.xlu1 %16252, %v13215_v50   ;;  %13279 = vrot.lane.b32.xlu0 %v16280_v0, %s16281_s30 }
 0xd46   :  { %13521 = vrot.lane.b32.xlu1 %v16280_v0, %s16282_s22  ;;  %13764 = vrot.lane.b32.xlu0 %v16280_v0, %s16283_s0 }
 0xd4a   :  { %14013 = vrot.lane.b32.xlu1 %v16280_v0, %s16285_s24 }
 0xdbd   :  { %v13219_v59 = vpop.permute.xlu0 %13218 }
 0xdbe   :  { %v13221_v15 = vmul.f32 %v13219_v59, %v13181_v40  ;;  %v13222_v32 = vmul.f32 %v13219_v59, %v13182_v9  ;;  %v13223_v36 = vmul.f32 %v13219_v59, %v13183_v58  ;;  %v13224_v56 = vmul.f32 %v13219_v59, %v13184_v24 }
 0xdbf   :  { %v13225_v9 = vmul.f32 %v13219_v59, %v13185_v38  ;;  %v13226_v16 = vmul.f32 %v13219_v59, %v13186_v30 }
 0xdc1   :  { %v13230_v44 = vpop.permute.xlu1 %13229 }
 0xdc2   :  { %v13232_v2 = vmul.f32 %v18111_v25, %v13230_v44  ;;  %v13233_v20 = vmul.f32 %v18117_v51, %v13230_v44  ;;  %v13234_v26 = vmul.f32 %v18123_v52, %v13230_v44  ;;  %v13235_v46 = vmul.f32 %v18129_v21, %v13230_v44 }
 0xdc3   :  { %v13236_v19 = vmul.f32 %v18135_v37, %v13230_v44  ;;  %v13237_v62 = vmul.f32 %v18141_v35, %v13230_v44 }
 0xdc4   :  { %v13238_v13 = vadd.f32 %v13232_v2, %v13221_v15  ;;  %v13239_v60 = vadd.f32 %v13233_v20, %v13222_v32  ;;  %v13240_v63 = vadd.f32 %v13234_v26, %v13223_v36  ;;  %v13241_v40 = vadd.f32 %v13235_v46, %v13224_v56  ;;  %v13763_v46 = vld [vmem:[%s18459_s4 + $0x10] sm:$0xff] }
 0xdc5   :  { %v13242_v58 = vadd.f32 %v13236_v19, %v13225_v9  ;;  %v13243_v53 = vadd.f32 %v13237_v62, %v13226_v16 }
 0xdc6   :  { %v13244_v18 = vmax.f32 %v13238_v13, 0.0  ;;  %v13245_v33 = vmax.f32 %v13239_v60, 0.0  ;;  %v13246_v1 = vmax.f32 %v13240_v63, 0.0  ;;  %v13247_v24 = vmax.f32 %v13241_v40, 0.0 }
 0xdc7   :  { %v13248_v29 = vmax.f32 %v13242_v58, 0.0  ;;  %v13249_v23 = vmax.f32 %v13243_v53, 0.0 }
 0xdc8   :  { %v18161_v28 = vadd.f32 %v13244_v18, %v17849_v61  ;;  %v18164_v12 = vadd.f32 %v13245_v33, %v17852_v8  ;;  %v18171_v7 = vadd.f32 %v13246_v1, %v17859_v54  ;;  %v18174_v4 = vadd.f32 %v13247_v24, %v17862_v45  ;;  %v13280_v54 = vpop.permute.xlu0 %13279  ;;  %v13522_v45 = vpop.permute.xlu1 %13521  ;;  %v14012_v1 = vld [vmem:[%s18459_s4 + $0x18] sm:$0xff] }
 0xdc9   :  { %v18181_v61 = vadd.f32 %v13248_v29, %v17869_v10  ;;  %v18184_v8 = vadd.f32 %v13249_v23, %v17872_v14 }
 0xdca   :  { %13283 = vrot.lane.b32.xlu1 %v18164_v12, %s16281_s30  ;;  %13281 = vrot.lane.b32.xlu0 %v18161_v28, %s16281_s30 }
 0xdcc   :  { %v13765_v10 = vpop.permute.xlu0 %13764  ;;  %v18282_v14 = vpop.permute.xlu1 %14013 }
 0xdce   :  { %13285 = vrot.lane.b32.xlu1 %v18171_v7, %s16281_s30  ;;  %13287 = vrot.lane.b32.xlu0 %v18174_v4, %s16281_s30 }
 0xdd2   :  { %13289 = vrot.lane.b32.xlu1 %v18181_v61, %s16281_s30  ;;  %13291 = vrot.lane.b32.xlu0 %v18184_v8, %s16281_s30 }
 0xdd6   :  { %13523 = vrot.lane.b32.xlu1 %v18161_v28, %s16282_s22  ;;  %13525 = vrot.lane.b32.xlu0 %v18164_v12, %s16282_s22 }
 0xdda   :  { %13529 = vrot.lane.b32.xlu1 %v18174_v4, %s16282_s22  ;;  %13527 = vrot.lane.b32.xlu0 %v18171_v7, %s16282_s22 }
 0xdde   :  { %13533 = vrot.lane.b32.xlu1 %v18184_v8, %s16282_s22  ;;  %13531 = vrot.lane.b32.xlu0 %v18181_v61, %s16282_s22 }
 0xde2   :  { %13768 = vrot.lane.b32.xlu1 %v18164_v12, %s16283_s0  ;;  %13766 = vrot.lane.b32.xlu0 %v18161_v28, %s16283_s0 }
 0xde6   :  { %13770 = vrot.lane.b32.xlu1 %v18171_v7, %s16283_s0  ;;  %13772 = vrot.lane.b32.xlu0 %v18174_v4, %s16283_s0 }
 0xdea   :  { %13774 = vrot.lane.b32.xlu1 %v18181_v61, %s16283_s0  ;;  %13776 = vrot.lane.b32.xlu0 %v18184_v8, %s16283_s0 }
 0xdee   :  { %14015 = vrot.lane.b32.xlu1 %v18161_v28, %s16285_s24  ;;  %14017 = vrot.lane.b32.xlu0 %v18164_v12, %s16285_s24 }
 0xdf2   :  { %14021 = vrot.lane.b32.xlu1 %v18174_v4, %s16285_s24  ;;  %14019 = vrot.lane.b32.xlu0 %v18171_v7, %s16285_s24 }
 0xdf6   :  { %14025 = vrot.lane.b32.xlu1 %v18184_v8, %s16285_s24  ;;  %14023 = vrot.lane.b32.xlu0 %v18181_v61, %s16285_s24 }
 0xdfa   :  { %14747 = vrot.lane.b32.xlu1 %v16280_v0, %s16288_s29  ;;  %14498 = vrot.lane.b32.xlu0 %v16280_v0, %s16286_s27 }
 0xdfe   :  { %14490 = vrot.lane.b32.xlu1 %v18171_v7, %s16286_s27  ;;  %14488 = vrot.lane.b32.xlu0 %v18164_v12, %s16286_s27 }
 0xe02   :  { %14492 = vrot.lane.b32.xlu1 %v18174_v4, %s16286_s27  ;;  %14486 = vrot.lane.b32.xlu0 %v18161_v28, %s16286_s27 }
 0xe06   :  { %14496 = vrot.lane.b32.xlu1 %v18184_v8, %s16286_s27  ;;  %14494 = vrot.lane.b32.xlu0 %v18181_v61, %s16286_s27 }
 0xe0a   :  { %14737 = vrot.lane.b32.xlu1 %v18164_v12, %s16288_s29  ;;  %14739 = vrot.lane.b32.xlu0 %v18171_v7, %s16288_s29 }
 0xe0e   :  { %14735 = vrot.lane.b32.xlu1 %v18161_v28, %s16288_s29  ;;  %14741 = vrot.lane.b32.xlu0 %v18174_v4, %s16288_s29 }
 0xe12   :  { %14743 = vrot.lane.b32.xlu1 %v18181_v61, %s16288_s29  ;;  %14745 = vrot.lane.b32.xlu0 %v18184_v8, %s16288_s29 }
 0xe16   :  { %14988 = vrot.lane.b32.xlu1 %v18171_v7, %s16289_s10  ;;  %14986 = vrot.lane.b32.xlu0 %v18164_v12, %s16289_s10 }
 0xe1a   :  { %14990 = vrot.lane.b32.xlu1 %v18174_v4, %s16289_s10  ;;  %14984 = vrot.lane.b32.xlu0 %v18161_v28, %s16289_s10 }
 0xe1e   :  { %14994 = vrot.lane.b32.xlu1 %v18184_v8, %s16289_s10  ;;  %14992 = vrot.lane.b32.xlu0 %v18181_v61, %s16289_s10 }
 0xe22   :  { %15235 = vrot.lane.b32.xlu1 %v18164_v12, %s16290_s13  ;;  %14996 = vrot.lane.b32.xlu0 %v16280_v0, %s16289_s10 }
 0xe26   :  { %15233 = vrot.lane.b32.xlu1 %v18161_v28, %s16290_s13  ;;  %15237 = vrot.lane.b32.xlu0 %v18171_v7, %s16290_s13 }
 0xe2a   :  { %15241 = vrot.lane.b32.xlu1 %v18181_v61, %s16290_s13  ;;  %15239 = vrot.lane.b32.xlu0 %v18174_v4, %s16290_s13 }
 0xe2e   :  { %15245 = vrot.lane.b32.xlu1 %v16280_v0, %s16290_s13  ;;  %15243 = vrot.lane.b32.xlu0 %v18184_v8, %s16290_s13 }
 0xe3c   :  { %v13282_v38 = vpop.permute.xlu0 %13281  ;;  %v13284_v6 = vpop.permute.xlu1 %13283 }
 0xe3d   :  { %v13293_v30 = vsel %vm89_vm1, %v13280_v54, %v13282_v38  ;;  %v13294_v27 = vsel %vm89_vm1, %v13282_v38, %v13284_v6 }
 0xe3e   :  { %13308 = vmatprep.subr.mxu1 %v13294_v27  ;;  %v14261_v27 = vld [vmem:[%s18459_s4 + $0x20] sm:$0xff] }
 0xe3f   :  { %13309 = vmatpush1.msra.mxu1 %v13293_v30 }
 0xe40   :  { %v13288_v41 = vpop.permute.xlu0 %13287  ;;  %15869 = vmatmul.mubr.msk.f32.vlgmr.msra.gmra.mrb[14].mxu1 %vm102_vm0, %v13271_v55  ;;  %v13286_v39 = vpop.permute.xlu1 %13285 }
 0xe41   :  { %v13295_v31 = vsel %vm89_vm1, %v13284_v6, %v13286_v39  ;;  %v13296_v42 = vsel %vm89_vm1, %v13286_v39, %v13288_v41  ;;  %13443 = vmatprep.mubr.f32.mxu1 %v16280_v0 }
 0xe42   :  { %13379 = vmatprep.subr.mxu1 %v13296_v42 }
 0xe43   :  { %13380 = vmatpush1.msra.mxu1 %v13295_v31 }
 0xe44   :  { %v13292_v17 = vpop.permute.xlu0 %13291  ;;  %15870 = vmatmul.mubr.msk.f32.vlgmr.msra.gmra.mrb[16].mxu1 %vm102_vm0, %v13271_v55  ;;  %v13290_v34 = vpop.permute.xlu1 %13289 }
 0xe45   :  { %v13297_v49 = vsel %vm89_vm1, %v13288_v41, %v13290_v34  ;;  %v13298_v47 = vsel %vm89_vm1, %v13290_v34, %v13292_v17  ;;  %13514 = vmatprep.mubr.f32.mxu1 %v16280_v0 }
 0xe46   :  { %13450 = vmatprep.subr.mxu1 %v13298_v47 }
 0xe47   :  { %13451 = vmatpush1.msra.mxu1 %v13297_v49 }
 0xe48   :  { %v13526_v5 = vpop.permute.xlu0 %13525  ;;  %15871 = vmatmul.mubr.msk.f32.vlgmr.msra.gmra.mrb[18].mxu1 %vm102_vm0, %v13271_v55  ;;  %v13524_v43 = vpop.permute.xlu1 %13523 }
 0xe49   :  { %v13535_v22 = vsel %vm333_vm2, %v13522_v45, %v13524_v43  ;;  %v13536_v3 = vsel %vm333_vm2, %v13524_v43, %v13526_v5  ;;  %13614 = vmatprep.mubr.f32.mxu1 %v16280_v0 }
 0xe4a   :  { %13550 = vmatprep.subr.mxu1 %v13536_v3 }
 0xe4b   :  { %13551 = vmatpush1.msra.mxu1 %v13535_v22 }
 0xe4c   :  { %v13528_v57 = vpop.permute.xlu0 %13527  ;;  %15872 = vmatmul.mubr.msk.f32.vlgmr.msra.gmra.mrb[14].mxu1 %vm102_vm0, %v13270_v48  ;;  %v13530_v11 = vpop.permute.xlu1 %13529 }
 0xe4d   :  { %v13537_v50 = vsel %vm333_vm2, %v13526_v5, %v13528_v57  ;;  %v13538_v59 = vsel %vm333_vm2, %v13528_v57, %v13530_v11  ;;  %13685 = vmatprep.mubr.f32.mxu1 %v16280_v0  ;;  %v14484_v5 = vld [vmem:[%s18459_s4 + $0x28] sm:$0xff] }
 0xe4e   :  { %13621 = vmatprep.subr.mxu1 %v13538_v59 }
 0xe4f   :  { %13622 = vmatpush1.msra.mxu1 %v13537_v50 }
 0xe50   :  { %v13532_v15 = vpop.permute.xlu0 %13531  ;;  %15873 = vmatmul.mubr.msk.f32.vlgmr.msra.gmra.mrb[16].mxu1 %vm102_vm0, %v13270_v48  ;;  %v13534_v32 = vpop.permute.xlu1 %13533 }
 0xe51   :  { %v13539_v36 = vsel %vm333_vm2, %v13530_v11, %v13532_v15  ;;  %v13540_v56 = vsel %vm333_vm2, %v13532_v15, %v13534_v32  ;;  %13756 = vmatprep.mubr.f32.mxu1 %v16280_v0 }
 0xe52   :  { %13692 = vmatprep.subr.mxu1 %v13540_v56 }
 0xe53   :  { %13693 = vmatpush1.msra.mxu1 %v13539_v36 }
 0xe54   :  { %v13767_v44 = vpop.permute.xlu0 %13766  ;;  %15874 = vmatmul.mubr.msk.f32.vlgmr.msra.gmra.mrb[18].mxu1 %vm102_vm0, %v13270_v48  ;;  %v13769_v2 = vpop.permute.xlu1 %13768 }
 0xe55   :  { %v13778_v20 = vsel %vm577_vm3, %v13765_v10, %v13767_v44  ;;  %v13779_v26 = vsel %vm577_vm3, %v13767_v44, %v13769_v2  ;;  %13857 = vmatprep.mubr.f32.mxu1 %v16280_v0  ;;  %v14734_v44 = vld [vmem:[%s18459_s4 + $0x30] sm:$0xff] }
 0xe56   :  { %13793 = vmatprep.subr.mxu1 %v13779_v26 }
 0xe57   :  { %13794 = vmatpush1.msra.mxu1 %v13778_v20 }
 0xe58   :  { %v13773_v19 = vpop.permute.xlu0 %13772  ;;  %15875 = vmatmul.mubr.msk.f32.vlgmr.msra.gmra.mrb[14].mxu1 %vm102_vm0, %v13763_v46  ;;  %v13771_v62 = vpop.permute.xlu1 %13770 }
 0xe59   :  { %v13780_v13 = vsel %vm577_vm3, %v13769_v2, %v13771_v62  ;;  %v13781_v60 = vsel %vm577_vm3, %v13771_v62, %v13773_v19  ;;  %13928 = vmatprep.mubr.f32.mxu1 %v16280_v0 }
 0xe5a   :  { %13864 = vmatprep.subr.mxu1 %v13781_v60 }
 0xe5b   :  { %13865 = vmatpush1.msra.mxu1 %v13780_v13 }
 0xe5c   :  { %v13777_v63 = vpop.permute.xlu0 %13776  ;;  %15876 = vmatmul.mubr.msk.f32.vlgmr.msra.gmra.mrb[16].mxu1 %vm102_vm0, %v13763_v46  ;;  %v13775_v40 = vpop.permute.xlu1 %13774 }
 0xe5d   :  { %v13782_v9 = vsel %vm577_vm3, %v13773_v19, %v13775_v40  ;;  %v13783_v16 = vsel %vm577_vm3, %v13775_v40, %v13777_v63  ;;  %13999 = vmatprep.mubr.f32.mxu1 %v16280_v0 }
 0xe5e   :  { %13935 = vmatprep.subr.mxu1 %v13783_v16 }
 0xe5f   :  { %13936 = vmatpush1.msra.mxu1 %v13782_v9 }
 0xe60   :  { %v14018_v18 = vpop.permute.xlu0 %14017  ;;  %15877 = vmatmul.mubr.msk.f32.vlgmr.msra.gmra.mrb[18].mxu1 %vm102_vm0, %v13763_v46  ;;  %v14016_v33 = vpop.permute.xlu1 %14015 }
 0xe61   :  { %v14027_v58 = vsel %vm1077_vm5, %v18282_v14, %v14016_v33  ;;  %v14028_v53 = vsel %vm1077_vm5, %v14016_v33, %v14018_v18  ;;  %14106 = vmatprep.mubr.f32.mxu1 %v16280_v0 }
 0xe62   :  { %14042 = vmatprep.subr.mxu1 %v14028_v53 }
 0xe63   :  { %14043 = vmatpush1.msra.mxu1 %v14027_v58 }
 0xe64   :  { %v14020_v24 = vpop.permute.xlu0 %14019  ;;  %15878 = vmatmul.mubr.msk.f32.vlgmr.msra.gmra.mrb[14].mxu1 %vm102_vm0, %v14012_v1  ;;  %v14022_v29 = vpop.permute.xlu1 %14021 }
 0xe65   :  { %v14029_v23 = vsel %vm1077_vm5, %v14018_v18, %v14020_v24  ;;  %v14030_v54 = vsel %vm1077_vm5, %v14020_v24, %v14022_v29  ;;  %14177 = vmatprep.mubr.f32.mxu1 %v16280_v0  ;;  %v14983_v18 = vld [vmem:[%s18459_s4 + $0x38] sm:$0xff] }
 0xe66   :  { %14113 = vmatprep.subr.mxu1 %v14030_v54 }
 0xe67   :  { %14114 = vmatpush1.msra.mxu1 %v14029_v23 }
 0xe68   :  { %v14024_v45 = vpop.permute.xlu0 %14023  ;;  %15879 = vmatmul.mubr.msk.f32.vlgmr.msra.gmra.mrb[16].mxu1 %vm102_vm0, %v14012_v1  ;;  %v14026_v10 = vpop.permute.xlu1 %14025 }
 0xe69   :  { %v14031_v14 = vsel %vm1077_vm5, %v14022_v29, %v14024_v45  ;;  %v14032_v38 = vsel %vm1077_vm5, %v14024_v45, %v14026_v10  ;;  %14248 = vmatprep.mubr.f32.mxu1 %v16280_v0 }
 0xe6a   :  { %14184 = vmatprep.subr.mxu1 %v14032_v38 }
 0xe6b   :  { %14185 = vmatpush1.msra.mxu1 %v14031_v14 }
 0xe6c   :  { %v14499_v6 = vpop.permute.xlu0 %14498  ;;  %15880 = vmatmul.mubr.msk.f32.vlgmr.msra.gmra.mrb[18].mxu1 %vm102_vm0, %v14012_v1  ;;  %14265 = vmatprep.subr.mxu1 %v18164_v12  ;;  %v14748_v30 = vpop.permute.xlu1 %14747 }
 0xe6d   :  { %14266 = vmatpush1.msra.mxu1 %v18161_v28  ;;  %14329 = vmatprep.mubr.f32.mxu1 %v16280_v0 }
 0xe6e   :  { %14336 = vmatprep.subr.mxu1 %v18174_v4 }
 0xe70   :  { %v14489_v55 = vpop.permute.xlu0 %14488  ;;  %15881 = vmatmul.mubr.msk.f32.vlgmr.msra.gmra.mrb[14].mxu1 %vm102_vm0, %v14261_v27  ;;  %v14491_v41 = vpop.permute.xlu1 %14490 }
 0xe71   :  { %14337 = vmatpush1.msra.mxu1 %v18171_v7  ;;  %14400 = vmatprep.mubr.f32.mxu1 %v16280_v0  ;;  %v14501_v42 = vsel %vm1551_vm6, %v14489_v55, %v14491_v41 }
 0xe72   :  { %14407 = vmatprep.subr.mxu1 %v18184_v8 }
 0xe74   :  { %v14487_v39 = vpop.permute.xlu0 %14486  ;;  %15882 = vmatmul.mubr.msk.f32.vlgmr.msra.gmra.mrb[16].mxu1 %vm102_vm0, %v14261_v27  ;;  %v14493_v31 = vpop.permute.xlu1 %14492 }
 0xe75   :  { %14408 = vmatpush1.msra.mxu1 %v18181_v61  ;;  %14471 = vmatprep.mubr.f32.mxu1 %v16280_v0  ;;  %v14500_v17 = vsel %vm1551_vm6, %v14487_v39, %v14489_v55  ;;  %v14502_v43 = vsel %vm1551_vm6, %v14491_v41, %v14493_v31 }
 0xe76   :  { %14515 = vmatprep.subr.mxu1 %v14501_v42 }
 0xe78   :  { %v14495_v34 = vpop.permute.xlu0 %14494  ;;  %15883 = vmatmul.mubr.msk.f32.vlgmr.msra.gmra.mrb[18].mxu1 %vm102_vm0, %v14261_v27  ;;  %v14497_v49 = vpop.permute.xlu1 %14496 }
 0xe79   :  { %14516 = vmatpush1.msra.mxu1 %v14500_v17  ;;  %v14503_v47 = vsel %vm1551_vm6, %v14493_v31, %v14495_v34  ;;  %14579 = vmatprep.mubr.f32.mxu1 %v16280_v0  ;;  %v14505_v48 = vsel %vm1551_vm6, %v14497_v49, %v14499_v6  ;;  %v14504_v57 = vsel %vm1551_vm6, %v14495_v34, %v14497_v49  ;;  %v15232_v6 = vld [vmem:[%s18459_s4 + $0x40] sm:$0xff]  ;;  %vm15707_vm6 = vcmask 11264  }
 0xe7a   :  { %14586 = vmatprep.subr.mxu1 %v14503_v47 }
 0xe7c   :  { %v14740_v22 = vpop.permute.xlu0 %14739  ;;  %15884 = vmatmul.mubr.msk.f32.vlgmr.msra.gmra.mrb[14].mxu1 %vm102_vm0, %v14484_v5  ;;  %v14738_v3 = vpop.permute.xlu1 %14737 }
 0xe7d   :  { %14587 = vmatpush1.msra.mxu1 %v14502_v43  ;;  %14650 = vmatprep.mubr.f32.mxu1 %v16280_v0  ;;  %v14750_v59 = vsel %vm2051_vm8, %v14738_v3, %v14740_v22 }
 0xe7e   :  { %14657 = vmatprep.subr.mxu1 %v14505_v48 }
 0xe80   :  { %v14742_v11 = vpop.permute.xlu0 %14741  ;;  %15885 = vmatmul.mubr.msk.f32.vlgmr.msra.gmra.mrb[16].mxu1 %vm102_vm0, %v14484_v5  ;;  %v14736_v50 = vpop.permute.xlu1 %14735 }
 0xe81   :  { %14658 = vmatpush1.msra.mxu1 %v14504_v57  ;;  %14721 = vmatprep.mubr.f32.mxu1 %v16280_v0  ;;  %v14749_v15 = vsel %vm2051_vm8, %v14736_v50, %v14738_v3  ;;  %v14751_v2 = vsel %vm2051_vm8, %v14740_v22, %v14742_v11 }
 0xe82   :  { %14764 = vmatprep.subr.mxu1 %v14750_v59 }
 0xe84   :  { %v14746_v32 = vpop.permute.xlu0 %14745  ;;  %15886 = vmatmul.mubr.msk.f32.vlgmr.msra.gmra.mrb[18].mxu1 %vm102_vm0, %v14484_v5  ;;  %v14744_v36 = vpop.permute.xlu1 %14743 }
 0xe85   :  { %14765 = vmatpush1.msra.mxu1 %v14749_v15  ;;  %v14752_v56 = vsel %vm2051_vm8, %v14742_v11, %v14744_v36  ;;  %14828 = vmatprep.mubr.f32.mxu1 %v16280_v0  ;;  %v14754_v46 = vsel %vm2051_vm8, %v14746_v32, %v14748_v30  ;;  %v14753_v19 = vsel %vm2051_vm8, %v14744_v36, %v14746_v32 }
 0xe86   :  { %14835 = vmatprep.subr.mxu1 %v14752_v56 }
 0xe88   :  { %v14987_v20 = vpop.permute.xlu0 %14986  ;;  %15887 = vmatmul.mubr.msk.f32.vlgmr.msra.gmra.mrb[14].mxu1 %vm102_vm0, %v14734_v44  ;;  %v14989_v26 = vpop.permute.xlu1 %14988 }
 0xe89   :  { %14836 = vmatpush1.msra.mxu1 %v14751_v2  ;;  %14899 = vmatprep.mubr.f32.mxu1 %v16280_v0  ;;  %v14999_v60 = vsel %vm2301_vm9, %v14987_v20, %v14989_v26 }
 0xe8a   :  { %14906 = vmatprep.subr.mxu1 %v14754_v46 }
 0xe8c   :  { %v14985_v62 = vpop.permute.xlu0 %14984  ;;  %15888 = vmatmul.mubr.msk.f32.vlgmr.msra.gmra.mrb[16].mxu1 %vm102_vm0, %v14734_v44  ;;  %v14991_v13 = vpop.permute.xlu1 %14990 }
 0xe8d   :  { %14907 = vmatpush1.msra.mxu1 %v14753_v19  ;;  %14970 = vmatprep.mubr.f32.mxu1 %v16280_v0  ;;  %v14998_v63 = vsel %vm2301_vm9, %v14985_v62, %v14987_v20  ;;  %v15000_v33 = vsel %vm2301_vm9, %v14989_v26, %v14991_v13 }
 0xe8e   :  { %15013 = vmatprep.subr.mxu1 %v14999_v60 }
 0xe90   :  { %v14993_v40 = vpop.permute.xlu0 %14992  ;;  %15889 = vmatmul.mubr.msk.f32.vlgmr.msra.gmra.mrb[18].mxu1 %vm102_vm0, %v14734_v44  ;;  %v14995_v9 = vpop.permute.xlu1 %14994 }
 0xe91   :  { %15014 = vmatpush1.msra.mxu1 %v14998_v63  ;;  %v15001_v16 = vsel %vm2301_vm9, %v14991_v13, %v14993_v40  ;;  %15077 = vmatprep.mubr.f32.mxu1 %v16280_v0  ;;  %v15002_v24 = vsel %vm2301_vm9, %v14993_v40, %v14995_v9 }
 0xe92   :  { %15084 = vmatprep.subr.mxu1 %v15001_v16 }
 0xe94   :  { %v14997_v58 = vpop.permute.xlu0 %14996  ;;  %15890 = vmatmul.mubr.msk.f32.vlgmr.msra.gmra.mrb[14].mxu1 %vm102_vm0, %v14983_v18  ;;  %v15236_v53 = vpop.permute.xlu1 %15235 }
 0xe95   :  { %15085 = vmatpush1.msra.mxu1 %v15000_v33  ;;  %v15003_v1 = vsel %vm2301_vm9, %v14995_v9, %v14997_v58  ;;  %15148 = vmatprep.mubr.f32.mxu1 %v16280_v0 }
 0xe96   :  { %15155 = vmatprep.subr.mxu1 %v15003_v1  ;;  %v16278_v1 = vld [vmem:[%s18460_s5] sm:$0xff] }
 0xe98   :  { %v15238_v29 = vpop.permute.xlu0 %15237  ;;  %15891 = vmatmul.mubr.msk.f32.vlgmr.msra.gmra.mrb[16].mxu1 %vm102_vm0, %v14983_v18  ;;  %v15234_v23 = vpop.permute.xlu1 %15233 }
 0xe99   :  { %15156 = vmatpush1.msra.mxu1 %v15002_v24  ;;  %v15248_v54 = vsel %vm2551_vm10, %v15236_v53, %v15238_v29  ;;  %15219 = vmatprep.mubr.f32.mxu1 %v16280_v0  ;;  %v15247_v45 = vsel %vm2551_vm10, %v15234_v23, %v15236_v53  ;;  %v16279_v23 = vld [vmem:[%s18461_s6] sm:$0xff] }
 0xe9a   :  { %15262 = vmatprep.subr.mxu1 %v15248_v54 }
 0xe9c   :  { %v15240_v10 = vpop.permute.xlu0 %15239  ;;  %15892 = vmatmul.mubr.msk.f32.vlgmr.msra.gmra.mrb[18].mxu1 %vm102_vm0, %v14983_v18  ;;  %v15242_v14 = vpop.permute.xlu1 %15241 }
 0xe9d   :  { %15263 = vmatpush1.msra.mxu1 %v15247_v45  ;;  %v15250_v38 = vsel %vm2551_vm10, %v15240_v10, %v15242_v14  ;;  %15326 = vmatprep.mubr.f32.mxu1 %v16280_v0  ;;  %v15249_v30 = vsel %vm2551_vm10, %v15238_v29, %v15240_v10  ;;  %v15556_v45 = vlaneseq }
 0xe9e   :  { %15333 = vmatprep.subr.mxu1 %v15250_v38 }
 0xe9f   :  { %v15557_v10 = vand.u32 127, %v15556_v45 }
 0xea0   :  { %v15244_v27 = vpop.permute.xlu0 %15243  ;;  %15893 = vmatmul.mubr.msk.f32.vlgmr.msra.gmra.mrb[14].mxu1 %vm102_vm0, %v15232_v6  ;;  %v15246_v55 = vpop.permute.xlu1 %15245 }
 0xea1   :  { %15334 = vmatpush1.msra.mxu1 %v15249_v30  ;;  %v15252_v41 = vsel %vm2551_vm10, %v15244_v27, %v15246_v55  ;;  %15397 = vmatprep.mubr.f32.mxu1 %v16280_v0  ;;  %v15251_v39 = vsel %vm2551_vm10, %v15242_v14, %v15244_v27  ;;  %v15559_v38 = vadd.s32 256, %v15557_v10 }
 0xea2   :  { %15404 = vmatprep.subr.mxu1 %v15252_v41 }
 0xea3   :  { %vm15571_vm1 = vcmp.lt.s32.totalorder %v15559_v38, 324  ;;  %vm15596_vm2 = vcmp.ge.s32.totalorder %v15559_v38, 324 }
 0xea4   :  { %15894 = vmatmul.mubr.msk.f32.vlgmr.msra.gmra.mrb[16].mxu1 %vm102_vm0, %v15232_v6 }
 0xea5   :  { %15405 = vmatpush1.msra.mxu1 %v15251_v39  ;;  %15468 = vmatprep.mubr.f32.mxu1 %v16280_v0 }
 0xea8   :  { %15895 = vmatmul.mubr.msk.f32.vlgmr.msra.gmra.mrb[18].mxu1 %vm102_vm0, %v15232_v6 }
 0xf73   :  { %v15328_v31 = vpop.f32.mrb[14].mxu1 }
 0xf74   :  { %v15481_v42 = vmul.f32 %v18111_v25, %v15328_v31  ;;  %v15330_v17 = vpop.f32.mrb[15].mxu1 }
 0xf75   :  { %v15482_v34 = vmul.f32 %v18117_v51, %v15330_v17 }
 0xf76   :  { %v15495_v49 = vmul.f32 %v15481_v42, %v15481_v42 }
 0xf77   :  { %v15487_v47 = vadd.f32 %v15482_v34, %v15481_v42  ;;  %v15496_v5 = vmul.f32 %v15482_v34, %v15482_v34  ;;  %v15399_v43 = vpop.f32.mrb[16].mxu1 }
 0xf78   :  { %v15483_v22 = vmul.f32 %v18123_v52, %v15399_v43  ;;  %v15401_v3 = vpop.f32.mrb[17].mxu1 }
 0xf79   :  { %v15501_v48 = vadd.f32 %v15496_v5, %v15495_v49  ;;  %v15484_v57 = vmul.f32 %v18129_v21, %v15401_v3 }
 0xf7a   :  { %v15488_v11 = vadd.f32 %v15487_v47, %v15483_v22  ;;  %v15497_v50 = vmul.f32 %v15483_v22, %v15483_v22 }
 0xf7b   :  { %v15498_v59 = vmul.f32 %v15484_v57, %v15484_v57  ;;  %v15470_v15 = vpop.f32.mrb[18].mxu1 }
 0xf7c   :  { %v15502_v32 = vadd.f32 %v15501_v48, %v15497_v50  ;;  %v15489_v36 = vadd.f32 %v15488_v11, %v15484_v57  ;;  %v15485_v56 = vmul.f32 %v18135_v37, %v15470_v15  ;;  %v15472_v44 = vpop.f32.mrb[19].mxu1 }
 0xf7d   :  { %v15486_v2 = vmul.f32 %v18141_v35, %v15472_v44 }
 0xf7e   :  { %v15503_v20 = vadd.f32 %v15502_v32, %v15498_v59  ;;  %v15490_v26 = vadd.f32 %v15489_v36, %v15485_v56  ;;  %v15499_v46 = vmul.f32 %v15485_v56, %v15485_v56 }
 0xf7f   :  { %v15500_v19 = vmul.f32 %v15486_v2, %v15486_v2 }
 0xf80   :  { %v15491_v62 = vadd.f32 %v15490_v26, %v15486_v2  ;;  %v15504_v13 = vadd.f32 %v15503_v20, %v15499_v46 }
 0xf82   :  { %15492 = vadd.xlane.f32.xlu0 %v15491_v62  ;;  %v15505_v60 = vadd.f32 %v15504_v13, %v15500_v19 }
 0xf84   :  { %15506 = vadd.xlane.f32.xlu1 %v15505_v60  ;;  %v15627_v60 = vld [vmem:[%s18463_s7] sm:$0xf] }
0x100f   :  { %v15493_v63 = vpop.xlane.xlu0 %15492 }
0x1010   :  { %v15494_v40 = vmul.f32 0.0022222223, %v15493_v63 }
0x1011   :  { %v15507_v9 = vpop.xlane.xlu1 %15506 }
0x1012   :  { %v15509_v16 = vmul.f32 %v15494_v40, %v15494_v40  ;;  %v15508_v18 = vmul.f32 0.0022222223, %v15507_v9 }
0x1014   :  { %v15510_v33 = vsub.f32 %v15508_v18, %v15509_v16 }
0x1016   :  { %v15511_v58 = vadd.f32 1e-05, %v15510_v33 }
0x1018   :  { %16262 = vrsqrt.f32 %v15511_v58 }
0x1022   :  { %v16263_v53 = vpop.eup %16262 }
0x1023   :  { %v15513_v24 = vmul.f32 %v16278_v1, %v16263_v53 }
0x1025   :  { %15518 = vperm.xlu0 %16253, %v15513_v24   ;;  %v15514_v29 = vmul.f32 %v15513_v24, %v15494_v40 }
0x1027   :  { %v15515_v54 = vsub.f32 %v16279_v23, %v15514_v29 }
0x1029   :  { %15529 = vperm.xlu1 %16252, %v15515_v54  }
0x10a4   :  { %v15519_v14 = vpop.permute.xlu0 %15518 }
0x10a5   :  { %v15521_v6 = vmul.f32 %v15519_v14, %v15481_v42  ;;  %v15522_v30 = vmul.f32 %v15519_v14, %v15482_v34  ;;  %v15524_v27 = vmul.f32 %v15519_v14, %v15484_v57  ;;  %v15525_v55 = vmul.f32 %v15519_v14, %v15485_v56 }
0x10a6   :  { %v15523_v47 = vmul.f32 %v15519_v14, %v15483_v22  ;;  %v15526_v43 = vmul.f32 %v15519_v14, %v15486_v2 }
0x10a8   :  { %v15530_v41 = vpop.permute.xlu1 %15529 }
0x10a9   :  { %v15532_v39 = vmul.f32 %v18111_v25, %v15530_v41  ;;  %v15533_v31 = vmul.f32 %v18117_v51, %v15530_v41  ;;  %v15535_v17 = vmul.f32 %v18129_v21, %v15530_v41  ;;  %v15536_v49 = vmul.f32 %v18135_v37, %v15530_v41 }
0x10aa   :  { %v15534_v5 = vmul.f32 %v18123_v52, %v15530_v41  ;;  %v15537_v3 = vmul.f32 %v18141_v35, %v15530_v41  ;;  %v15562_v51 = vadd.s32 640, %v15557_v10 }
0x10ab   :  { %v15538_v48 = vadd.f32 %v15532_v39, %v15521_v6  ;;  %v15539_v42 = vadd.f32 %v15533_v31, %v15522_v30  ;;  %v15541_v34 = vadd.f32 %v15535_v17, %v15524_v27  ;;  %v15542_v57 = vadd.f32 %v15536_v49, %v15525_v55 }
0x10ac   :  { %v15540_v11 = vadd.f32 %v15534_v5, %v15523_v47  ;;  %v15543_v50 = vadd.f32 %v15537_v3, %v15526_v43  ;;  %vm15605_vm3 = vcmp.lt.s32.totalorder %v15562_v51, 648 }
0x10ad   :  { %v15544_v59 = vmax.f32 %v15538_v48, 0.0  ;;  %v15545_v25 = vmax.f32 %v15539_v42, 0.0  ;;  %v15547_v15 = vmax.f32 %v15541_v34, 0.0  ;;  %v15548_v22 = vmax.f32 %v15542_v57, 0.0 }
0x10ae   :  { %v15546_v32 = vmax.f32 %v15540_v11, 0.0  ;;  %v15549_v21 = vmax.f32 %v15543_v50, 0.0 }
0x10af   :  { %v15550_v37 = vadd.f32 %v15544_v59, %v18161_v28  ;;  %v15551_v52 = vadd.f32 %v15545_v25, %v18164_v12  ;;  %v15553_v35 = vadd.f32 %v15547_v15, %v18174_v4  ;;  %v15554_v46 = vadd.f32 %v15548_v22, %v18181_v61  ;;  %v15628_v12 = vld [vmem:[%s18462_s8] sm:$0xf] }
0x10b0   :  { %v15552_v36 = vadd.f32 %v15546_v32, %v18171_v7  ;;  %v15555_v2 = vadd.f32 %v15549_v21, %v18184_v8 }
0x10b1   :  { %v15587_v56 = vadd.f32 %v15551_v52, %v15550_v37 }
0x10b2   :  { %v15583_v44 = vsel %vm15571_vm1, %v15552_v36, 0.0  ;;  %v15614_v20 = vsel %vm15596_vm2, %v15552_v36, 0.0  ;;  %v15617_v28 = vsel %vm15605_vm3, %v15555_v2, 0.0 }
0x10b3   :  { %v15588_v26 = vadd.f32 %v15587_v56, %v15583_v44  ;;  %v15620_v19 = vadd.f32 %v15614_v20, %v15553_v35 }
0x10b5   :  { %15592 = vadd.xlane.f32.xlu0 %v15588_v26  ;;  %v15621_v62 = vadd.f32 %v15620_v19, %v15554_v46 }
0x10b7   :  { %v15622_v13 = vadd.f32 %v15621_v62, %v15617_v28 }
0x10b9   :  { %15623 = vadd.xlane.f32.xlu1 %v15622_v13 }
0x10cb   :  { %15631 = vperm.xlu0 %16253, %v15628_v12  }
0x1142   :  { %v15593_v7 = vpop.xlane.xlu0 %15592 }
0x1146   :  { %v15624_v4 = vpop.xlane.xlu1 %15623 }
0x1147   :  { %v15625_v8 = vsel %vm1077_vm5, %v15593_v7, %v15624_v4 }
0x1148   :  { %v15626_v61 = vmul.f32 0.0044444446, %v15625_v8 }
0x114a   :  { %15900 = vmatpush3.msra.mxu0 %v15626_v61  ;;  %v15632_v63 = vpop.permute.xlu0 %15631 }
0x114b   :  { %15902 = vmatmul.mubr.msk.f32.vlgmr.msra.gmra.mrb[18].mxu0 %vm102_vm0, %v15627_v60 }
0x121e   :  { %v15703_v40 = vpop.f32.mrb[18].mxu0 }
0x121f   :  { %v15704_v9 = vadd.f32 %v15703_v40, %v15632_v63  ;;  %v15903_v16 = vpop.f32.mrb[19].mxu0 }
0x1221   :  { %15708 = vst.msk [vmem:[%s18464_s9] sm:$0xf] %vm15707_vm6, %v15704_v9 }

</bundles_post_ra>
